<compile_context>
chip_gen: v6e
topology: v6e:2x2x1
jax: 0.10.0
libtpu: 0.0.40
codegen_flags: <defaults>
</compile_context>

<pallas_src>
import math
import functools

import jax
import jax.numpy as jnp
from jax.experimental import pallas as pl
from jax.experimental.pallas import tpu as pltpu


# ---------------------------------------------------------------------------
# In-kernel building blocks (operate on values, not refs)
# ---------------------------------------------------------------------------

def _mha_block(xq, xkv, wq, bq, wk, bk, wv, bv, wo, bo, mask,
               *, n_heads, kdim, vdim):
    """Multi-headed attention + output projection + ReLU for one batch element.

    xq: (S, D) query source.  xkv: (Sm, D) key/value source.
    mask: (S, Sm) float (1 = keep, 0 = masked) or None (no masking).
    """
    S = xq.shape[0]
    Sm = xkv.shape[0]
    D = wo.shape[-1]

    q = jnp.dot(xq, wq, preferred_element_type=jnp.float32) + bq      # (S,  H*kd)
    k = jnp.dot(xkv, wk, preferred_element_type=jnp.float32) + bk     # (Sm, H*kd)
    v = jnp.dot(xkv, wv, preferred_element_type=jnp.float32) + bv     # (Sm, H*vd)

    # Split heads and batch them: (S, H*kd) -> (H, S, kd).
    qh = jnp.transpose(q.reshape(S, n_heads, kdim), (1, 0, 2))        # (H, S,  kd)
    kh = jnp.transpose(k.reshape(Sm, n_heads, kdim), (1, 0, 2))       # (H, Sm, kd)
    vh = jnp.transpose(v.reshape(Sm, n_heads, vdim), (1, 0, 2))       # (H, Sm, vd)

    # All-head scores in one batched contraction, one softmax pass.
    s = jnp.einsum("hqd,hkd->hqk", qh, kh,
                   preferred_element_type=jnp.float32)                # (H, S, Sm)
    if mask is not None:
        s = jnp.where(mask[None, :, :] == 0.0, -jnp.inf, s)
    s = s * (1.0 / math.sqrt(kdim))
    s = s - jnp.max(s, axis=-1, keepdims=True)
    p = jnp.exp(s)
    p = p * pl.reciprocal(jnp.sum(p, axis=-1, keepdims=True), approx=True)

    ctx = jnp.einsum("hqk,hkv->hqv", p, vh,
                     preferred_element_type=jnp.float32)              # (H, S, vd)

    # Output projection accumulated per head (no lane-axis concat):
    #   out[q, d] = sum_h sum_v ctx[h, q, v] * wo[h*vd + v, d]
    wo_h = wo.reshape(n_heads, vdim, D)                               # (H, vd, D)
    proj = jnp.einsum("hqv,hvd->hqd", ctx, wo_h,
                      preferred_element_type=jnp.float32)             # (H, S, D)
    out = jnp.sum(proj, axis=0) + bo
    return jnp.maximum(out, 0.0)                                      # wo ends with ReLU


def _add_ln(x, y, g, b, eps):
    """Residual add + LayerNorm over the last (d_model) axis."""
    z = x + y
    mu = jnp.mean(z, axis=-1, keepdims=True)
    zc = z - mu
    var = jnp.mean(zc * zc, axis=-1, keepdims=True)
    return zc * jax.lax.rsqrt(var + eps) * g + b


# ---------------------------------------------------------------------------
# Fused decoder-stack kernel: one grid step = full stack for one batch element
# ---------------------------------------------------------------------------

def _decoder_stack_kernel(x_ref, mask_ref, *refs,
                          n_layers, n_heads, kdim, vdim, eps):
    (sa_wq, sa_bq, sa_wk, sa_bk, sa_wv, sa_bv, sa_wo, sa_bo,
     ca_wq, ca_bq, ca_wk, ca_bk, ca_wv, ca_bv, ca_wo, ca_bo,
     f_w1, f_b1, f_w2, f_b2,
     g1, bb1, g2, bb2, g3, bb3, o_ref) = refs

    hk = dict(n_heads=n_heads, kdim=kdim, vdim=vdim)
    x = x_ref[0]                 # (S, D), stays resident across the whole stack
    mask = mask_ref[...]         # (S, S)

    for l in range(n_layers):    # static unroll; n_layers is small
        mem = x                  # PyTorch: memory=None -> memory = current trg
        # masked self-attention + residual + LayerNorm
        a1 = _mha_block(x, x, sa_wq[l], sa_bq[l], sa_wk[l], sa_bk[l],
                        sa_wv[l], sa_bv[l], sa_wo[l], sa_bo[l], mask, **hk)
        t1 = _add_ln(x, a1, g1[l], bb1[l], eps)
        # cross-attention (mask=None -> masking statically skipped)
        a2 = _mha_block(t1, mem, ca_wq[l], ca_bq[l], ca_wk[l], ca_bk[l],
                        ca_wv[l], ca_bv[l], ca_wo[l], ca_bo[l], None, **hk)
        t2 = _add_ln(t1, a2, g2[l], bb2[l], eps)
        # feed-forward + residual + LayerNorm
        h = jnp.maximum(
            jnp.dot(t2, f_w1[l], preferred_element_type=jnp.float32) + f_b1[l], 0.0)
        f = jnp.dot(h, f_w2[l], preferred_element_type=jnp.float32) + f_b2[l]
        x = _add_ln(t2, f, g3[l], bb3[l], eps)

    o_ref[0] = x


# ---------------------------------------------------------------------------
# pallas_call wrapper
# ---------------------------------------------------------------------------

_WEIGHT_KEYS = (
    ("sa", "wq"), ("sa", "bq"), ("sa", "wk"), ("sa", "bk"),
    ("sa", "wv"), ("sa", "bv"), ("sa", "wo"), ("sa", "bo"),
    ("ca", "wq"), ("ca", "bq"), ("ca", "wk"), ("ca", "bk"),
    ("ca", "wv"), ("ca", "bv"), ("ca", "wo"), ("ca", "bo"),
    ("ffn", "w1"), ("ffn", "b1"), ("ffn", "w2"), ("ffn", "b2"),
    ("ln1", "g"), ("ln1", "b"), ("ln2", "g"), ("ln2", "b"),
    ("ln3", "g"), ("ln3", "b"),
)


def _full_spec(arr):
    nd = arr.ndim
    return pl.BlockSpec(arr.shape, lambda b, _nd=nd: (0,) * _nd)


def decoder_stack(x, mask, params, cfg):
    """x: (B, S, D) float32, mask: (S, S) float32.  Whole decoder stack, fused."""
    B, S, D = x.shape
    weights = [params[g][n] for (g, n) in _WEIGHT_KEYS]
    kernel = functools.partial(
        _decoder_stack_kernel, n_layers=cfg["n_layers"], n_heads=cfg["n_heads"],
        kdim=cfg["kdim"], vdim=cfg["vdim"], eps=cfg["eps"])
    batched = pl.BlockSpec((1, S, D), lambda b: (b, 0, 0))
    return pl.pallas_call(
        kernel,
        out_shape=jax.ShapeDtypeStruct((B, S, D), jnp.float32),
        grid=(B,),
        in_specs=[batched, _full_spec(mask)] + [_full_spec(w) for w in weights],
        out_specs=batched,
        compiler_params=pltpu.CompilerParams(dimension_semantics=("parallel",)),
    )(x, mask, *weights)


# ---------------------------------------------------------------------------
# Glue: positional encoding, embedding, full forward
# ---------------------------------------------------------------------------

def get_pe(seq_length, d_model):
    """Replicates PosEnc.get_pe exactly."""
    position = jnp.arange(seq_length, dtype=jnp.float32)[:, None]           # (S, 1)
    even_idx = jnp.arange(0, d_model, 2, dtype=jnp.float32)
    odd_idx = jnp.arange(1, d_model, 2, dtype=jnp.float32)
    div_even = 10.0 ** (4.0 * 2.0 * even_idx / d_model)
    div_odd = 10.0 ** (4.0 * 2.0 * odd_idx / d_model)
    pe = jnp.zeros((seq_length, 1, d_model), jnp.float32)
    pe = pe.at[:, 0, 0::2].set(jnp.sin(position / div_even))
    pe = pe.at[:, 0, 1::2].set(jnp.cos(position / div_odd))
    return pe


def decoder_forward(params, src_tokens, mask, cfg):
    """src_tokens: (S, B) int32.  Returns (S, B, D) like the PyTorch module."""
    S, B = src_tokens.shape
    D = cfg["d_model"]
    # Tiny token gather + PE add stays in XLA; the heavy stack runs in Pallas.
    emb = params["embedding"][src_tokens] / math.sqrt(D) + get_pe(S, D)   # (S, B, D)
    x = jnp.transpose(emb, (1, 0, 2))                                     # (B, S, D)
    out = decoder_stack(x, mask, params, cfg)
    return jnp.transpose(out, (1, 0, 2))                                  # (S, B, D)


# ---------------------------------------------------------------------------
# Pure-JAX reference (mirrors the PyTorch graph) for a correctness check
# ---------------------------------------------------------------------------

def _ref_mha(key, query, value, mask, p, cfg):
    hi = jax.lax.Precision.HIGHEST
    lin = lambda x, w, b: jnp.einsum("sbd,dk->sbk", x, w, precision=hi) + b[0]
    K = lin(key, p["wk"], p["bk"])
    Q = lin(query, p["wq"], p["bq"])
    V = lin(value, p["wv"], p["bv"])
    kd, vd, H = cfg["kdim"], cfg["vdim"], cfg["n_heads"]
    outs = []
    for h in range(H):
        qh = jnp.transpose(Q[..., h * kd:(h + 1) * kd], (1, 0, 2))
        kh = jnp.transpose(K[..., h * kd:(h + 1) * kd], (1, 0, 2))
        vh = jnp.transpose(V[..., h * vd:(h + 1) * vd], (1, 0, 2))
        prod = jnp.einsum("bsk,btk->bst", qh, kh, precision=hi)
        if mask is not None:
            prod = jnp.where(mask == 0, -jnp.inf, prod)
        prod = prod / math.sqrt(kd)
        alpha = jax.nn.softmax(prod, axis=-1)
        outs.append(jnp.transpose(jnp.einsum("bst,btv->bsv", alpha, vh, precision=hi), (1, 0, 2)))
    cat = jnp.concatenate(outs, axis=-1)
    return jnp.maximum(jnp.einsum("sbv,vd->sbd", cat, p["wo"], precision=hi) + p["bo"][0], 0.0)


def _ref_ln(x, p, eps):
    mu = jnp.mean(x, -1, keepdims=True)
    var = jnp.mean((x - mu) ** 2, -1, keepdims=True)
    return (x - mu) / jnp.sqrt(var + eps) * p["g"][0] + p["b"][0]


def ref_decoder_forward(params, src_tokens, mask, cfg):
    hi = jax.lax.Precision.HIGHEST
    S, B = src_tokens.shape
    D = cfg["d_model"]
    trg = params["embedding"][src_tokens] / math.sqrt(D) + get_pe(S, D)
    for l in range(cfg["n_layers"]):
        at = lambda grp: {k: v[l] for k, v in params[grp].items()}
        sa, ca, fp = at("sa"), at("ca"), at("ffn")
        ln1, ln2, ln3 = at("ln1"), at("ln2"), at("ln3")
        mem = trg
        t1 = _ref_ln(trg + _ref_mha(trg, trg, trg, mask, sa, cfg), ln1, cfg["eps"])
        t2 = _ref_ln(t1 + _ref_mha(mem, t1, mem, None, ca, cfg), ln2, cfg["eps"])
        h = jnp.maximum(jnp.einsum("sbd,df->sbf", t2, fp["w1"], precision=hi) + fp["b1"][0], 0.0)
        f = jnp.einsum("sbf,fd->sbd", h, fp["w2"], precision=hi) + fp["b2"][0]
        trg = _ref_ln(t2 + f, ln3, cfg["eps"])
    return trg


# ---------------------------------------------------------------------------
# Deterministic parameter init (weights stacked over layers)
# ---------------------------------------------------------------------------

def init_params(key, cfg):
    keys = iter(jax.random.split(key, 256))
    nrm = lambda shape, s=0.05: (s * jax.random.normal(next(keys), shape)).astype(jnp.float32)
    D, H, kd, vd = cfg["d_model"], cfg["n_heads"], cfg["kdim"], cfg["vdim"]
    dff, L = cfg["dff"], cfg["n_layers"]
    Hk, Hv = H * kd, H * vd

    def attn_params():
        return dict(wq=nrm((L, D, Hk)), bq=nrm((L, 1, Hk)),
                    wk=nrm((L, D, Hk)), bk=nrm((L, 1, Hk)),
                    wv=nrm((L, D, Hv)), bv=nrm((L, 1, Hv)),
                    wo=nrm((L, Hv, D)), bo=nrm((L, 1, D)))

    def ln_params():
        return dict(g=jnp.ones((L, 1, D), jnp.float32) + nrm((L, 1, D), 0.01),
                    b=nrm((L, 1, D), 0.01))

    return dict(
        embedding=nrm((cfg["n_tokens"], D), 0.5),
        sa=attn_params(), ca=attn_params(),
        ffn=dict(w1=nrm((L, D, dff)), b1=nrm((L, 1, dff)),
                 w2=nrm((L, dff, D)), b2=nrm((L, 1, D))),
        ln1=ln_params(), ln2=ln_params(), ln3=ln_params(),
    )


# ---------------------------------------------------------------------------
# Main
# ---------------------------------------------------------------------------

if __name__ == "__main__":
    cfg = dict(d_model=128, n_heads=4, vdim=32, kdim=128 // 4, dff=256,
               n_layers=2, n_tokens=50, eps=1e-5)
    S, B = 8, 2

    key = jax.random.PRNGKey(0)
    pkey, tkey = jax.random.split(key)
    params = init_params(pkey, cfg)

    src_tokens = jax.random.randint(tkey, (S, B), 0, cfg["n_tokens"], dtype=jnp.int32)
    causal_mask = jnp.tril(jnp.ones((S, S), jnp.float32))   # 1 = attend, 0 = masked

    run = jax.jit(functools.partial(decoder_forward, cfg=cfg))
    out = jax.block_until_ready(run(params, src_tokens, causal_mask))
    assert out.shape == (S, B, cfg["d_model"]) and out.dtype == jnp.float32

    ref = ref_decoder_forward(params, src_tokens, causal_mask, cfg)
    assert jnp.allclose(out, ref, atol=2e-3, rtol=2e-3), "Pallas output mismatch vs reference"

    # TODO(synk): on v6e/v7x, casting matmul inputs to bf16 (f32 accumulation) would
    # halve weight DMA bytes; kept f32 here to stay within the tight check tolerance.
    print("KERNEL_OK")
</pallas_src>

<mosaic_0001>
module attributes {stable_mosaic.version = 11 : i64} {
  func.func @_decoder_stack_kernel(%arg0: i32, %arg1: memref<1x8x128xf32, #tpu.memory_space<vmem>>, %arg2: memref<8x8xf32, #tpu.memory_space<vmem>>, %arg3: memref<2x128x128xf32, #tpu.memory_space<vmem>>, %arg4: memref<2x1x128xf32, #tpu.memory_space<vmem>>, %arg5: memref<2x128x128xf32, #tpu.memory_space<vmem>>, %arg6: memref<2x1x128xf32, #tpu.memory_space<vmem>>, %arg7: memref<2x128x128xf32, #tpu.memory_space<vmem>>, %arg8: memref<2x1x128xf32, #tpu.memory_space<vmem>>, %arg9: memref<2x128x128xf32, #tpu.memory_space<vmem>>, %arg10: memref<2x1x128xf32, #tpu.memory_space<vmem>>, %arg11: memref<2x128x128xf32, #tpu.memory_space<vmem>>, %arg12: memref<2x1x128xf32, #tpu.memory_space<vmem>>, %arg13: memref<2x128x128xf32, #tpu.memory_space<vmem>>, %arg14: memref<2x1x128xf32, #tpu.memory_space<vmem>>, %arg15: memref<2x128x128xf32, #tpu.memory_space<vmem>>, %arg16: memref<2x1x128xf32, #tpu.memory_space<vmem>>, %arg17: memref<2x128x128xf32, #tpu.memory_space<vmem>>, %arg18: memref<2x1x128xf32, #tpu.memory_space<vmem>>, %arg19: memref<2x128x256xf32, #tpu.memory_space<vmem>>, %arg20: memref<2x1x256xf32, #tpu.memory_space<vmem>>, %arg21: memref<2x256x128xf32, #tpu.memory_space<vmem>>, %arg22: memref<2x1x128xf32, #tpu.memory_space<vmem>>, %arg23: memref<2x1x128xf32, #tpu.memory_space<vmem>>, %arg24: memref<2x1x128xf32, #tpu.memory_space<vmem>>, %arg25: memref<2x1x128xf32, #tpu.memory_space<vmem>>, %arg26: memref<2x1x128xf32, #tpu.memory_space<vmem>>, %arg27: memref<2x1x128xf32, #tpu.memory_space<vmem>>, %arg28: memref<2x1x128xf32, #tpu.memory_space<vmem>>, %arg29: memref<1x8x128xf32, #tpu.memory_space<vmem>>) attributes {dimension_semantics = [#tpu.dimension_semantics<parallel>], iteration_bounds = array<i64: 2>, scalar_prefetch = 0 : i64, scratch_operands = 0 : i64, tpu.core_type = #tpu.core_type<tc>, window_params = [{transform_indices = @transform_0, window_bounds = array<i64: 1, 8, 128>}, {pipeline_mode = #tpu.pipeline_mode<synchronous>, transform_indices = @transform_1, window_bounds = array<i64: 8, 8>}, {pipeline_mode = #tpu.pipeline_mode<synchronous>, transform_indices = @transform_2, window_bounds = array<i64: 2, 128, 128>}, {pipeline_mode = #tpu.pipeline_mode<synchronous>, transform_indices = @transform_3, window_bounds = array<i64: 2, 1, 128>}, {pipeline_mode = #tpu.pipeline_mode<synchronous>, transform_indices = @transform_4, window_bounds = array<i64: 2, 128, 128>}, {pipeline_mode = #tpu.pipeline_mode<synchronous>, transform_indices = @transform_5, window_bounds = array<i64: 2, 1, 128>}, {pipeline_mode = #tpu.pipeline_mode<synchronous>, transform_indices = @transform_6, window_bounds = array<i64: 2, 128, 128>}, {pipeline_mode = #tpu.pipeline_mode<synchronous>, transform_indices = @transform_7, window_bounds = array<i64: 2, 1, 128>}, {pipeline_mode = #tpu.pipeline_mode<synchronous>, transform_indices = @transform_8, window_bounds = array<i64: 2, 128, 128>}, {pipeline_mode = #tpu.pipeline_mode<synchronous>, transform_indices = @transform_9, window_bounds = array<i64: 2, 1, 128>}, {pipeline_mode = #tpu.pipeline_mode<synchronous>, transform_indices = @transform_10, window_bounds = array<i64: 2, 128, 128>}, {pipeline_mode = #tpu.pipeline_mode<synchronous>, transform_indices = @transform_11, window_bounds = array<i64: 2, 1, 128>}, {pipeline_mode = #tpu.pipeline_mode<synchronous>, transform_indices = @transform_12, window_bounds = array<i64: 2, 128, 128>}, {pipeline_mode = #tpu.pipeline_mode<synchronous>, transform_indices = @transform_13, window_bounds = array<i64: 2, 1, 128>}, {pipeline_mode = #tpu.pipeline_mode<synchronous>, transform_indices = @transform_14, window_bounds = array<i64: 2, 128, 128>}, {pipeline_mode = #tpu.pipeline_mode<synchronous>, transform_indices = @transform_15, window_bounds = array<i64: 2, 1, 128>}, {pipeline_mode = #tpu.pipeline_mode<synchronous>, transform_indices = @transform_16, window_bounds = array<i64: 2, 128, 128>}, {pipeline_mode = #tpu.pipeline_mode<synchronous>, transform_indices = @transform_17, window_bounds = array<i64: 2, 1, 128>}, {pipeline_mode = #tpu.pipeline_mode<synchronous>, transform_indices = @transform_18, window_bounds = array<i64: 2, 128, 256>}, {pipeline_mode = #tpu.pipeline_mode<synchronous>, transform_indices = @transform_19, window_bounds = array<i64: 2, 1, 256>}, {pipeline_mode = #tpu.pipeline_mode<synchronous>, transform_indices = @transform_20, window_bounds = array<i64: 2, 256, 128>}, {pipeline_mode = #tpu.pipeline_mode<synchronous>, transform_indices = @transform_21, window_bounds = array<i64: 2, 1, 128>}, {pipeline_mode = #tpu.pipeline_mode<synchronous>, transform_indices = @transform_22, window_bounds = array<i64: 2, 1, 128>}, {pipeline_mode = #tpu.pipeline_mode<synchronous>, transform_indices = @transform_23, window_bounds = array<i64: 2, 1, 128>}, {pipeline_mode = #tpu.pipeline_mode<synchronous>, transform_indices = @transform_24, window_bounds = array<i64: 2, 1, 128>}, {pipeline_mode = #tpu.pipeline_mode<synchronous>, transform_indices = @transform_25, window_bounds = array<i64: 2, 1, 128>}, {pipeline_mode = #tpu.pipeline_mode<synchronous>, transform_indices = @transform_26, window_bounds = array<i64: 2, 1, 128>}, {pipeline_mode = #tpu.pipeline_mode<synchronous>, transform_indices = @transform_27, window_bounds = array<i64: 2, 1, 128>}, {transform_indices = @transform_28, window_bounds = array<i64: 1, 8, 128>}]} {
    %c0 = arith.constant 0 : index
    %c0_0 = arith.constant 0 : index
    %c0_1 = arith.constant 0 : index
    %0 = vector.load %arg1[%c0, %c0_0, %c0_1] : memref<1x8x128xf32, #tpu.memory_space<vmem>>, vector<1x8x128xf32>
    %1 = vector.shape_cast %0 : vector<1x8x128xf32> to vector<8x128xf32>
    %c0_2 = arith.constant 0 : index
    %c0_3 = arith.constant 0 : index
    %2 = vector.load %arg2[%c0_2, %c0_3] : memref<8x8xf32, #tpu.memory_space<vmem>>, vector<8x8xf32>
    %c0_4 = arith.constant 0 : index
    %c0_5 = arith.constant 0 : index
    %c0_6 = arith.constant 0 : index
    %3 = vector.load %arg3[%c0_4, %c0_5, %c0_6] : memref<2x128x128xf32, #tpu.memory_space<vmem>>, vector<1x128x128xf32>
    %4 = vector.shape_cast %3 : vector<1x128x128xf32> to vector<128x128xf32>
    %c0_7 = arith.constant 0 : index
    %c0_8 = arith.constant 0 : index
    %c0_9 = arith.constant 0 : index
    %5 = vector.load %arg4[%c0_7, %c0_8, %c0_9] : memref<2x1x128xf32, #tpu.memory_space<vmem>>, vector<1x1x128xf32>
    %6 = vector.shape_cast %5 : vector<1x1x128xf32> to vector<1x128xf32>
    %c0_10 = arith.constant 0 : index
    %c0_11 = arith.constant 0 : index
    %c0_12 = arith.constant 0 : index
    %7 = vector.load %arg5[%c0_10, %c0_11, %c0_12] : memref<2x128x128xf32, #tpu.memory_space<vmem>>, vector<1x128x128xf32>
    %8 = vector.shape_cast %7 : vector<1x128x128xf32> to vector<128x128xf32>
    %c0_13 = arith.constant 0 : index
    %c0_14 = arith.constant 0 : index
    %c0_15 = arith.constant 0 : index
    %9 = vector.load %arg6[%c0_13, %c0_14, %c0_15] : memref<2x1x128xf32, #tpu.memory_space<vmem>>, vector<1x1x128xf32>
    %10 = vector.shape_cast %9 : vector<1x1x128xf32> to vector<1x128xf32>
    %c0_16 = arith.constant 0 : index
    %c0_17 = arith.constant 0 : index
    %c0_18 = arith.constant 0 : index
    %11 = vector.load %arg7[%c0_16, %c0_17, %c0_18] : memref<2x128x128xf32, #tpu.memory_space<vmem>>, vector<1x128x128xf32>
    %12 = vector.shape_cast %11 : vector<1x128x128xf32> to vector<128x128xf32>
    %c0_19 = arith.constant 0 : index
    %c0_20 = arith.constant 0 : index
    %c0_21 = arith.constant 0 : index
    %13 = vector.load %arg8[%c0_19, %c0_20, %c0_21] : memref<2x1x128xf32, #tpu.memory_space<vmem>>, vector<1x1x128xf32>
    %14 = vector.shape_cast %13 : vector<1x1x128xf32> to vector<1x128xf32>
    %c0_22 = arith.constant 0 : index
    %c0_23 = arith.constant 0 : index
    %c0_24 = arith.constant 0 : index
    %15 = vector.load %arg9[%c0_22, %c0_23, %c0_24] : memref<2x128x128xf32, #tpu.memory_space<vmem>>, vector<1x128x128xf32>
    %16 = vector.shape_cast %15 : vector<1x128x128xf32> to vector<128x128xf32>
    %c0_25 = arith.constant 0 : index
    %c0_26 = arith.constant 0 : index
    %c0_27 = arith.constant 0 : index
    %17 = vector.load %arg10[%c0_25, %c0_26, %c0_27] : memref<2x1x128xf32, #tpu.memory_space<vmem>>, vector<1x1x128xf32>
    %18 = vector.shape_cast %17 : vector<1x1x128xf32> to vector<1x128xf32>
    %cst = arith.constant dense<0.000000e+00> : vector<8x128xf32>
    %19 = tpu.matmul %1, %4, %cst {dimension_numbers = #tpu.dot_dimension_numbers<[1], [0], [0], [1], [0, 0, 1, 1], [], []>} : vector<8x128xf32>, vector<128x128xf32>, vector<8x128xf32> -> vector<8x128xf32>
    %20 = vector.broadcast %6 : vector<1x128xf32> to vector<8x128xf32>
    %21 = arith.addf %19, %20 : vector<8x128xf32>
    %cst_28 = arith.constant dense<0.000000e+00> : vector<8x128xf32>
    %22 = tpu.matmul %1, %8, %cst_28 {dimension_numbers = #tpu.dot_dimension_numbers<[1], [0], [0], [1], [0, 0, 1, 1], [], []>} : vector<8x128xf32>, vector<128x128xf32>, vector<8x128xf32> -> vector<8x128xf32>
    %23 = vector.broadcast %10 : vector<1x128xf32> to vector<8x128xf32>
    %24 = arith.addf %22, %23 : vector<8x128xf32>
    %cst_29 = arith.constant dense<0.000000e+00> : vector<8x128xf32>
    %25 = tpu.matmul %1, %12, %cst_29 {dimension_numbers = #tpu.dot_dimension_numbers<[1], [0], [0], [1], [0, 0, 1, 1], [], []>} : vector<8x128xf32>, vector<128x128xf32>, vector<8x128xf32> -> vector<8x128xf32>
    %26 = vector.broadcast %14 : vector<1x128xf32> to vector<8x128xf32>
    %27 = arith.addf %25, %26 : vector<8x128xf32>
    %28 = vector.shape_cast %21 : vector<8x128xf32> to vector<8x4x32xf32>
    %29 = tpu.transpose %28, [1, 0, 2] : vector<8x4x32xf32> -> vector<4x8x32xf32>
    %30 = vector.shape_cast %24 : vector<8x128xf32> to vector<8x4x32xf32>
    %31 = tpu.transpose %30, [1, 0, 2] : vector<8x4x32xf32> -> vector<4x8x32xf32>
    %32 = vector.shape_cast %27 : vector<8x128xf32> to vector<8x4x32xf32>
    %33 = tpu.transpose %32, [1, 0, 2] : vector<8x4x32xf32> -> vector<4x8x32xf32>
    "tpu.trace_start"() <{level = 10 : i32, message = "hqd,hkd->hqk"}> : () -> ()
    %cst_30 = arith.constant dense<0.000000e+00> : vector<4x8x8xf32>
    %34 = tpu.matmul %29, %31, %cst_30 {dimension_numbers = #tpu.dot_dimension_numbers<[2], [2], [1], [1], [0, 0, 0, 1, 1, 1], [0], [0]>} : vector<4x8x32xf32>, vector<4x8x32xf32>, vector<4x8x8xf32> -> vector<4x8x8xf32>
    "tpu.trace_stop"() : () -> ()
    %35 = vector.shape_cast %2 : vector<8x8xf32> to vector<1x8x8xf32>
    %cst_31 = arith.constant 0.000000e+00 : f32
    %36 = vector.broadcast %cst_31 : f32 to vector<1x8x8xf32>
    %37 = arith.cmpf oeq, %35, %36 : vector<1x8x8xf32>
    %cst_32 = arith.constant 0xFF800000 : f32
    %38 = vector.shape_cast %37 : vector<1x8x8xi1> to vector<1x8x8xi1>
    %39 = vector.broadcast %38 : vector<1x8x8xi1> to vector<4x8x8xi1>
    %40 = vector.broadcast %cst_32 : f32 to vector<4x8x8xf32>
    %41 = arith.select %39, %40, %34 : vector<4x8x8xi1>, vector<4x8x8xf32>
    %cst_33 = arith.constant 0.176776692 : f32
    %42 = vector.broadcast %cst_33 : f32 to vector<4x8x8xf32>
    %43 = arith.mulf %41, %42 : vector<4x8x8xf32>
    %cst_34 = arith.constant dense<0xFF800000> : vector<4x8xf32>
    %44 = vector.multi_reduction <maximumf>, %43, %cst_34 [2] : vector<4x8x8xf32> to vector<4x8xf32>
    %45 = vector.shape_cast %44 : vector<4x8xf32> to vector<4x8x1xf32>
    %46 = vector.broadcast %45 : vector<4x8x1xf32> to vector<4x8x8xf32>
    %47 = arith.subf %43, %46 : vector<4x8x8xf32>
    %48 = math.exp %47 : vector<4x8x8xf32>
    %cst_35 = arith.constant dense<0.000000e+00> : vector<4x8xf32>
    %49 = vector.multi_reduction <add>, %48, %cst_35 [2] : vector<4x8x8xf32> to vector<4x8xf32>
    %50 = vector.shape_cast %49 : vector<4x8xf32> to vector<4x8x1xf32>
    %51 = tpu.reciprocal %50 {approx = true} : vector<4x8x1xf32> -> vector<4x8x1xf32>
    %52 = vector.broadcast %51 : vector<4x8x1xf32> to vector<4x8x8xf32>
    %53 = arith.mulf %48, %52 : vector<4x8x8xf32>
    "tpu.trace_start"() <{level = 10 : i32, message = "hqk,hkv->hqv"}> : () -> ()
    %cst_36 = arith.constant dense<0.000000e+00> : vector<4x8x32xf32>
    %54 = tpu.matmul %53, %33, %cst_36 {dimension_numbers = #tpu.dot_dimension_numbers<[2], [1], [1], [2], [0, 0, 0, 1, 1, 2], [0], [0]>} : vector<4x8x8xf32>, vector<4x8x32xf32>, vector<4x8x32xf32> -> vector<4x8x32xf32>
    "tpu.trace_stop"() : () -> ()
    %55 = vector.shape_cast %16 : vector<128x128xf32> to vector<4x32x128xf32>
    "tpu.trace_start"() <{level = 10 : i32, message = "hqv,hvd->hqd"}> : () -> ()
    %cst_37 = arith.constant dense<0.000000e+00> : vector<4x8x128xf32>
    %56 = tpu.matmul %54, %55, %cst_37 {dimension_numbers = #tpu.dot_dimension_numbers<[2], [1], [1], [2], [0, 0, 0, 1, 1, 2], [0], [0]>} : vector<4x8x32xf32>, vector<4x32x128xf32>, vector<4x8x128xf32> -> vector<4x8x128xf32>
    "tpu.trace_stop"() : () -> ()
    %cst_38 = arith.constant dense<0.000000e+00> : vector<8x128xf32>
    %57 = vector.multi_reduction <add>, %56, %cst_38 [0] : vector<4x8x128xf32> to vector<8x128xf32>
    %58 = vector.broadcast %18 : vector<1x128xf32> to vector<8x128xf32>
    %59 = arith.addf %57, %58 : vector<8x128xf32>
    %cst_39 = arith.constant 0.000000e+00 : f32
    %60 = vector.broadcast %cst_39 : f32 to vector<8x128xf32>
    %61 = arith.maximumf %59, %60 : vector<8x128xf32>
    %c0_40 = arith.constant 0 : index
    %c0_41 = arith.constant 0 : index
    %c0_42 = arith.constant 0 : index
    %62 = vector.load %arg23[%c0_40, %c0_41, %c0_42] : memref<2x1x128xf32, #tpu.memory_space<vmem>>, vector<1x1x128xf32>
    %63 = vector.shape_cast %62 : vector<1x1x128xf32> to vector<1x128xf32>
    %c0_43 = arith.constant 0 : index
    %c0_44 = arith.constant 0 : index
    %c0_45 = arith.constant 0 : index
    %64 = vector.load %arg24[%c0_43, %c0_44, %c0_45] : memref<2x1x128xf32, #tpu.memory_space<vmem>>, vector<1x1x128xf32>
    %65 = vector.shape_cast %64 : vector<1x1x128xf32> to vector<1x128xf32>
    %66 = arith.addf %1, %61 : vector<8x128xf32>
    %cst_46 = arith.constant dense<0.000000e+00> : vector<8xf32>
    %67 = vector.multi_reduction <add>, %66, %cst_46 [1] : vector<8x128xf32> to vector<8xf32>
    %68 = vector.shape_cast %67 : vector<8xf32> to vector<8x1xf32>
    %cst_47 = arith.constant 1.280000e+02 : f32
    %69 = vector.broadcast %cst_47 : f32 to vector<8x1xf32>
    %70 = arith.divf %68, %69 : vector<8x1xf32>
    %71 = vector.broadcast %70 : vector<8x1xf32> to vector<8x128xf32>
    %72 = arith.subf %66, %71 : vector<8x128xf32>
    %73 = arith.mulf %72, %72 : vector<8x128xf32>
    %cst_48 = arith.constant dense<0.000000e+00> : vector<8xf32>
    %74 = vector.multi_reduction <add>, %73, %cst_48 [1] : vector<8x128xf32> to vector<8xf32>
    %75 = vector.shape_cast %74 : vector<8xf32> to vector<8x1xf32>
    %cst_49 = arith.constant 1.280000e+02 : f32
    %76 = vector.broadcast %cst_49 : f32 to vector<8x1xf32>
    %77 = arith.divf %75, %76 : vector<8x1xf32>
    %cst_50 = arith.constant 9.99999974E-6 : f32
    %78 = vector.broadcast %cst_50 : f32 to vector<8x1xf32>
    %79 = arith.addf %77, %78 : vector<8x1xf32>
    %80 = math.rsqrt %79 : vector<8x1xf32>
    %81 = vector.broadcast %80 : vector<8x1xf32> to vector<8x128xf32>
    %82 = arith.mulf %72, %81 : vector<8x128xf32>
    %83 = vector.broadcast %63 : vector<1x128xf32> to vector<8x128xf32>
    %84 = arith.mulf %82, %83 : vector<8x128xf32>
    %85 = vector.broadcast %65 : vector<1x128xf32> to vector<8x128xf32>
    %86 = arith.addf %84, %85 : vector<8x128xf32>
    %c0_51 = arith.constant 0 : index
    %c0_52 = arith.constant 0 : index
    %c0_53 = arith.constant 0 : index
    %87 = vector.load %arg11[%c0_51, %c0_52, %c0_53] : memref<2x128x128xf32, #tpu.memory_space<vmem>>, vector<1x128x128xf32>
    %88 = vector.shape_cast %87 : vector<1x128x128xf32> to vector<128x128xf32>
    %c0_54 = arith.constant 0 : index
    %c0_55 = arith.constant 0 : index
    %c0_56 = arith.constant 0 : index
    %89 = vector.load %arg12[%c0_54, %c0_55, %c0_56] : memref<2x1x128xf32, #tpu.memory_space<vmem>>, vector<1x1x128xf32>
    %90 = vector.shape_cast %89 : vector<1x1x128xf32> to vector<1x128xf32>
    %c0_57 = arith.constant 0 : index
    %c0_58 = arith.constant 0 : index
    %c0_59 = arith.constant 0 : index
    %91 = vector.load %arg13[%c0_57, %c0_58, %c0_59] : memref<2x128x128xf32, #tpu.memory_space<vmem>>, vector<1x128x128xf32>
    %92 = vector.shape_cast %91 : vector<1x128x128xf32> to vector<128x128xf32>
    %c0_60 = arith.constant 0 : index
    %c0_61 = arith.constant 0 : index
    %c0_62 = arith.constant 0 : index
    %93 = vector.load %arg14[%c0_60, %c0_61, %c0_62] : memref<2x1x128xf32, #tpu.memory_space<vmem>>, vector<1x1x128xf32>
    %94 = vector.shape_cast %93 : vector<1x1x128xf32> to vector<1x128xf32>
    %c0_63 = arith.constant 0 : index
    %c0_64 = arith.constant 0 : index
    %c0_65 = arith.constant 0 : index
    %95 = vector.load %arg15[%c0_63, %c0_64, %c0_65] : memref<2x128x128xf32, #tpu.memory_space<vmem>>, vector<1x128x128xf32>
    %96 = vector.shape_cast %95 : vector<1x128x128xf32> to vector<128x128xf32>
    %c0_66 = arith.constant 0 : index
    %c0_67 = arith.constant 0 : index
    %c0_68 = arith.constant 0 : index
    %97 = vector.load %arg16[%c0_66, %c0_67, %c0_68] : memref<2x1x128xf32, #tpu.memory_space<vmem>>, vector<1x1x128xf32>
    %98 = vector.shape_cast %97 : vector<1x1x128xf32> to vector<1x128xf32>
    %c0_69 = arith.constant 0 : index
    %c0_70 = arith.constant 0 : index
    %c0_71 = arith.constant 0 : index
    %99 = vector.load %arg17[%c0_69, %c0_70, %c0_71] : memref<2x128x128xf32, #tpu.memory_space<vmem>>, vector<1x128x128xf32>
    %100 = vector.shape_cast %99 : vector<1x128x128xf32> to vector<128x128xf32>
    %c0_72 = arith.constant 0 : index
    %c0_73 = arith.constant 0 : index
    %c0_74 = arith.constant 0 : index
    %101 = vector.load %arg18[%c0_72, %c0_73, %c0_74] : memref<2x1x128xf32, #tpu.memory_space<vmem>>, vector<1x1x128xf32>
    %102 = vector.shape_cast %101 : vector<1x1x128xf32> to vector<1x128xf32>
    %cst_75 = arith.constant dense<0.000000e+00> : vector<8x128xf32>
    %103 = tpu.matmul %86, %88, %cst_75 {dimension_numbers = #tpu.dot_dimension_numbers<[1], [0], [0], [1], [0, 0, 1, 1], [], []>} : vector<8x128xf32>, vector<128x128xf32>, vector<8x128xf32> -> vector<8x128xf32>
    %104 = vector.broadcast %90 : vector<1x128xf32> to vector<8x128xf32>
    %105 = arith.addf %103, %104 : vector<8x128xf32>
    %cst_76 = arith.constant dense<0.000000e+00> : vector<8x128xf32>
    %106 = tpu.matmul %1, %92, %cst_76 {dimension_numbers = #tpu.dot_dimension_numbers<[1], [0], [0], [1], [0, 0, 1, 1], [], []>} : vector<8x128xf32>, vector<128x128xf32>, vector<8x128xf32> -> vector<8x128xf32>
    %107 = vector.broadcast %94 : vector<1x128xf32> to vector<8x128xf32>
    %108 = arith.addf %106, %107 : vector<8x128xf32>
    %cst_77 = arith.constant dense<0.000000e+00> : vector<8x128xf32>
    %109 = tpu.matmul %1, %96, %cst_77 {dimension_numbers = #tpu.dot_dimension_numbers<[1], [0], [0], [1], [0, 0, 1, 1], [], []>} : vector<8x128xf32>, vector<128x128xf32>, vector<8x128xf32> -> vector<8x128xf32>
    %110 = vector.broadcast %98 : vector<1x128xf32> to vector<8x128xf32>
    %111 = arith.addf %109, %110 : vector<8x128xf32>
    %112 = vector.shape_cast %105 : vector<8x128xf32> to vector<8x4x32xf32>
    %113 = tpu.transpose %112, [1, 0, 2] : vector<8x4x32xf32> -> vector<4x8x32xf32>
    %114 = vector.shape_cast %108 : vector<8x128xf32> to vector<8x4x32xf32>
    %115 = tpu.transpose %114, [1, 0, 2] : vector<8x4x32xf32> -> vector<4x8x32xf32>
    %116 = vector.shape_cast %111 : vector<8x128xf32> to vector<8x4x32xf32>
    %117 = tpu.transpose %116, [1, 0, 2] : vector<8x4x32xf32> -> vector<4x8x32xf32>
    "tpu.trace_start"() <{level = 10 : i32, message = "hqd,hkd->hqk"}> : () -> ()
    %cst_78 = arith.constant dense<0.000000e+00> : vector<4x8x8xf32>
    %118 = tpu.matmul %113, %115, %cst_78 {dimension_numbers = #tpu.dot_dimension_numbers<[2], [2], [1], [1], [0, 0, 0, 1, 1, 1], [0], [0]>} : vector<4x8x32xf32>, vector<4x8x32xf32>, vector<4x8x8xf32> -> vector<4x8x8xf32>
    "tpu.trace_stop"() : () -> ()
    %cst_79 = arith.constant 0.176776692 : f32
    %119 = vector.broadcast %cst_79 : f32 to vector<4x8x8xf32>
    %120 = arith.mulf %118, %119 : vector<4x8x8xf32>
    %cst_80 = arith.constant dense<0xFF800000> : vector<4x8xf32>
    %121 = vector.multi_reduction <maximumf>, %120, %cst_80 [2] : vector<4x8x8xf32> to vector<4x8xf32>
    %122 = vector.shape_cast %121 : vector<4x8xf32> to vector<4x8x1xf32>
    %123 = vector.broadcast %122 : vector<4x8x1xf32> to vector<4x8x8xf32>
    %124 = arith.subf %120, %123 : vector<4x8x8xf32>
    %125 = math.exp %124 : vector<4x8x8xf32>
    %cst_81 = arith.constant dense<0.000000e+00> : vector<4x8xf32>
    %126 = vector.multi_reduction <add>, %125, %cst_81 [2] : vector<4x8x8xf32> to vector<4x8xf32>
    %127 = vector.shape_cast %126 : vector<4x8xf32> to vector<4x8x1xf32>
    %128 = tpu.reciprocal %127 {approx = true} : vector<4x8x1xf32> -> vector<4x8x1xf32>
    %129 = vector.broadcast %128 : vector<4x8x1xf32> to vector<4x8x8xf32>
    %130 = arith.mulf %125, %129 : vector<4x8x8xf32>
    "tpu.trace_start"() <{level = 10 : i32, message = "hqk,hkv->hqv"}> : () -> ()
    %cst_82 = arith.constant dense<0.000000e+00> : vector<4x8x32xf32>
    %131 = tpu.matmul %130, %117, %cst_82 {dimension_numbers = #tpu.dot_dimension_numbers<[2], [1], [1], [2], [0, 0, 0, 1, 1, 2], [0], [0]>} : vector<4x8x8xf32>, vector<4x8x32xf32>, vector<4x8x32xf32> -> vector<4x8x32xf32>
    "tpu.trace_stop"() : () -> ()
    %132 = vector.shape_cast %100 : vector<128x128xf32> to vector<4x32x128xf32>
    "tpu.trace_start"() <{level = 10 : i32, message = "hqv,hvd->hqd"}> : () -> ()
    %cst_83 = arith.constant dense<0.000000e+00> : vector<4x8x128xf32>
    %133 = tpu.matmul %131, %132, %cst_83 {dimension_numbers = #tpu.dot_dimension_numbers<[2], [1], [1], [2], [0, 0, 0, 1, 1, 2], [0], [0]>} : vector<4x8x32xf32>, vector<4x32x128xf32>, vector<4x8x128xf32> -> vector<4x8x128xf32>
    "tpu.trace_stop"() : () -> ()
    %cst_84 = arith.constant dense<0.000000e+00> : vector<8x128xf32>
    %134 = vector.multi_reduction <add>, %133, %cst_84 [0] : vector<4x8x128xf32> to vector<8x128xf32>
    %135 = vector.broadcast %102 : vector<1x128xf32> to vector<8x128xf32>
    %136 = arith.addf %134, %135 : vector<8x128xf32>
    %cst_85 = arith.constant 0.000000e+00 : f32
    %137 = vector.broadcast %cst_85 : f32 to vector<8x128xf32>
    %138 = arith.maximumf %136, %137 : vector<8x128xf32>
    %c0_86 = arith.constant 0 : index
    %c0_87 = arith.constant 0 : index
    %c0_88 = arith.constant 0 : index
    %139 = vector.load %arg25[%c0_86, %c0_87, %c0_88] : memref<2x1x128xf32, #tpu.memory_space<vmem>>, vector<1x1x128xf32>
    %140 = vector.shape_cast %139 : vector<1x1x128xf32> to vector<1x128xf32>
    %c0_89 = arith.constant 0 : index
    %c0_90 = arith.constant 0 : index
    %c0_91 = arith.constant 0 : index
    %141 = vector.load %arg26[%c0_89, %c0_90, %c0_91] : memref<2x1x128xf32, #tpu.memory_space<vmem>>, vector<1x1x128xf32>
    %142 = vector.shape_cast %141 : vector<1x1x128xf32> to vector<1x128xf32>
    %143 = arith.addf %86, %138 : vector<8x128xf32>
    %cst_92 = arith.constant dense<0.000000e+00> : vector<8xf32>
    %144 = vector.multi_reduction <add>, %143, %cst_92 [1] : vector<8x128xf32> to vector<8xf32>
    %145 = vector.shape_cast %144 : vector<8xf32> to vector<8x1xf32>
    %cst_93 = arith.constant 1.280000e+02 : f32
    %146 = vector.broadcast %cst_93 : f32 to vector<8x1xf32>
    %147 = arith.divf %145, %146 : vector<8x1xf32>
    %148 = vector.broadcast %147 : vector<8x1xf32> to vector<8x128xf32>
    %149 = arith.subf %143, %148 : vector<8x128xf32>
    %150 = arith.mulf %149, %149 : vector<8x128xf32>
    %cst_94 = arith.constant dense<0.000000e+00> : vector<8xf32>
    %151 = vector.multi_reduction <add>, %150, %cst_94 [1] : vector<8x128xf32> to vector<8xf32>
    %152 = vector.shape_cast %151 : vector<8xf32> to vector<8x1xf32>
    %cst_95 = arith.constant 1.280000e+02 : f32
    %153 = vector.broadcast %cst_95 : f32 to vector<8x1xf32>
    %154 = arith.divf %152, %153 : vector<8x1xf32>
    %cst_96 = arith.constant 9.99999974E-6 : f32
    %155 = vector.broadcast %cst_96 : f32 to vector<8x1xf32>
    %156 = arith.addf %154, %155 : vector<8x1xf32>
    %157 = math.rsqrt %156 : vector<8x1xf32>
    %158 = vector.broadcast %157 : vector<8x1xf32> to vector<8x128xf32>
    %159 = arith.mulf %149, %158 : vector<8x128xf32>
    %160 = vector.broadcast %140 : vector<1x128xf32> to vector<8x128xf32>
    %161 = arith.mulf %159, %160 : vector<8x128xf32>
    %162 = vector.broadcast %142 : vector<1x128xf32> to vector<8x128xf32>
    %163 = arith.addf %161, %162 : vector<8x128xf32>
    %c0_97 = arith.constant 0 : index
    %c0_98 = arith.constant 0 : index
    %c0_99 = arith.constant 0 : index
    %164 = vector.load %arg19[%c0_97, %c0_98, %c0_99] : memref<2x128x256xf32, #tpu.memory_space<vmem>>, vector<1x128x256xf32>
    %165 = vector.shape_cast %164 : vector<1x128x256xf32> to vector<128x256xf32>
    %cst_100 = arith.constant dense<0.000000e+00> : vector<8x256xf32>
    %166 = tpu.matmul %163, %165, %cst_100 {dimension_numbers = #tpu.dot_dimension_numbers<[1], [0], [0], [1], [0, 0, 1, 1], [], []>} : vector<8x128xf32>, vector<128x256xf32>, vector<8x256xf32> -> vector<8x256xf32>
    %c0_101 = arith.constant 0 : index
    %c0_102 = arith.constant 0 : index
    %c0_103 = arith.constant 0 : index
    %167 = vector.load %arg20[%c0_101, %c0_102, %c0_103] : memref<2x1x256xf32, #tpu.memory_space<vmem>>, vector<1x1x256xf32>
    %168 = vector.shape_cast %167 : vector<1x1x256xf32> to vector<1x256xf32>
    %169 = vector.broadcast %168 : vector<1x256xf32> to vector<8x256xf32>
    %170 = arith.addf %166, %169 : vector<8x256xf32>
    %cst_104 = arith.constant 0.000000e+00 : f32
    %171 = vector.broadcast %cst_104 : f32 to vector<8x256xf32>
    %172 = arith.maximumf %170, %171 : vector<8x256xf32>
    %c0_105 = arith.constant 0 : index
    %c0_106 = arith.constant 0 : index
    %c0_107 = arith.constant 0 : index
    %173 = vector.load %arg21[%c0_105, %c0_106, %c0_107] : memref<2x256x128xf32, #tpu.memory_space<vmem>>, vector<1x256x128xf32>
    %174 = vector.shape_cast %173 : vector<1x256x128xf32> to vector<256x128xf32>
    %cst_108 = arith.constant dense<0.000000e+00> : vector<8x128xf32>
    %175 = tpu.matmul %172, %174, %cst_108 {dimension_numbers = #tpu.dot_dimension_numbers<[1], [0], [0], [1], [0, 0, 1, 1], [], []>} : vector<8x256xf32>, vector<256x128xf32>, vector<8x128xf32> -> vector<8x128xf32>
    %c0_109 = arith.constant 0 : index
    %c0_110 = arith.constant 0 : index
    %c0_111 = arith.constant 0 : index
    %176 = vector.load %arg22[%c0_109, %c0_110, %c0_111] : memref<2x1x128xf32, #tpu.memory_space<vmem>>, vector<1x1x128xf32>
    %177 = vector.shape_cast %176 : vector<1x1x128xf32> to vector<1x128xf32>
    %178 = vector.broadcast %177 : vector<1x128xf32> to vector<8x128xf32>
    %179 = arith.addf %175, %178 : vector<8x128xf32>
    %c0_112 = arith.constant 0 : index
    %c0_113 = arith.constant 0 : index
    %c0_114 = arith.constant 0 : index
    %180 = vector.load %arg27[%c0_112, %c0_113, %c0_114] : memref<2x1x128xf32, #tpu.memory_space<vmem>>, vector<1x1x128xf32>
    %181 = vector.shape_cast %180 : vector<1x1x128xf32> to vector<1x128xf32>
    %c0_115 = arith.constant 0 : index
    %c0_116 = arith.constant 0 : index
    %c0_117 = arith.constant 0 : index
    %182 = vector.load %arg28[%c0_115, %c0_116, %c0_117] : memref<2x1x128xf32, #tpu.memory_space<vmem>>, vector<1x1x128xf32>
    %183 = vector.shape_cast %182 : vector<1x1x128xf32> to vector<1x128xf32>
    %184 = arith.addf %163, %179 : vector<8x128xf32>
    %cst_118 = arith.constant dense<0.000000e+00> : vector<8xf32>
    %185 = vector.multi_reduction <add>, %184, %cst_118 [1] : vector<8x128xf32> to vector<8xf32>
    %186 = vector.shape_cast %185 : vector<8xf32> to vector<8x1xf32>
    %cst_119 = arith.constant 1.280000e+02 : f32
    %187 = vector.broadcast %cst_119 : f32 to vector<8x1xf32>
    %188 = arith.divf %186, %187 : vector<8x1xf32>
    %189 = vector.broadcast %188 : vector<8x1xf32> to vector<8x128xf32>
    %190 = arith.subf %184, %189 : vector<8x128xf32>
    %191 = arith.mulf %190, %190 : vector<8x128xf32>
    %cst_120 = arith.constant dense<0.000000e+00> : vector<8xf32>
    %192 = vector.multi_reduction <add>, %191, %cst_120 [1] : vector<8x128xf32> to vector<8xf32>
    %193 = vector.shape_cast %192 : vector<8xf32> to vector<8x1xf32>
    %cst_121 = arith.constant 1.280000e+02 : f32
    %194 = vector.broadcast %cst_121 : f32 to vector<8x1xf32>
    %195 = arith.divf %193, %194 : vector<8x1xf32>
    %cst_122 = arith.constant 9.99999974E-6 : f32
    %196 = vector.broadcast %cst_122 : f32 to vector<8x1xf32>
    %197 = arith.addf %195, %196 : vector<8x1xf32>
    %198 = math.rsqrt %197 : vector<8x1xf32>
    %199 = vector.broadcast %198 : vector<8x1xf32> to vector<8x128xf32>
    %200 = arith.mulf %190, %199 : vector<8x128xf32>
    %201 = vector.broadcast %181 : vector<1x128xf32> to vector<8x128xf32>
    %202 = arith.mulf %200, %201 : vector<8x128xf32>
    %203 = vector.broadcast %183 : vector<1x128xf32> to vector<8x128xf32>
    %204 = arith.addf %202, %203 : vector<8x128xf32>
    %c1 = arith.constant 1 : index
    %c0_123 = arith.constant 0 : index
    %c0_124 = arith.constant 0 : index
    %205 = vector.load %arg3[%c1, %c0_123, %c0_124] : memref<2x128x128xf32, #tpu.memory_space<vmem>>, vector<1x128x128xf32>
    %206 = vector.shape_cast %205 : vector<1x128x128xf32> to vector<128x128xf32>
    %c1_125 = arith.constant 1 : index
    %c0_126 = arith.constant 0 : index
    %c0_127 = arith.constant 0 : index
    %207 = vector.load %arg4[%c1_125, %c0_126, %c0_127] : memref<2x1x128xf32, #tpu.memory_space<vmem>>, vector<1x1x128xf32>
    %208 = vector.shape_cast %207 : vector<1x1x128xf32> to vector<1x128xf32>
    %c1_128 = arith.constant 1 : index
    %c0_129 = arith.constant 0 : index
    %c0_130 = arith.constant 0 : index
    %209 = vector.load %arg5[%c1_128, %c0_129, %c0_130] : memref<2x128x128xf32, #tpu.memory_space<vmem>>, vector<1x128x128xf32>
    %210 = vector.shape_cast %209 : vector<1x128x128xf32> to vector<128x128xf32>
    %c1_131 = arith.constant 1 : index
    %c0_132 = arith.constant 0 : index
    %c0_133 = arith.constant 0 : index
    %211 = vector.load %arg6[%c1_131, %c0_132, %c0_133] : memref<2x1x128xf32, #tpu.memory_space<vmem>>, vector<1x1x128xf32>
    %212 = vector.shape_cast %211 : vector<1x1x128xf32> to vector<1x128xf32>
    %c1_134 = arith.constant 1 : index
    %c0_135 = arith.constant 0 : index
    %c0_136 = arith.constant 0 : index
    %213 = vector.load %arg7[%c1_134, %c0_135, %c0_136] : memref<2x128x128xf32, #tpu.memory_space<vmem>>, vector<1x128x128xf32>
    %214 = vector.shape_cast %213 : vector<1x128x128xf32> to vector<128x128xf32>
    %c1_137 = arith.constant 1 : index
    %c0_138 = arith.constant 0 : index
    %c0_139 = arith.constant 0 : index
    %215 = vector.load %arg8[%c1_137, %c0_138, %c0_139] : memref<2x1x128xf32, #tpu.memory_space<vmem>>, vector<1x1x128xf32>
    %216 = vector.shape_cast %215 : vector<1x1x128xf32> to vector<1x128xf32>
    %c1_140 = arith.constant 1 : index
    %c0_141 = arith.constant 0 : index
    %c0_142 = arith.constant 0 : index
    %217 = vector.load %arg9[%c1_140, %c0_141, %c0_142] : memref<2x128x128xf32, #tpu.memory_space<vmem>>, vector<1x128x128xf32>
    %218 = vector.shape_cast %217 : vector<1x128x128xf32> to vector<128x128xf32>
    %c1_143 = arith.constant 1 : index
    %c0_144 = arith.constant 0 : index
    %c0_145 = arith.constant 0 : index
    %219 = vector.load %arg10[%c1_143, %c0_144, %c0_145] : memref<2x1x128xf32, #tpu.memory_space<vmem>>, vector<1x1x128xf32>
    %220 = vector.shape_cast %219 : vector<1x1x128xf32> to vector<1x128xf32>
    %cst_146 = arith.constant dense<0.000000e+00> : vector<8x128xf32>
    %221 = tpu.matmul %204, %206, %cst_146 {dimension_numbers = #tpu.dot_dimension_numbers<[1], [0], [0], [1], [0, 0, 1, 1], [], []>} : vector<8x128xf32>, vector<128x128xf32>, vector<8x128xf32> -> vector<8x128xf32>
    %222 = vector.broadcast %208 : vector<1x128xf32> to vector<8x128xf32>
    %223 = arith.addf %221, %222 : vector<8x128xf32>
    %cst_147 = arith.constant dense<0.000000e+00> : vector<8x128xf32>
    %224 = tpu.matmul %204, %210, %cst_147 {dimension_numbers = #tpu.dot_dimension_numbers<[1], [0], [0], [1], [0, 0, 1, 1], [], []>} : vector<8x128xf32>, vector<128x128xf32>, vector<8x128xf32> -> vector<8x128xf32>
    %225 = vector.broadcast %212 : vector<1x128xf32> to vector<8x128xf32>
    %226 = arith.addf %224, %225 : vector<8x128xf32>
    %cst_148 = arith.constant dense<0.000000e+00> : vector<8x128xf32>
    %227 = tpu.matmul %204, %214, %cst_148 {dimension_numbers = #tpu.dot_dimension_numbers<[1], [0], [0], [1], [0, 0, 1, 1], [], []>} : vector<8x128xf32>, vector<128x128xf32>, vector<8x128xf32> -> vector<8x128xf32>
    %228 = vector.broadcast %216 : vector<1x128xf32> to vector<8x128xf32>
    %229 = arith.addf %227, %228 : vector<8x128xf32>
    %230 = vector.shape_cast %223 : vector<8x128xf32> to vector<8x4x32xf32>
    %231 = tpu.transpose %230, [1, 0, 2] : vector<8x4x32xf32> -> vector<4x8x32xf32>
    %232 = vector.shape_cast %226 : vector<8x128xf32> to vector<8x4x32xf32>
    %233 = tpu.transpose %232, [1, 0, 2] : vector<8x4x32xf32> -> vector<4x8x32xf32>
    %234 = vector.shape_cast %229 : vector<8x128xf32> to vector<8x4x32xf32>
    %235 = tpu.transpose %234, [1, 0, 2] : vector<8x4x32xf32> -> vector<4x8x32xf32>
    "tpu.trace_start"() <{level = 10 : i32, message = "hqd,hkd->hqk"}> : () -> ()
    %cst_149 = arith.constant dense<0.000000e+00> : vector<4x8x8xf32>
    %236 = tpu.matmul %231, %233, %cst_149 {dimension_numbers = #tpu.dot_dimension_numbers<[2], [2], [1], [1], [0, 0, 0, 1, 1, 1], [0], [0]>} : vector<4x8x32xf32>, vector<4x8x32xf32>, vector<4x8x8xf32> -> vector<4x8x8xf32>
    "tpu.trace_stop"() : () -> ()
    %237 = vector.shape_cast %2 : vector<8x8xf32> to vector<1x8x8xf32>
    %cst_150 = arith.constant 0.000000e+00 : f32
    %238 = vector.broadcast %cst_150 : f32 to vector<1x8x8xf32>
    %239 = arith.cmpf oeq, %237, %238 : vector<1x8x8xf32>
    %cst_151 = arith.constant 0xFF800000 : f32
    %240 = vector.shape_cast %239 : vector<1x8x8xi1> to vector<1x8x8xi1>
    %241 = vector.broadcast %240 : vector<1x8x8xi1> to vector<4x8x8xi1>
    %242 = vector.broadcast %cst_151 : f32 to vector<4x8x8xf32>
    %243 = arith.select %241, %242, %236 : vector<4x8x8xi1>, vector<4x8x8xf32>
    %cst_152 = arith.constant 0.176776692 : f32
    %244 = vector.broadcast %cst_152 : f32 to vector<4x8x8xf32>
    %245 = arith.mulf %243, %244 : vector<4x8x8xf32>
    %cst_153 = arith.constant dense<0xFF800000> : vector<4x8xf32>
    %246 = vector.multi_reduction <maximumf>, %245, %cst_153 [2] : vector<4x8x8xf32> to vector<4x8xf32>
    %247 = vector.shape_cast %246 : vector<4x8xf32> to vector<4x8x1xf32>
    %248 = vector.broadcast %247 : vector<4x8x1xf32> to vector<4x8x8xf32>
    %249 = arith.subf %245, %248 : vector<4x8x8xf32>
    %250 = math.exp %249 : vector<4x8x8xf32>
    %cst_154 = arith.constant dense<0.000000e+00> : vector<4x8xf32>
    %251 = vector.multi_reduction <add>, %250, %cst_154 [2] : vector<4x8x8xf32> to vector<4x8xf32>
    %252 = vector.shape_cast %251 : vector<4x8xf32> to vector<4x8x1xf32>
    %253 = tpu.reciprocal %252 {approx = true} : vector<4x8x1xf32> -> vector<4x8x1xf32>
    %254 = vector.broadcast %253 : vector<4x8x1xf32> to vector<4x8x8xf32>
    %255 = arith.mulf %250, %254 : vector<4x8x8xf32>
    "tpu.trace_start"() <{level = 10 : i32, message = "hqk,hkv->hqv"}> : () -> ()
    %cst_155 = arith.constant dense<0.000000e+00> : vector<4x8x32xf32>
    %256 = tpu.matmul %255, %235, %cst_155 {dimension_numbers = #tpu.dot_dimension_numbers<[2], [1], [1], [2], [0, 0, 0, 1, 1, 2], [0], [0]>} : vector<4x8x8xf32>, vector<4x8x32xf32>, vector<4x8x32xf32> -> vector<4x8x32xf32>
    "tpu.trace_stop"() : () -> ()
    %257 = vector.shape_cast %218 : vector<128x128xf32> to vector<4x32x128xf32>
    "tpu.trace_start"() <{level = 10 : i32, message = "hqv,hvd->hqd"}> : () -> ()
    %cst_156 = arith.constant dense<0.000000e+00> : vector<4x8x128xf32>
    %258 = tpu.matmul %256, %257, %cst_156 {dimension_numbers = #tpu.dot_dimension_numbers<[2], [1], [1], [2], [0, 0, 0, 1, 1, 2], [0], [0]>} : vector<4x8x32xf32>, vector<4x32x128xf32>, vector<4x8x128xf32> -> vector<4x8x128xf32>
    "tpu.trace_stop"() : () -> ()
    %cst_157 = arith.constant dense<0.000000e+00> : vector<8x128xf32>
    %259 = vector.multi_reduction <add>, %258, %cst_157 [0] : vector<4x8x128xf32> to vector<8x128xf32>
    %260 = vector.broadcast %220 : vector<1x128xf32> to vector<8x128xf32>
    %261 = arith.addf %259, %260 : vector<8x128xf32>
    %cst_158 = arith.constant 0.000000e+00 : f32
    %262 = vector.broadcast %cst_158 : f32 to vector<8x128xf32>
    %263 = arith.maximumf %261, %262 : vector<8x128xf32>
    %c1_159 = arith.constant 1 : index
    %c0_160 = arith.constant 0 : index
    %c0_161 = arith.constant 0 : index
    %264 = vector.load %arg23[%c1_159, %c0_160, %c0_161] : memref<2x1x128xf32, #tpu.memory_space<vmem>>, vector<1x1x128xf32>
    %265 = vector.shape_cast %264 : vector<1x1x128xf32> to vector<1x128xf32>
    %c1_162 = arith.constant 1 : index
    %c0_163 = arith.constant 0 : index
    %c0_164 = arith.constant 0 : index
    %266 = vector.load %arg24[%c1_162, %c0_163, %c0_164] : memref<2x1x128xf32, #tpu.memory_space<vmem>>, vector<1x1x128xf32>
    %267 = vector.shape_cast %266 : vector<1x1x128xf32> to vector<1x128xf32>
    %268 = arith.addf %204, %263 : vector<8x128xf32>
    %cst_165 = arith.constant dense<0.000000e+00> : vector<8xf32>
    %269 = vector.multi_reduction <add>, %268, %cst_165 [1] : vector<8x128xf32> to vector<8xf32>
    %270 = vector.shape_cast %269 : vector<8xf32> to vector<8x1xf32>
    %cst_166 = arith.constant 1.280000e+02 : f32
    %271 = vector.broadcast %cst_166 : f32 to vector<8x1xf32>
    %272 = arith.divf %270, %271 : vector<8x1xf32>
    %273 = vector.broadcast %272 : vector<8x1xf32> to vector<8x128xf32>
    %274 = arith.subf %268, %273 : vector<8x128xf32>
    %275 = arith.mulf %274, %274 : vector<8x128xf32>
    %cst_167 = arith.constant dense<0.000000e+00> : vector<8xf32>
    %276 = vector.multi_reduction <add>, %275, %cst_167 [1] : vector<8x128xf32> to vector<8xf32>
    %277 = vector.shape_cast %276 : vector<8xf32> to vector<8x1xf32>
    %cst_168 = arith.constant 1.280000e+02 : f32
    %278 = vector.broadcast %cst_168 : f32 to vector<8x1xf32>
    %279 = arith.divf %277, %278 : vector<8x1xf32>
    %cst_169 = arith.constant 9.99999974E-6 : f32
    %280 = vector.broadcast %cst_169 : f32 to vector<8x1xf32>
    %281 = arith.addf %279, %280 : vector<8x1xf32>
    %282 = math.rsqrt %281 : vector<8x1xf32>
    %283 = vector.broadcast %282 : vector<8x1xf32> to vector<8x128xf32>
    %284 = arith.mulf %274, %283 : vector<8x128xf32>
    %285 = vector.broadcast %265 : vector<1x128xf32> to vector<8x128xf32>
    %286 = arith.mulf %284, %285 : vector<8x128xf32>
    %287 = vector.broadcast %267 : vector<1x128xf32> to vector<8x128xf32>
    %288 = arith.addf %286, %287 : vector<8x128xf32>
    %c1_170 = arith.constant 1 : index
    %c0_171 = arith.constant 0 : index
    %c0_172 = arith.constant 0 : index
    %289 = vector.load %arg11[%c1_170, %c0_171, %c0_172] : memref<2x128x128xf32, #tpu.memory_space<vmem>>, vector<1x128x128xf32>
    %290 = vector.shape_cast %289 : vector<1x128x128xf32> to vector<128x128xf32>
    %c1_173 = arith.constant 1 : index
    %c0_174 = arith.constant 0 : index
    %c0_175 = arith.constant 0 : index
    %291 = vector.load %arg12[%c1_173, %c0_174, %c0_175] : memref<2x1x128xf32, #tpu.memory_space<vmem>>, vector<1x1x128xf32>
    %292 = vector.shape_cast %291 : vector<1x1x128xf32> to vector<1x128xf32>
    %c1_176 = arith.constant 1 : index
    %c0_177 = arith.constant 0 : index
    %c0_178 = arith.constant 0 : index
    %293 = vector.load %arg13[%c1_176, %c0_177, %c0_178] : memref<2x128x128xf32, #tpu.memory_space<vmem>>, vector<1x128x128xf32>
    %294 = vector.shape_cast %293 : vector<1x128x128xf32> to vector<128x128xf32>
    %c1_179 = arith.constant 1 : index
    %c0_180 = arith.constant 0 : index
    %c0_181 = arith.constant 0 : index
    %295 = vector.load %arg14[%c1_179, %c0_180, %c0_181] : memref<2x1x128xf32, #tpu.memory_space<vmem>>, vector<1x1x128xf32>
    %296 = vector.shape_cast %295 : vector<1x1x128xf32> to vector<1x128xf32>
    %c1_182 = arith.constant 1 : index
    %c0_183 = arith.constant 0 : index
    %c0_184 = arith.constant 0 : index
    %297 = vector.load %arg15[%c1_182, %c0_183, %c0_184] : memref<2x128x128xf32, #tpu.memory_space<vmem>>, vector<1x128x128xf32>
    %298 = vector.shape_cast %297 : vector<1x128x128xf32> to vector<128x128xf32>
    %c1_185 = arith.constant 1 : index
    %c0_186 = arith.constant 0 : index
    %c0_187 = arith.constant 0 : index
    %299 = vector.load %arg16[%c1_185, %c0_186, %c0_187] : memref<2x1x128xf32, #tpu.memory_space<vmem>>, vector<1x1x128xf32>
    %300 = vector.shape_cast %299 : vector<1x1x128xf32> to vector<1x128xf32>
    %c1_188 = arith.constant 1 : index
    %c0_189 = arith.constant 0 : index
    %c0_190 = arith.constant 0 : index
    %301 = vector.load %arg17[%c1_188, %c0_189, %c0_190] : memref<2x128x128xf32, #tpu.memory_space<vmem>>, vector<1x128x128xf32>
    %302 = vector.shape_cast %301 : vector<1x128x128xf32> to vector<128x128xf32>
    %c1_191 = arith.constant 1 : index
    %c0_192 = arith.constant 0 : index
    %c0_193 = arith.constant 0 : index
    %303 = vector.load %arg18[%c1_191, %c0_192, %c0_193] : memref<2x1x128xf32, #tpu.memory_space<vmem>>, vector<1x1x128xf32>
    %304 = vector.shape_cast %303 : vector<1x1x128xf32> to vector<1x128xf32>
    %cst_194 = arith.constant dense<0.000000e+00> : vector<8x128xf32>
    %305 = tpu.matmul %288, %290, %cst_194 {dimension_numbers = #tpu.dot_dimension_numbers<[1], [0], [0], [1], [0, 0, 1, 1], [], []>} : vector<8x128xf32>, vector<128x128xf32>, vector<8x128xf32> -> vector<8x128xf32>
    %306 = vector.broadcast %292 : vector<1x128xf32> to vector<8x128xf32>
    %307 = arith.addf %305, %306 : vector<8x128xf32>
    %cst_195 = arith.constant dense<0.000000e+00> : vector<8x128xf32>
    %308 = tpu.matmul %204, %294, %cst_195 {dimension_numbers = #tpu.dot_dimension_numbers<[1], [0], [0], [1], [0, 0, 1, 1], [], []>} : vector<8x128xf32>, vector<128x128xf32>, vector<8x128xf32> -> vector<8x128xf32>
    %309 = vector.broadcast %296 : vector<1x128xf32> to vector<8x128xf32>
    %310 = arith.addf %308, %309 : vector<8x128xf32>
    %cst_196 = arith.constant dense<0.000000e+00> : vector<8x128xf32>
    %311 = tpu.matmul %204, %298, %cst_196 {dimension_numbers = #tpu.dot_dimension_numbers<[1], [0], [0], [1], [0, 0, 1, 1], [], []>} : vector<8x128xf32>, vector<128x128xf32>, vector<8x128xf32> -> vector<8x128xf32>
    %312 = vector.broadcast %300 : vector<1x128xf32> to vector<8x128xf32>
    %313 = arith.addf %311, %312 : vector<8x128xf32>
    %314 = vector.shape_cast %307 : vector<8x128xf32> to vector<8x4x32xf32>
    %315 = tpu.transpose %314, [1, 0, 2] : vector<8x4x32xf32> -> vector<4x8x32xf32>
    %316 = vector.shape_cast %310 : vector<8x128xf32> to vector<8x4x32xf32>
    %317 = tpu.transpose %316, [1, 0, 2] : vector<8x4x32xf32> -> vector<4x8x32xf32>
    %318 = vector.shape_cast %313 : vector<8x128xf32> to vector<8x4x32xf32>
    %319 = tpu.transpose %318, [1, 0, 2] : vector<8x4x32xf32> -> vector<4x8x32xf32>
    "tpu.trace_start"() <{level = 10 : i32, message = "hqd,hkd->hqk"}> : () -> ()
    %cst_197 = arith.constant dense<0.000000e+00> : vector<4x8x8xf32>
    %320 = tpu.matmul %315, %317, %cst_197 {dimension_numbers = #tpu.dot_dimension_numbers<[2], [2], [1], [1], [0, 0, 0, 1, 1, 1], [0], [0]>} : vector<4x8x32xf32>, vector<4x8x32xf32>, vector<4x8x8xf32> -> vector<4x8x8xf32>
    "tpu.trace_stop"() : () -> ()
    %cst_198 = arith.constant 0.176776692 : f32
    %321 = vector.broadcast %cst_198 : f32 to vector<4x8x8xf32>
    %322 = arith.mulf %320, %321 : vector<4x8x8xf32>
    %cst_199 = arith.constant dense<0xFF800000> : vector<4x8xf32>
    %323 = vector.multi_reduction <maximumf>, %322, %cst_199 [2] : vector<4x8x8xf32> to vector<4x8xf32>
    %324 = vector.shape_cast %323 : vector<4x8xf32> to vector<4x8x1xf32>
    %325 = vector.broadcast %324 : vector<4x8x1xf32> to vector<4x8x8xf32>
    %326 = arith.subf %322, %325 : vector<4x8x8xf32>
    %327 = math.exp %326 : vector<4x8x8xf32>
    %cst_200 = arith.constant dense<0.000000e+00> : vector<4x8xf32>
    %328 = vector.multi_reduction <add>, %327, %cst_200 [2] : vector<4x8x8xf32> to vector<4x8xf32>
    %329 = vector.shape_cast %328 : vector<4x8xf32> to vector<4x8x1xf32>
    %330 = tpu.reciprocal %329 {approx = true} : vector<4x8x1xf32> -> vector<4x8x1xf32>
    %331 = vector.broadcast %330 : vector<4x8x1xf32> to vector<4x8x8xf32>
    %332 = arith.mulf %327, %331 : vector<4x8x8xf32>
    "tpu.trace_start"() <{level = 10 : i32, message = "hqk,hkv->hqv"}> : () -> ()
    %cst_201 = arith.constant dense<0.000000e+00> : vector<4x8x32xf32>
    %333 = tpu.matmul %332, %319, %cst_201 {dimension_numbers = #tpu.dot_dimension_numbers<[2], [1], [1], [2], [0, 0, 0, 1, 1, 2], [0], [0]>} : vector<4x8x8xf32>, vector<4x8x32xf32>, vector<4x8x32xf32> -> vector<4x8x32xf32>
    "tpu.trace_stop"() : () -> ()
    %334 = vector.shape_cast %302 : vector<128x128xf32> to vector<4x32x128xf32>
    "tpu.trace_start"() <{level = 10 : i32, message = "hqv,hvd->hqd"}> : () -> ()
    %cst_202 = arith.constant dense<0.000000e+00> : vector<4x8x128xf32>
    %335 = tpu.matmul %333, %334, %cst_202 {dimension_numbers = #tpu.dot_dimension_numbers<[2], [1], [1], [2], [0, 0, 0, 1, 1, 2], [0], [0]>} : vector<4x8x32xf32>, vector<4x32x128xf32>, vector<4x8x128xf32> -> vector<4x8x128xf32>
    "tpu.trace_stop"() : () -> ()
    %cst_203 = arith.constant dense<0.000000e+00> : vector<8x128xf32>
    %336 = vector.multi_reduction <add>, %335, %cst_203 [0] : vector<4x8x128xf32> to vector<8x128xf32>
    %337 = vector.broadcast %304 : vector<1x128xf32> to vector<8x128xf32>
    %338 = arith.addf %336, %337 : vector<8x128xf32>
    %cst_204 = arith.constant 0.000000e+00 : f32
    %339 = vector.broadcast %cst_204 : f32 to vector<8x128xf32>
    %340 = arith.maximumf %338, %339 : vector<8x128xf32>
    %c1_205 = arith.constant 1 : index
    %c0_206 = arith.constant 0 : index
    %c0_207 = arith.constant 0 : index
    %341 = vector.load %arg25[%c1_205, %c0_206, %c0_207] : memref<2x1x128xf32, #tpu.memory_space<vmem>>, vector<1x1x128xf32>
    %342 = vector.shape_cast %341 : vector<1x1x128xf32> to vector<1x128xf32>
    %c1_208 = arith.constant 1 : index
    %c0_209 = arith.constant 0 : index
    %c0_210 = arith.constant 0 : index
    %343 = vector.load %arg26[%c1_208, %c0_209, %c0_210] : memref<2x1x128xf32, #tpu.memory_space<vmem>>, vector<1x1x128xf32>
    %344 = vector.shape_cast %343 : vector<1x1x128xf32> to vector<1x128xf32>
    %345 = arith.addf %288, %340 : vector<8x128xf32>
    %cst_211 = arith.constant dense<0.000000e+00> : vector<8xf32>
    %346 = vector.multi_reduction <add>, %345, %cst_211 [1] : vector<8x128xf32> to vector<8xf32>
    %347 = vector.shape_cast %346 : vector<8xf32> to vector<8x1xf32>
    %cst_212 = arith.constant 1.280000e+02 : f32
    %348 = vector.broadcast %cst_212 : f32 to vector<8x1xf32>
    %349 = arith.divf %347, %348 : vector<8x1xf32>
    %350 = vector.broadcast %349 : vector<8x1xf32> to vector<8x128xf32>
    %351 = arith.subf %345, %350 : vector<8x128xf32>
    %352 = arith.mulf %351, %351 : vector<8x128xf32>
    %cst_213 = arith.constant dense<0.000000e+00> : vector<8xf32>
    %353 = vector.multi_reduction <add>, %352, %cst_213 [1] : vector<8x128xf32> to vector<8xf32>
    %354 = vector.shape_cast %353 : vector<8xf32> to vector<8x1xf32>
    %cst_214 = arith.constant 1.280000e+02 : f32
    %355 = vector.broadcast %cst_214 : f32 to vector<8x1xf32>
    %356 = arith.divf %354, %355 : vector<8x1xf32>
    %cst_215 = arith.constant 9.99999974E-6 : f32
    %357 = vector.broadcast %cst_215 : f32 to vector<8x1xf32>
    %358 = arith.addf %356, %357 : vector<8x1xf32>
    %359 = math.rsqrt %358 : vector<8x1xf32>
    %360 = vector.broadcast %359 : vector<8x1xf32> to vector<8x128xf32>
    %361 = arith.mulf %351, %360 : vector<8x128xf32>
    %362 = vector.broadcast %342 : vector<1x128xf32> to vector<8x128xf32>
    %363 = arith.mulf %361, %362 : vector<8x128xf32>
    %364 = vector.broadcast %344 : vector<1x128xf32> to vector<8x128xf32>
    %365 = arith.addf %363, %364 : vector<8x128xf32>
    %c1_216 = arith.constant 1 : index
    %c0_217 = arith.constant 0 : index
    %c0_218 = arith.constant 0 : index
    %366 = vector.load %arg19[%c1_216, %c0_217, %c0_218] : memref<2x128x256xf32, #tpu.memory_space<vmem>>, vector<1x128x256xf32>
    %367 = vector.shape_cast %366 : vector<1x128x256xf32> to vector<128x256xf32>
    %cst_219 = arith.constant dense<0.000000e+00> : vector<8x256xf32>
    %368 = tpu.matmul %365, %367, %cst_219 {dimension_numbers = #tpu.dot_dimension_numbers<[1], [0], [0], [1], [0, 0, 1, 1], [], []>} : vector<8x128xf32>, vector<128x256xf32>, vector<8x256xf32> -> vector<8x256xf32>
    %c1_220 = arith.constant 1 : index
    %c0_221 = arith.constant 0 : index
    %c0_222 = arith.constant 0 : index
    %369 = vector.load %arg20[%c1_220, %c0_221, %c0_222] : memref<2x1x256xf32, #tpu.memory_space<vmem>>, vector<1x1x256xf32>
    %370 = vector.shape_cast %369 : vector<1x1x256xf32> to vector<1x256xf32>
    %371 = vector.broadcast %370 : vector<1x256xf32> to vector<8x256xf32>
    %372 = arith.addf %368, %371 : vector<8x256xf32>
    %cst_223 = arith.constant 0.000000e+00 : f32
    %373 = vector.broadcast %cst_223 : f32 to vector<8x256xf32>
    %374 = arith.maximumf %372, %373 : vector<8x256xf32>
    %c1_224 = arith.constant 1 : index
    %c0_225 = arith.constant 0 : index
    %c0_226 = arith.constant 0 : index
    %375 = vector.load %arg21[%c1_224, %c0_225, %c0_226] : memref<2x256x128xf32, #tpu.memory_space<vmem>>, vector<1x256x128xf32>
    %376 = vector.shape_cast %375 : vector<1x256x128xf32> to vector<256x128xf32>
    %cst_227 = arith.constant dense<0.000000e+00> : vector<8x128xf32>
    %377 = tpu.matmul %374, %376, %cst_227 {dimension_numbers = #tpu.dot_dimension_numbers<[1], [0], [0], [1], [0, 0, 1, 1], [], []>} : vector<8x256xf32>, vector<256x128xf32>, vector<8x128xf32> -> vector<8x128xf32>
    %c1_228 = arith.constant 1 : index
    %c0_229 = arith.constant 0 : index
    %c0_230 = arith.constant 0 : index
    %378 = vector.load %arg22[%c1_228, %c0_229, %c0_230] : memref<2x1x128xf32, #tpu.memory_space<vmem>>, vector<1x1x128xf32>
    %379 = vector.shape_cast %378 : vector<1x1x128xf32> to vector<1x128xf32>
    %380 = vector.broadcast %379 : vector<1x128xf32> to vector<8x128xf32>
    %381 = arith.addf %377, %380 : vector<8x128xf32>
    %c1_231 = arith.constant 1 : index
    %c0_232 = arith.constant 0 : index
    %c0_233 = arith.constant 0 : index
    %382 = vector.load %arg27[%c1_231, %c0_232, %c0_233] : memref<2x1x128xf32, #tpu.memory_space<vmem>>, vector<1x1x128xf32>
    %383 = vector.shape_cast %382 : vector<1x1x128xf32> to vector<1x128xf32>
    %c1_234 = arith.constant 1 : index
    %c0_235 = arith.constant 0 : index
    %c0_236 = arith.constant 0 : index
    %384 = vector.load %arg28[%c1_234, %c0_235, %c0_236] : memref<2x1x128xf32, #tpu.memory_space<vmem>>, vector<1x1x128xf32>
    %385 = vector.shape_cast %384 : vector<1x1x128xf32> to vector<1x128xf32>
    %386 = arith.addf %365, %381 : vector<8x128xf32>
    %cst_237 = arith.constant dense<0.000000e+00> : vector<8xf32>
    %387 = vector.multi_reduction <add>, %386, %cst_237 [1] : vector<8x128xf32> to vector<8xf32>
    %388 = vector.shape_cast %387 : vector<8xf32> to vector<8x1xf32>
    %cst_238 = arith.constant 1.280000e+02 : f32
    %389 = vector.broadcast %cst_238 : f32 to vector<8x1xf32>
    %390 = arith.divf %388, %389 : vector<8x1xf32>
    %391 = vector.broadcast %390 : vector<8x1xf32> to vector<8x128xf32>
    %392 = arith.subf %386, %391 : vector<8x128xf32>
    %393 = arith.mulf %392, %392 : vector<8x128xf32>
    %cst_239 = arith.constant dense<0.000000e+00> : vector<8xf32>
    %394 = vector.multi_reduction <add>, %393, %cst_239 [1] : vector<8x128xf32> to vector<8xf32>
    %395 = vector.shape_cast %394 : vector<8xf32> to vector<8x1xf32>
    %cst_240 = arith.constant 1.280000e+02 : f32
    %396 = vector.broadcast %cst_240 : f32 to vector<8x1xf32>
    %397 = arith.divf %395, %396 : vector<8x1xf32>
    %cst_241 = arith.constant 9.99999974E-6 : f32
    %398 = vector.broadcast %cst_241 : f32 to vector<8x1xf32>
    %399 = arith.addf %397, %398 : vector<8x1xf32>
    %400 = math.rsqrt %399 : vector<8x1xf32>
    %401 = vector.broadcast %400 : vector<8x1xf32> to vector<8x128xf32>
    %402 = arith.mulf %392, %401 : vector<8x128xf32>
    %403 = vector.broadcast %383 : vector<1x128xf32> to vector<8x128xf32>
    %404 = arith.mulf %402, %403 : vector<8x128xf32>
    %405 = vector.broadcast %385 : vector<1x128xf32> to vector<8x128xf32>
    %406 = arith.addf %404, %405 : vector<8x128xf32>
    %c0_242 = arith.constant 0 : index
    %c0_243 = arith.constant 0 : index
    %c0_244 = arith.constant 0 : index
    %407 = vector.load %arg29[%c0_242, %c0_243, %c0_244] : memref<1x8x128xf32, #tpu.memory_space<vmem>>, vector<1x8x128xf32>
    %408 = vector.shape_cast %407 : vector<1x8x128xf32> to vector<8x128xf32>
    %409 = vector.shape_cast %406 : vector<8x128xf32> to vector<1x8x128xf32>
    tpu.vector_store %arg29[%c0_242, %c0_243, %c0_244], %409 {strides = array<i32>} : memref<1x8x128xf32, #tpu.memory_space<vmem>>, vector<1x8x128xf32>,
    return
  }
  func.func @transform_0(%arg0: i32) -> (i32, i32, i32) {
    %c0_i32 = arith.constant 0 : i32
    %c0_i32_0 = arith.constant 0 : i32
    %c0_i32_1 = arith.constant 0 : i32
    return %arg0, %c0_i32, %c0_i32_0 : i32, i32, i32
  }
  func.func @transform_1(%arg0: i32) -> (i32, i32) {
    %c0_i32 = arith.constant 0 : i32
    %c0_i32_0 = arith.constant 0 : i32
    %c0_i32_1 = arith.constant 0 : i32
    return %c0_i32, %c0_i32_0 : i32, i32
  }
  func.func @transform_2(%arg0: i32) -> (i32, i32, i32) {
    %c0_i32 = arith.constant 0 : i32
    %c0_i32_0 = arith.constant 0 : i32
    %c0_i32_1 = arith.constant 0 : i32
    %c0_i32_2 = arith.constant 0 : i32
    return %c0_i32, %c0_i32_0, %c0_i32_1 : i32, i32, i32
  }
  func.func @transform_3(%arg0: i32) -> (i32, i32, i32) {
    %c0_i32 = arith.constant 0 : i32
    %c0_i32_0 = arith.constant 0 : i32
    %c0_i32_1 = arith.constant 0 : i32
    %c0_i32_2 = arith.constant 0 : i32
    return %c0_i32, %c0_i32_0, %c0_i32_1 : i32, i32, i32
  }
  func.func @transform_4(%arg0: i32) -> (i32, i32, i32) {
    %c0_i32 = arith.constant 0 : i32
    %c0_i32_0 = arith.constant 0 : i32
    %c0_i32_1 = arith.constant 0 : i32
    %c0_i32_2 = arith.constant 0 : i32
    return %c0_i32, %c0_i32_0, %c0_i32_1 : i32, i32, i32
  }
  func.func @transform_5(%arg0: i32) -> (i32, i32, i32) {
    %c0_i32 = arith.constant 0 : i32
    %c0_i32_0 = arith.constant 0 : i32
    %c0_i32_1 = arith.constant 0 : i32
    %c0_i32_2 = arith.constant 0 : i32
    return %c0_i32, %c0_i32_0, %c0_i32_1 : i32, i32, i32
  }
  func.func @transform_6(%arg0: i32) -> (i32, i32, i32) {
    %c0_i32 = arith.constant 0 : i32
    %c0_i32_0 = arith.constant 0 : i32
    %c0_i32_1 = arith.constant 0 : i32
    %c0_i32_2 = arith.constant 0 : i32
    return %c0_i32, %c0_i32_0, %c0_i32_1 : i32, i32, i32
  }
  func.func @transform_7(%arg0: i32) -> (i32, i32, i32) {
    %c0_i32 = arith.constant 0 : i32
    %c0_i32_0 = arith.constant 0 : i32
    %c0_i32_1 = arith.constant 0 : i32
    %c0_i32_2 = arith.constant 0 : i32
    return %c0_i32, %c0_i32_0, %c0_i32_1 : i32, i32, i32
  }
  func.func @transform_8(%arg0: i32) -> (i32, i32, i32) {
    %c0_i32 = arith.constant 0 : i32
    %c0_i32_0 = arith.constant 0 : i32
    %c0_i32_1 = arith.constant 0 : i32
    %c0_i32_2 = arith.constant 0 : i32
    return %c0_i32, %c0_i32_0, %c0_i32_1 : i32, i32, i32
  }
  func.func @transform_9(%arg0: i32) -> (i32, i32, i32) {
    %c0_i32 = arith.constant 0 : i32
    %c0_i32_0 = arith.constant 0 : i32
    %c0_i32_1 = arith.constant 0 : i32
    %c0_i32_2 = arith.constant 0 : i32
    return %c0_i32, %c0_i32_0, %c0_i32_1 : i32, i32, i32
  }
  func.func @transform_10(%arg0: i32) -> (i32, i32, i32) {
    %c0_i32 = arith.constant 0 : i32
    %c0_i32_0 = arith.constant 0 : i32
    %c0_i32_1 = arith.constant 0 : i32
    %c0_i32_2 = arith.constant 0 : i32
    return %c0_i32, %c0_i32_0, %c0_i32_1 : i32, i32, i32
  }
  func.func @transform_11(%arg0: i32) -> (i32, i32, i32) {
    %c0_i32 = arith.constant 0 : i32
    %c0_i32_0 = arith.constant 0 : i32
    %c0_i32_1 = arith.constant 0 : i32
    %c0_i32_2 = arith.constant 0 : i32
    return %c0_i32, %c0_i32_0, %c0_i32_1 : i32, i32, i32
  }
  func.func @transform_12(%arg0: i32) -> (i32, i32, i32) {
    %c0_i32 = arith.constant 0 : i32
    %c0_i32_0 = arith.constant 0 : i32
    %c0_i32_1 = arith.constant 0 : i32
    %c0_i32_2 = arith.constant 0 : i32
    return %c0_i32, %c0_i32_0, %c0_i32_1 : i32, i32, i32
  }
  func.func @transform_13(%arg0: i32) -> (i32, i32, i32) {
    %c0_i32 = arith.constant 0 : i32
    %c0_i32_0 = arith.constant 0 : i32
    %c0_i32_1 = arith.constant 0 : i32
    %c0_i32_2 = arith.constant 0 : i32
    return %c0_i32, %c0_i32_0, %c0_i32_1 : i32, i32, i32
  }
  func.func @transform_14(%arg0: i32) -> (i32, i32, i32) {
    %c0_i32 = arith.constant 0 : i32
    %c0_i32_0 = arith.constant 0 : i32
    %c0_i32_1 = arith.constant 0 : i32
    %c0_i32_2 = arith.constant 0 : i32
    return %c0_i32, %c0_i32_0, %c0_i32_1 : i32, i32, i32
  }
  func.func @transform_15(%arg0: i32) -> (i32, i32, i32) {
    %c0_i32 = arith.constant 0 : i32
    %c0_i32_0 = arith.constant 0 : i32
    %c0_i32_1 = arith.constant 0 : i32
    %c0_i32_2 = arith.constant 0 : i32
    return %c0_i32, %c0_i32_0, %c0_i32_1 : i32, i32, i32
  }
  func.func @transform_16(%arg0: i32) -> (i32, i32, i32) {
    %c0_i32 = arith.constant 0 : i32
    %c0_i32_0 = arith.constant 0 : i32
    %c0_i32_1 = arith.constant 0 : i32
    %c0_i32_2 = arith.constant 0 : i32
    return %c0_i32, %c0_i32_0, %c0_i32_1 : i32, i32, i32
  }
  func.func @transform_17(%arg0: i32) -> (i32, i32, i32) {
    %c0_i32 = arith.constant 0 : i32
    %c0_i32_0 = arith.constant 0 : i32
    %c0_i32_1 = arith.constant 0 : i32
    %c0_i32_2 = arith.constant 0 : i32
    return %c0_i32, %c0_i32_0, %c0_i32_1 : i32, i32, i32
  }
  func.func @transform_18(%arg0: i32) -> (i32, i32, i32) {
    %c0_i32 = arith.constant 0 : i32
    %c0_i32_0 = arith.constant 0 : i32
    %c0_i32_1 = arith.constant 0 : i32
    %c0_i32_2 = arith.constant 0 : i32
    return %c0_i32, %c0_i32_0, %c0_i32_1 : i32, i32, i32
  }
  func.func @transform_19(%arg0: i32) -> (i32, i32, i32) {
    %c0_i32 = arith.constant 0 : i32
    %c0_i32_0 = arith.constant 0 : i32
    %c0_i32_1 = arith.constant 0 : i32
    %c0_i32_2 = arith.constant 0 : i32
    return %c0_i32, %c0_i32_0, %c0_i32_1 : i32, i32, i32
  }
  func.func @transform_20(%arg0: i32) -> (i32, i32, i32) {
    %c0_i32 = arith.constant 0 : i32
    %c0_i32_0 = arith.constant 0 : i32
    %c0_i32_1 = arith.constant 0 : i32
    %c0_i32_2 = arith.constant 0 : i32
    return %c0_i32, %c0_i32_0, %c0_i32_1 : i32, i32, i32
  }
  func.func @transform_21(%arg0: i32) -> (i32, i32, i32) {
    %c0_i32 = arith.constant 0 : i32
    %c0_i32_0 = arith.constant 0 : i32
    %c0_i32_1 = arith.constant 0 : i32
    %c0_i32_2 = arith.constant 0 : i32
    return %c0_i32, %c0_i32_0, %c0_i32_1 : i32, i32, i32
  }
  func.func @transform_22(%arg0: i32) -> (i32, i32, i32) {
    %c0_i32 = arith.constant 0 : i32
    %c0_i32_0 = arith.constant 0 : i32
    %c0_i32_1 = arith.constant 0 : i32
    %c0_i32_2 = arith.constant 0 : i32
    return %c0_i32, %c0_i32_0, %c0_i32_1 : i32, i32, i32
  }
  func.func @transform_23(%arg0: i32) -> (i32, i32, i32) {
    %c0_i32 = arith.constant 0 : i32
    %c0_i32_0 = arith.constant 0 : i32
    %c0_i32_1 = arith.constant 0 : i32
    %c0_i32_2 = arith.constant 0 : i32
    return %c0_i32, %c0_i32_0, %c0_i32_1 : i32, i32, i32
  }
  func.func @transform_24(%arg0: i32) -> (i32, i32, i32) {
    %c0_i32 = arith.constant 0 : i32
    %c0_i32_0 = arith.constant 0 : i32
    %c0_i32_1 = arith.constant 0 : i32
    %c0_i32_2 = arith.constant 0 : i32
    return %c0_i32, %c0_i32_0, %c0_i32_1 : i32, i32, i32
  }
  func.func @transform_25(%arg0: i32) -> (i32, i32, i32) {
    %c0_i32 = arith.constant 0 : i32
    %c0_i32_0 = arith.constant 0 : i32
    %c0_i32_1 = arith.constant 0 : i32
    %c0_i32_2 = arith.constant 0 : i32
    return %c0_i32, %c0_i32_0, %c0_i32_1 : i32, i32, i32
  }
  func.func @transform_26(%arg0: i32) -> (i32, i32, i32) {
    %c0_i32 = arith.constant 0 : i32
    %c0_i32_0 = arith.constant 0 : i32
    %c0_i32_1 = arith.constant 0 : i32
    %c0_i32_2 = arith.constant 0 : i32
    return %c0_i32, %c0_i32_0, %c0_i32_1 : i32, i32, i32
  }
  func.func @transform_27(%arg0: i32) -> (i32, i32, i32) {
    %c0_i32 = arith.constant 0 : i32
    %c0_i32_0 = arith.constant 0 : i32
    %c0_i32_1 = arith.constant 0 : i32
    %c0_i32_2 = arith.constant 0 : i32
    return %c0_i32, %c0_i32_0, %c0_i32_1 : i32, i32, i32
  }
  func.func @transform_28(%arg0: i32) -> (i32, i32, i32) {
    %c0_i32 = arith.constant 0 : i32
    %c0_i32_0 = arith.constant 0 : i32
    %c0_i32_1 = arith.constant 0 : i32
    return %arg0, %c0_i32, %c0_i32_0 : i32, i32, i32
  }
}

</mosaic_0001>

<bundles_post_ra>
// kernel: decoder_forward.1
= control target key start
LH: loop header
LB: loop body
LE: loop exit
PB: predicated region body
PF: predicated region fallthrough
CT: control target
= control target key end

     0   :  { %s11914_s0 = inlined_call_operand.vmem [shape: f32[2,8,128], index: 0, kind: input, shape index: {}]   ;;  %s11915_s1 = inlined_call_operand.vmem [shape: f32[8,8], index: 1, kind: input, shape index: {}]   ;;  %s11916_s2 = inlined_call_operand.hbm [shape: f32[2,128,128], index: 2, kind: input, shape index: {}]   ;;  %s11917_s3 = inlined_call_operand.vmem [shape: f32[2,1,128], index: 3, kind: input, shape index: {}]   ;;  %s11918_s4 = inlined_call_operand.hbm [shape: f32[2,128,128], index: 4, kind: input, shape index: {}]   ;;  %s11919_s5 = inlined_call_operand.vmem [shape: f32[2,1,128], index: 5, kind: input, shape index: {}]   ;;  %s11920_s6 = inlined_call_operand.hbm [shape: f32[2,128,128], index: 6, kind: input, shape index: {}]   ;;  %s11921_s7 = inlined_call_operand.vmem [shape: f32[2,1,128], index: 7, kind: input, shape index: {}]   ;;  %s11922_s8 = inlined_call_operand.hbm [shape: f32[2,128,128], index: 8, kind: input, shape index: {}]   ;;  %s11923_s9 = inlined_call_operand.vmem [shape: f32[2,1,128], index: 9, kind: input, shape index: {}]   ;;  %s11924_s10 = inlined_call_operand.hbm [shape: f32[2,128,128], index: 10, kind: input, shape index: {}]   ;;  %s11925_s11 = inlined_call_operand.vmem [shape: f32[2,1,128], index: 11, kind: input, shape index: {}]   ;;  %s11926_s12 = inlined_call_operand.hbm [shape: f32[2,128,128], index: 12, kind: input, shape index: {}]   ;;  %s11927_s13 = inlined_call_operand.vmem [shape: f32[2,1,128], index: 13, kind: input, shape index: {}]   ;;  %s11928_s14 = inlined_call_operand.hbm [shape: f32[2,128,128], index: 14, kind: input, shape index: {}]   ;;  %s11929_s15 = inlined_call_operand.vmem [shape: f32[2,1,128], index: 15, kind: input, shape index: {}]   ;;  %s11930_s16 = inlined_call_operand.hbm [shape: f32[2,128,128], index: 16, kind: input, shape index: {}]   ;;  %s11931_s17 = inlined_call_operand.vmem [shape: f32[2,1,128], index: 17, kind: input, shape index: {}]   ;;  %s11932_s18 = inlined_call_operand.vmem [shape: f32[2,128,256], index: 18, kind: input, shape index: {}]   ;;  %s11933_s19 = inlined_call_operand.vmem [shape: f32[2,1,256], index: 19, kind: input, shape index: {}]   ;;  %s11934_s20 = inlined_call_operand.hbm [shape: f32[2,256,128], index: 20, kind: input, shape index: {}]   ;;  %s11935_s21 = inlined_call_operand.vmem [shape: f32[2,1,128], index: 21, kind: input, shape index: {}]   ;;  %s11936_s22 = inlined_call_operand.vmem [shape: f32[2,1,128], index: 22, kind: input, shape index: {}]   ;;  %s11937_s23 = inlined_call_operand.vmem [shape: f32[2,1,128], index: 23, kind: input, shape index: {}]   ;;  %s11938_s24 = inlined_call_operand.vmem [shape: f32[2,1,128], index: 24, kind: input, shape index: {}]   ;;  %s11939_s25 = inlined_call_operand.vmem [shape: f32[2,1,128], index: 25, kind: input, shape index: {}]   ;;  %s11940_s26 = inlined_call_operand.vmem [shape: f32[2,1,128], index: 26, kind: input, shape index: {}]   ;;  %s11941_s27 = inlined_call_operand.vmem [shape: f32[2,1,128], index: 27, kind: input, shape index: {}]   ;;  %s11942_s28 = inlined_call_operand.vmem [shape: f32[2,8,128], index: 28, kind: output, shape index: {}]  }
   0x1   :  { %11956 = sst [smem:[#allocation22_spill]] %s11914_s0 }
   0x2   :  { %11957 = sst [smem:[#allocation23_spill]] %s11915_s1 }
   0x3   :  { %11958 = sst [smem:[#allocation24_spill]] %s11916_s2 }
   0x4   :  { %11959 = sst [smem:[#allocation25_spill]] %s11917_s3 }
   0x5   :  { %11960 = sst [smem:[#allocation26_spill]] %s11918_s4 }
   0x6   :  { %11961 = sst [smem:[#allocation27_spill]] %s11919_s5 }
   0x7   :  { %11962 = sst [smem:[#allocation28_spill]] %s11920_s6 }
   0x8   :  { %11963 = sst [smem:[#allocation29_spill]] %s11921_s7 }
   0x9   :  { %11964 = sst [smem:[#allocation30_spill]] %s11922_s8 }
   0xa   :  { %11965 = sst [smem:[#allocation31_spill]] %s11923_s9 }
   0xb   :  { %11966 = sst [smem:[#allocation32_spill]] %s11924_s10 }
   0xc   :  { %11967 = sst [smem:[#allocation33_spill]] %s11925_s11 }
   0xd   :  { %11968 = sst [smem:[#allocation34_spill]] %s11926_s12 }
   0xe   :  { %11969 = sst [smem:[#allocation35_spill]] %s11930_s16 }
   0xf   :  { %33 = vsyncpa [#allocation3], 0 }
  0x10   :  { %34 = vsyncpa [#allocation5], 0 }
  0x11   :  { %35 = vsyncpa [#allocation8], 0 }
  0x12   :  { %36 = vsyncpa [#allocation11], 0 }
  0x13   :  { %37 = vsyncpa [#allocation14], 0  ;;  %s10477_s8 = smov 0  }
  0x14 LB: > { %11970 = sst [smem:[#allocation21_spill]] %s10312_s8  ;;  %s10483_s5 = sadd.s32 4294967295, %s10312_s8   ;;  %s10312_s8 = sphi %s10477_s8, %s43_s8  }
  0x15   : > { %p8502_p0 = scmp.ge.s32.totalorder %s10312_s8, 1  ;;  %p667_p1 = scmp.lt.s32.totalorder %s10312_s8, 3 }
  0x16   : > { %p9931_p2 = scmp.eq.s32.totalorder %s10483_s5, 0  ;;  %s10314_s30 = smov [#allocation4]  }
  0x17   : > { %p10488_p3 = pnand %p8502_p0, %p667_p1  ;;  %s698_s3 = sshll.u32 %s10314_s30, 4  ;;  %s699_s3 = int_to_ptr.vmem [resolvable:$true] %s698_s3 }
  0x18   : > { %s10315_s6 = smov [#allocation7]   ;;  %s10316_s11 = smov [#allocation10]  }
  0x19   : > { %p9903_p4 = pneg %p10488_p3  ;;  %s730_s10 = sshll.u32 %s10315_s6, 4  ;;  %s10494_s10 = int_to_ptr.vmem [resolvable:$true] %s730_s10 }
  0x1a   : > { %s762_s29 = sshll.u32 %s10316_s11, 4  ;;  %s10317_s2 = smov [#allocation13]   ;;  %s10502_s29 = int_to_ptr.vmem [resolvable:$true] %s762_s29 }
  0x1b   : > { %p10498_p5 = pnand %p9931_p2, %p9903_p4  ;;  %s10504_s7 = sshll.u32 %s10317_s2, 4  ;;  %s795_s7 = int_to_ptr.vmem [resolvable:$true] %s10504_s7 }
  0x1c   : > { %s10063_s1 = scalar_lea.vmem %s699_s3, 4096  ;;  %p10071_p10 = scmp.lt.s32.totalorder %s699_s3, %s699_s3 }
  0x1d   : > { %p10508_p6 = pneg %p10498_p5  ;;  %p10064_p7 = scmp.ne.s32.totalorder %s699_s3, %s10063_s1 }
  0x1e   : > { %p10072_p11 = scmp.lt.s32.totalorder %s10063_s1, %s10063_s1 }
  0x1f   : > { %p10066_p8 = pnand %p10064_p7, %p10508_p6 }
  0x20   : > { %p10073_p12 = por %p10072_p11, %p10071_p10 }
  0x21   : > { %p10067_p9 = pneg %p10066_p8 }
  0x23   : > { %p10074_p13 = pnand %p10073_p12, %p10067_p9 }
  0x25   : > { %10077 = shalt.err (!%p10074_p13)
}
  0x26   : > { %s10318_s4 = smov 128   ;;  %s10319_s30 = smov 8  }
  0x27   : > { %s11974_s2 = sld [smem:[#allocation26_spill]]  ;;  %s10089_s8 = scalar_lea.vmem %s10494_s10, 4096 }
  0x28   : > { %p10090_p0 = scmp.ne.s32.totalorder %s10494_s10, %s10089_s8  ;;  %p10097_p7 = scmp.lt.s32.totalorder %s10494_s10, %s10494_s10 }
  0x29   : > { %p10098_p8 = scmp.lt.s32.totalorder %s10089_s8, %s10089_s8 }
  0x2a   : > { %p10092_p1 = pnand %p10090_p0, %p10508_p6 }
  0x2b   : > { %p10099_p9 = por %p10098_p8, %p10097_p7 }
  0x2c   : > { %p10093_p4 = pneg %p10092_p1 }
  0x2d   : > { %9909 = dma.hbm_to_vmem [thread:$0]  (!%p10498_p5), %s11974_s2, 4096, %s699_s3, [#allocation5], %s10318_s4, %s10318_s4, %s10319_s30  }
  0x2e   : > { %p10100_p10 = pnand %p10099_p9, %p10093_p4 }
  0x30   : > { %10103 = shalt.err (!%p10100_p10)
}
  0x31   : > { %s11975_s3 = sld [smem:[#allocation30_spill]]  ;;  %s10115_s11 = scalar_lea.vmem %s10502_s29, 4096 }
  0x32   : > { %p10116_p11 = scmp.ne.s32.totalorder %s10502_s29, %s10115_s11  ;;  %p10123_p0 = scmp.lt.s32.totalorder %s10502_s29, %s10502_s29 }
  0x33   : > { %p10124_p1 = scmp.lt.s32.totalorder %s10115_s11, %s10115_s11 }
  0x34   : > { %p10118_p12 = pnand %p10116_p11, %p10508_p6 }
  0x35   : > { %p10125_p4 = por %p10124_p1, %p10123_p0 }
  0x36   : > { %p10119_p13 = pneg %p10118_p12 }
  0x37   : > { %9915 = dma.hbm_to_vmem [thread:$0]  (!%p10498_p5), %s11975_s3, 4096, %s10494_s10, [#allocation8], %s10318_s4, %s10318_s4, %s10319_s30  }
  0x38   : > { %p10126_p7 = pnand %p10125_p4, %p10119_p13 }
  0x3a   : > { %10129 = shalt.err (!%p10126_p7)
}
  0x3b   : > { %s11976_s10 = sld [smem:[#allocation34_spill]]  ;;  %s10141_s1 = scalar_lea.vmem %s795_s7, 4096 }
  0x3c   : > { %p10142_p8 = scmp.ne.s32.totalorder %s795_s7, %s10141_s1  ;;  %p10149_p11 = scmp.lt.s32.totalorder %s795_s7, %s795_s7 }
  0x3d   : > { %p10150_p12 = scmp.lt.s32.totalorder %s10141_s1, %s10141_s1 }
  0x3e   : > { %p10144_p9 = pnand %p10142_p8, %p10508_p6 }
  0x3f   : > { %p10151_p13 = por %p10150_p12, %p10149_p11 }
  0x40   : > { %p10145_p10 = pneg %p10144_p9 }
  0x41   : > { %9921 = dma.hbm_to_vmem [thread:$0]  (!%p10498_p5), %s11976_s10, 4096, %s10502_s29, [#allocation11], %s10318_s4, %s10318_s4, %s10319_s30  }
  0x42   : > { %p10152_p0 = pnand %p10151_p13, %p10145_p10 }
  0x44   : > { %10155 = shalt.err (!%p10152_p0)
}
  0x45   : > { %s11977_s16 = sld [smem:[#allocation35_spill]]  ;;  %s10320_s29 = smov [#allocation2]  }
  0x46   : > { %s682_s11 = sshll.u32 %s10320_s29, 4  ;;  %s10321_s8 = smov [#allocation6]   ;;  %s683_s11 = int_to_ptr.vmem [resolvable:$true] %s682_s11 }
  0x47   : > { %s714_s2 = sshll.u32 %s10321_s8, 4  ;;  %s10167_s10 = scalar_lea.vmem %s683_s11, 4096  ;;  %s715_s2 = int_to_ptr.vmem [resolvable:$true] %s714_s2 }
  0x48   : > { %p10168_p1 = scmp.ne.s32.totalorder %s683_s11, %s10167_s10  ;;  %p10175_p8 = scmp.lt.s32.totalorder %s683_s11, %s683_s11 }
  0x49   : > { %p10176_p9 = scmp.lt.s32.totalorder %s10167_s10, %s10167_s10 }
  0x4a   : > { %p10170_p4 = pnand %p10168_p1, %p10508_p6 }
  0x4b   : > { %9927 = dma.hbm_to_vmem [thread:$0]  (!%p10498_p5), %s11977_s16, 4096, %s795_s7, [#allocation14], %s10318_s4, %s10318_s4, %s10319_s30  }
  0x4c   : > { %p10171_p7 = pneg %p10170_p4  ;;  %p10177_p10 = por %p10176_p9, %p10175_p8 }
  0x4e   : > { %p10178_p11 = pnand %p10177_p10, %p10171_p7 }
  0x50   : > { %10181 = shalt.err (!%p10178_p11)
}
  0x51   : > { %s11978_s6 = sld [smem:[#allocation24_spill]]  ;;  %s10193_s3 = scalar_lea.vmem %s715_s2, 4096 }
  0x52   : > { %p10194_p12 = scmp.ne.s32.totalorder %s715_s2, %s10193_s3  ;;  %p10201_p1 = scmp.lt.s32.totalorder %s715_s2, %s715_s2 }
  0x53   : > { %p10202_p4 = scmp.lt.s32.totalorder %s10193_s3, %s10193_s3 }
  0x54   : > { %p10196_p13 = pnand %p10194_p12, %p10508_p6 }
  0x55   : > { %p10203_p7 = por %p10202_p4, %p10201_p1 }
  0x56   : > { %p10197_p0 = pneg %p10196_p13 }
  0x57   : > { %9906 = dma.hbm_to_vmem [thread:$0]  (!%p10498_p5), %s11978_s6, 4096, %s683_s11, [#allocation3], %s10318_s4, %s10318_s4, %s10319_s30  }
  0x58   : > { %p10204_p8 = pnand %p10203_p7, %p10197_p0 }
  0x5a   : > { %10207 = shalt.err (!%p10204_p8)
}
  0x5b   : > { %s11979_s10 = sld [smem:[#allocation28_spill]]  ;;  %s10322_s11 = smov [#allocation9]  }
  0x5c   : > { %s746_s7 = sshll.u32 %s10322_s11, 4  ;;  %s10323_s1 = smov [#allocation12]   ;;  %s747_s7 = int_to_ptr.vmem [resolvable:$true] %s746_s7 }
  0x5d   : > { %s778_s6 = sshll.u32 %s10323_s1, 4  ;;  %s10219_s16 = scalar_lea.vmem %s747_s7, 4096  ;;  %s779_s6 = int_to_ptr.vmem [resolvable:$true] %s778_s6 }
  0x5e   : > { %p10220_p9 = scmp.ne.s32.totalorder %s747_s7, %s10219_s16  ;;  %p10227_p12 = scmp.lt.s32.totalorder %s747_s7, %s747_s7 }
  0x5f   : > { %p10228_p13 = scmp.lt.s32.totalorder %s10219_s16, %s10219_s16 }
  0x60   : > { %p10222_p10 = pnand %p10220_p9, %p10508_p6 }
  0x61   : > { %9912 = dma.hbm_to_vmem [thread:$0]  (!%p10498_p5), %s11979_s10, 4096, %s715_s2, [#allocation5], %s10318_s4, %s10318_s4, %s10319_s30  }
  0x62   : > { %p10223_p11 = pneg %p10222_p10  ;;  %p10229_p0 = por %p10228_p13, %p10227_p12 }
  0x64   : > { %p10230_p1 = pnand %p10229_p0, %p10223_p11 }
  0x66   : > { %10233 = shalt.err (!%p10230_p1)
}
  0x67   : > { %s11980_s29 = sld [smem:[#allocation32_spill]]  ;;  %s10245_s8 = scalar_lea.vmem %s779_s6, 4096 }
  0x68   : > { %p10246_p4 = scmp.ne.s32.totalorder %s779_s6, %s10245_s8  ;;  %p10253_p9 = scmp.lt.s32.totalorder %s779_s6, %s779_s6 }
  0x69   : > { %p10254_p10 = scmp.lt.s32.totalorder %s10245_s8, %s10245_s8 }
  0x6a   : > { %p10248_p7 = pnand %p10246_p4, %p10508_p6 }
  0x6b   : > { %p10255_p11 = por %p10254_p10, %p10253_p9 }
  0x6c   : > { %p10249_p8 = pneg %p10248_p7 }
  0x6d   : > { %9918 = dma.hbm_to_vmem [thread:$0]  (!%p10498_p5), %s11980_s29, 4096, %s747_s7, [#allocation8], %s10318_s4, %s10318_s4, %s10319_s30  }
  0x6e   : > { %p10256_p12 = pnand %p10255_p11, %p10249_p8 }
  0x70   : > { %10259 = shalt.err (!%p10256_p12)
}
  0x71   : > { %9924 = dma.hbm_to_vmem [thread:$0]  (!%p10498_p5), %s11928_s14, 4096, %s779_s6, [#allocation11], %s10318_s4, %s10318_s4, %s10319_s30  }
  0x72   : > { %s10324_s11 = smov [#allocation15]  }
  0x73   : > { %s816_s7 = sshll.u32 %s10324_s11, 4  ;;  %s817_s7 = int_to_ptr.vmem [resolvable:$true] %s816_s7 }
  0x74   : > { %s10271_s1 = scalar_lea.vmem %s817_s7, 8192  ;;  %p10279_p4 = scmp.lt.s32.totalorder %s817_s7, %s817_s7 }
  0x75   : > { %p10272_p13 = scmp.ne.s32.totalorder %s817_s7, %s10271_s1  ;;  %p10280_p7 = scmp.lt.s32.totalorder %s10271_s1, %s10271_s1 }
  0x77   : > { %p10274_p0 = pnand %p10272_p13, %p10508_p6  ;;  %p10281_p8 = por %p10280_p7, %p10279_p4 }
  0x79   : > { %p10275_p1 = pneg %p10274_p0 }
  0x7b   : > { %p10282_p9 = pnand %p10281_p8, %p10275_p1 }
  0x7d   : > { %10285 = shalt.err (!%p10282_p9)
}
  0x7e   : > { %9930 = dma.hbm_to_vmem [thread:$0]  (!%p10498_p5), %s11934_s20, 8192, %s817_s7, [#allocation14], %s10318_s4, %s10318_s4, %s10319_s30  }
  0x7f   : > { %860 = sbr.rel (%p10488_p3) target bundleno = 8020 (0x1f54), region = 132 }
  0x84   : > { %10291 = dma.done.wait (%p9931_p2), [#allocation3], 4096  }
  0x85   : > { %10293 = vsyncadd (%p9931_p2), [#allocation3], 4294963200 }
  0x86   : > { %10295 = dma.done.wait (%p9931_p2), [#allocation5], 8192  }
  0x87   : > { %10297 = vsyncadd (%p9931_p2), [#allocation5], 4294959104 }
  0x88   : > { %10299 = dma.done.wait (%p9931_p2), [#allocation8], 8192  }
  0x89   : > { %10301 = vsyncadd (%p9931_p2), [#allocation8], 4294959104 }
  0x8a   : > { %10303 = dma.done.wait (%p9931_p2), [#allocation11], 8192  }
  0x8b   : > { %10305 = vsyncadd (%p9931_p2), [#allocation11], 4294959104 }
  0x8c   : > { %10307 = dma.done.wait (%p9931_p2), [#allocation14], 12288  }
  0x8d   : > { %10309 = vsyncadd (%p9931_p2), [#allocation14], 4294955008  ;;  %v10325_v0 = vmov 0.0   ;;  %vm10326_vm0 = vmmov 0   ;;  %v1006_v1 = vld [vmem:[#allocation4 + $0x78] sm:$0xff]  ;;  %v1005_v3 = vld [vmem:[#allocation4 + $0x70] sm:$0xff]  ;;  %v1285_v60 = vlaneseq }
  0x8e   : > { %9146 = vmatprep.subr.mxu1 %v10325_v0  ;;  %9111 = vmatprep.subr.mxu0 %v10325_v0  ;;  %v989_v2 = vld [vmem:[#allocation2 + $0x78] sm:$0xff]  ;;  %v988_v4 = vld [vmem:[#allocation2 + $0x70] sm:$0xff]  ;;  %v1004_v5 = vld [vmem:[#allocation4 + $0x68] sm:$0xff]  ;;  %p964_p2 = scmp.lt.s32.totalorder %s10483_s5, 1  ;;  %s11981_s4 = sld [smem:[#allocation22_spill]]  ;;  %vm1708_vm1 = vcmask 261120  }
  0x8f   : > { %9178 = vmatprep.mubr.msk.f32.mxu1 %vm10326_vm0, %v10325_v0  ;;  %9143 = vmatprep.mubr.msk.f32.mxu0 %vm10326_vm0, %v10325_v0  ;;  %v987_v6 = vld [vmem:[#allocation2 + $0x68] sm:$0xff]  ;;  %v1003_v7 = vld [vmem:[#allocation4 + $0x60] sm:$0xff]  ;;  %v1002_v9 = vld [vmem:[#allocation4 + $0x58] sm:$0xff]  ;;  %s11982_s8 = sld [smem:[#allocation27_spill]]  ;;  %s11950_s1 = smov 32   ;;  %vm2024_vm3 = vcmask 64512  }
  0x90   : > { %9147 = vmatpush3.msra.mxu1 %v1006_v1  ;;  %9112 = vmatpush3.msra.mxu0 %v989_v2  ;;  %v986_v8 = vld [vmem:[#allocation2 + $0x60] sm:$0xff]  ;;  %v985_v10 = vld [vmem:[#allocation2 + $0x58] sm:$0xff]  ;;  %v1001_v11 = vld [vmem:[#allocation4 + $0x50] sm:$0xff]  ;;  %s11996_s5 = smov (!%p964_p2, %s10483_s5), 1  ;;  %s11984_s7 = sld [smem:[#allocation25_spill]]  ;;  %v10735_v1 = vshrl.u32 %v1285_v60, 7 }
  0x91   : > { %9148 = vmatprep.subr.mxu1 %v10325_v0  ;;  %9113 = vmatprep.subr.mxu0 %v10325_v0  ;;  %v984_v12 = vld [vmem:[#allocation2 + $0x50] sm:$0xff]  ;;  %v1000_v13 = vld [vmem:[#allocation4 + $0x48] sm:$0xff]  ;;  %v999_v15 = vld [vmem:[#allocation4 + $0x40] sm:$0xff]  ;;  %s11949_s9 = sshll.u32 %s11996_s5, 3  ;;  %s11952_s2 = smov 96  }
  0x92   : > { %9149 = vmatpush3.msra.mxu1 %v1005_v3  ;;  %9114 = vmatpush3.msra.mxu0 %v988_v4  ;;  %v983_v14 = vld [vmem:[#allocation2 + $0x48] sm:$0xff]  ;;  %v982_v16 = vld [vmem:[#allocation2 + $0x40] sm:$0xff]  ;;  %v998_v17 = vld [vmem:[#allocation4 + $0x38] sm:$0xff]  ;;  %s11954_s6 = smov 64   ;;  %v10330_v58 = vmov 1983009808  }
  0x93   : > { %9150 = vmatprep.subr.mxu1 %v10325_v0  ;;  %9115 = vmatprep.subr.mxu0 %v10325_v0  ;;  %v981_v18 = vld [vmem:[#allocation2 + $0x38] sm:$0xff]  ;;  %v997_v19 = vld [vmem:[#allocation4 + $0x30] sm:$0xff]  ;;  %v996_v21 = vld [vmem:[#allocation4 + $0x28] sm:$0xff]  ;;  %v1283_v59 = vunpack.c.l.s4 %v10330_v58  ;;  %v10331_v61 = vmov 1934713408   ;;  %s11988_s12 = sld [smem:[#allocation31_spill]] }
  0x94   : > { %9151 = vmatpush3.msra.mxu1 %v1004_v5  ;;  %9116 = vmatpush3.msra.mxu0 %v987_v6  ;;  %v980_v20 = vld [vmem:[#allocation2 + $0x30] sm:$0xff]  ;;  %v979_v22 = vld [vmem:[#allocation2 + $0x28] sm:$0xff]  ;;  %v995_v23 = vld [vmem:[#allocation4 + $0x20] sm:$0xff]  ;;  %s10677_s30 = scalar_lea.vmem %s11981_s4, %s11949_s9  ;;  %v1315_v62 = vunpack.c.l.s4 %v10331_v61  ;;  %s11985_s4 = sld [smem:[#allocation23_spill]] }
  0x95   : > { %9152 = vmatprep.subr.mxu1 %v10325_v0  ;;  %9117 = vmatprep.subr.mxu0 %v10325_v0  ;;  %v978_v24 = vld [vmem:[#allocation2 + $0x20] sm:$0xff]  ;;  %v994_v25 = vld [vmem:[#allocation4 + $0x18] sm:$0xff]  ;;  %v993_v27 = vld [vmem:[#allocation4 + $0x10] sm:$0xff]  ;;  %s11983_s16 = smov %s11982_s8  ;;  %v1284_v63 = vunpack.c.0.s8 %v1283_v59  ;;  %s11989_s29 = sld [smem:[#allocation33_spill]] }
  0x96   : > { %9153 = vmatpush3.msra.mxu1 %v1003_v7  ;;  %9118 = vmatpush3.msra.mxu0 %v986_v8  ;;  %v977_v26 = vld [vmem:[#allocation2 + $0x18] sm:$0xff]  ;;  %v976_v28 = vld [vmem:[#allocation2 + $0x10] sm:$0xff]  ;;  %v992_v29 = vld [vmem:[#allocation4 + $0x8] sm:$0xff]  ;;  %v1316_v4 = vunpack.c.0.s8 %v1315_v62  ;;  %s11991_s3 = smov 96   ;;  %s11993_s11 = sshll.u32 %s11996_s5, 3 }
  0x97   : > { %9154 = vmatprep.subr.mxu1 %v10325_v0  ;;  %9119 = vmatprep.subr.mxu0 %v10325_v0  ;;  %v975_v30 = vld [vmem:[#allocation2 + $0x8] sm:$0xff]  ;;  %v991_v31 = vld [vmem:[#allocation4] sm:$0xff]  ;;  %v1023_v42 = vld [vmem:[#allocation6 + $0x78] sm:$0xff]  ;;  %v10738_v5 = vsub.s32 %v1284_v63, %v10735_v1 }
  0x98   : > { %9155 = vmatpush3.msra.mxu1 %v1002_v9  ;;  %9120 = vmatpush3.msra.mxu0 %v985_v10  ;;  %v974_v32 = vld [vmem:[#allocation2] sm:$0xff]  ;;  %v1022_v43 = vld [vmem:[#allocation6 + $0x70] sm:$0xff]  ;;  %v1021_v44 = vld [vmem:[#allocation6 + $0x68] sm:$0xff] }
  0x99   : > { %9156 = vmatprep.subr.mxu1 %v10325_v0  ;;  %9121 = vmatprep.subr.mxu0 %v10325_v0  ;;  %v10682_v33 = vld [vmem:[%s10677_s30] sm:$0xff]  ;;  %v1019_v46 = vld [vmem:[#allocation6 + $0x58] sm:$0xff]  ;;  %v1018_v47 = vld [vmem:[#allocation6 + $0x50] sm:$0xff] }
  0x9a   : > { %9157 = vmatpush3.msra.mxu1 %v1001_v11  ;;  %9122 = vmatpush3.msra.mxu0 %v984_v12  ;;  %v8526_v34 = vld [vmem:[%s11982_s8] ss:$0 sm:$0xff]  ;;  %v1017_v48 = vld [vmem:[#allocation6 + $0x48] sm:$0xff]  ;;  %v1015_v50 = vld [vmem:[#allocation6 + $0x38] sm:$0xff]  ;;  %v10743_v12 = vsub.s32 %v1316_v4, %v10735_v1  ;;  %s11986_s8 = sld [smem:[#allocation29_spill]] }
  0x9b   : > { %9158 = vmatprep.subr.mxu1 %v10325_v0  ;;  %9123 = vmatprep.subr.mxu0 %v10325_v0  ;;  %v8525_v36 = vld [vmem:[%s11984_s7] ss:$0 sm:$0xff]  ;;  %v1014_v51 = vld [vmem:[#allocation6 + $0x30] sm:$0xff]  ;;  %v1013_v52 = vld [vmem:[#allocation6 + $0x28] sm:$0xff] }
  0x9c   : > { %9159 = vmatpush3.msra.mxu1 %v1000_v13  ;;  %9124 = vmatpush3.msra.mxu0 %v983_v14  ;;  %v1020_v45 = vld [vmem:[#allocation6 + $0x60] sm:$0xff]  ;;  %v1011_v54 = vld [vmem:[#allocation6 + $0x18] sm:$0xff]  ;;  %v1010_v55 = vld [vmem:[#allocation6 + $0x10] sm:$0xff] }
  0x9d   : > { %9160 = vmatprep.subr.mxu1 %v10325_v0  ;;  %9125 = vmatprep.subr.mxu0 %v10325_v0  ;;  %v1016_v49 = vld [vmem:[#allocation6 + $0x40] sm:$0xff]  ;;  %v1009_v56 = vld [vmem:[#allocation6 + $0x8] sm:$0xff] }
  0x9e   : > { %9161 = vmatpush3.msra.mxu1 %v999_v15  ;;  %9126 = vmatpush3.msra.mxu0 %v982_v16  ;;  %v1012_v53 = vld [vmem:[#allocation6 + $0x20] sm:$0xff] }
  0x9f   : > { %9162 = vmatprep.subr.mxu1 %v10325_v0  ;;  %9127 = vmatprep.subr.mxu0 %v10325_v0  ;;  %v1008_v57 = vld [vmem:[#allocation6] sm:$0xff] }
  0xa0   : > { %9163 = vmatpush3.msra.mxu1 %v998_v17  ;;  %9128 = vmatpush3.msra.mxu0 %v981_v18  ;;  %s11987_s10 = smov %s11986_s8 }
  0xa1   : > { %9164 = vmatprep.subr.mxu1 %v10325_v0  ;;  %9129 = vmatprep.subr.mxu0 %v10325_v0 }
  0xa2   : > { %9165 = vmatpush3.msra.mxu1 %v997_v19  ;;  %9130 = vmatpush3.msra.mxu0 %v980_v20 }
  0xa3   : > { %9166 = vmatprep.subr.mxu1 %v10325_v0  ;;  %9131 = vmatprep.subr.mxu0 %v10325_v0 }
  0xa4   : > { %9167 = vmatpush3.msra.mxu1 %v996_v21  ;;  %9132 = vmatpush3.msra.mxu0 %v979_v22 }
  0xa5   : > { %9168 = vmatprep.subr.mxu1 %v10325_v0  ;;  %9133 = vmatprep.subr.mxu0 %v10325_v0 }
  0xa6   : > { %9169 = vmatpush3.msra.mxu1 %v995_v23  ;;  %9134 = vmatpush3.msra.mxu0 %v978_v24 }
  0xa7   : > { %9170 = vmatprep.subr.mxu1 %v10325_v0  ;;  %9135 = vmatprep.subr.mxu0 %v10325_v0 }
  0xa8   : > { %9171 = vmatpush3.msra.mxu1 %v994_v25  ;;  %9136 = vmatpush3.msra.mxu0 %v977_v26 }
  0xa9   : > { %9172 = vmatprep.subr.mxu1 %v10325_v0  ;;  %9137 = vmatprep.subr.mxu0 %v10325_v0 }
  0xaa   : > { %9173 = vmatpush3.msra.mxu1 %v993_v27  ;;  %9138 = vmatpush3.msra.mxu0 %v976_v28 }
  0xab   : > { %9174 = vmatprep.subr.mxu1 %v10325_v0  ;;  %9139 = vmatprep.subr.mxu0 %v10325_v0 }
  0xac   : > { %9175 = vmatpush3.msra.mxu1 %v992_v29  ;;  %9140 = vmatpush3.msra.mxu0 %v975_v30 }
  0xad   : > { %9176 = vmatprep.subr.mxu1 %v10325_v0  ;;  %9141 = vmatprep.subr.mxu0 %v10325_v0 }
  0xae   : > { %9177 = vmatpush3.msra.mxu1 %v991_v31  ;;  %9142 = vmatpush3.msra.mxu0 %v974_v32 }
  0xaf   : > { %9179 = vmatmul.mubr.f32.vlgmr.msra.gmra.mxu1 %v10682_v33  ;;  %9144 = vmatmul.mubr.f32.vlgmr.msra.gmra.mxu0 %v10682_v33 }
  0xb0   : > { %9216 = vmatprep.subr.mxu1 %v10325_v0  ;;  %9218 = vmatprep.mubr.msk.f32.mxu1 %vm10326_vm0, %v10325_v0 }
  0xb1   : > { %9181 = vmatprep.subr.mxu0 %v10325_v0  ;;  %9213 = vmatprep.mubr.msk.f32.mxu0 %vm10326_vm0, %v10325_v0 }
  0xb2   : > { %9182 = vmatpush3.msra.mxu0 %v1023_v42 }
  0xb3   : > { %9183 = vmatprep.subr.mxu0 %v10325_v0 }
  0xb4   : > { %9184 = vmatpush3.msra.mxu0 %v1022_v43 }
  0xb5   : > { %9185 = vmatprep.subr.mxu0 %v10325_v0 }
  0xb6   : > { %9186 = vmatpush3.msra.mxu0 %v1021_v44 }
  0xb7   : > { %9187 = vmatprep.subr.mxu0 %v10325_v0 }
  0xb8   : > { %9188 = vmatpush3.msra.mxu0 %v1020_v45 }
  0xb9   : > { %9189 = vmatprep.subr.mxu0 %v10325_v0 }
  0xba   : > { %9190 = vmatpush3.msra.mxu0 %v1019_v46 }
  0xbb   : > { %9191 = vmatprep.subr.mxu0 %v10325_v0 }
  0xbc   : > { %9192 = vmatpush3.msra.mxu0 %v1018_v47 }
  0xbd   : > { %9193 = vmatprep.subr.mxu0 %v10325_v0 }
  0xbe   : > { %9194 = vmatpush3.msra.mxu0 %v1017_v48 }
  0xbf   : > { %9195 = vmatprep.subr.mxu0 %v10325_v0 }
  0xc0   : > { %9196 = vmatpush3.msra.mxu0 %v1016_v49 }
  0xc1   : > { %9197 = vmatprep.subr.mxu0 %v10325_v0 }
  0xc2   : > { %9198 = vmatpush3.msra.mxu0 %v1015_v50 }
  0xc3   : > { %9199 = vmatprep.subr.mxu0 %v10325_v0 }
  0xc4   : > { %9200 = vmatpush3.msra.mxu0 %v1014_v51 }
  0xc5   : > { %9201 = vmatprep.subr.mxu0 %v10325_v0 }
  0xc6   : > { %9202 = vmatpush3.msra.mxu0 %v1013_v52 }
  0xc7   : > { %9203 = vmatprep.subr.mxu0 %v10325_v0 }
  0xc8   : > { %9204 = vmatpush3.msra.mxu0 %v1012_v53 }
  0xc9   : > { %9205 = vmatprep.subr.mxu0 %v10325_v0 }
  0xca   : > { %9206 = vmatpush3.msra.mxu0 %v1011_v54 }
  0xcb   : > { %9207 = vmatprep.subr.mxu0 %v10325_v0 }
  0xcc   : > { %9208 = vmatpush3.msra.mxu0 %v1010_v55 }
  0xcd   : > { %9209 = vmatprep.subr.mxu0 %v10325_v0 }
  0xce   : > { %9210 = vmatpush3.msra.mxu0 %v1009_v56 }
  0xcf   : > { %9211 = vmatprep.subr.mxu0 %v10325_v0 }
  0xd0   : > { %9212 = vmatpush3.msra.mxu0 %v1008_v57 }
  0xd1   : > { %9214 = vmatmul.mubr.f32.vlgmr.msra.gmra.mxu0 %v10682_v33  ;;  %9256 = vmatprep.subr.mxu0 %v10325_v0 }
  0xd2   : > { %9264 = vmatprep.mubr.msk.f32.mxu0 %vm10326_vm0, %v10325_v0 }
 0x16f   : > { %v1190_v35 = vpop.f32.mrf.mxu1  ;;  %v1114_v37 = vpop.f32.mrf.mxu0 }
 0x170   : > { %v10700_v38 = vadd.f32 %v8526_v34, %v1190_v35  ;;  %v10702_v41 = vadd.f32 %v8525_v36, %v1114_v37 }
 0x171   : > { %v9180_v39 = vpop.f32.mrf.mxu1  ;;  %v9145_v40 = vpop.f32.mrf.mxu0 }
 0x172   : > { %1423 = vrot.lane.b32.xlu1 %v10700_v38, %s11950_s1  ;;  %1417 = vrot.lane.b32.xlu0 %v10700_v38, %s11952_s2 }
 0x176   : > { %1420 = vrot.lane.b32.xlu0 %v10700_v38, %s11954_s6  ;;  %1271 = vrot.lane.b32.xlu1 %v10702_v41, %s11952_s2 }
 0x17a   : > { %1274 = vrot.lane.b32.xlu0 %v10702_v41, %s11954_s6  ;;  %1277 = vrot.lane.b32.xlu1 %v10702_v41, %s11950_s1 }
 0x1e4   : > { %v1424_v2 = vpop.permute.xlu1 %1423  ;;  %v1418_v3 = vpop.permute.xlu0 %1417 }
 0x1e5   : > { %v1442_v6 = vcombine.low %v1418_v3, %v1424_v2  ;;  %v1443_v7 = vcombine.high %v1418_v3, %v1424_v2 }
 0x1e7   : > { %v1450_v13 = vrot.slane %v1442_v6, %v10738_v5  ;;  %v1457_v14 = vrot.slane %v1443_v7, %v10738_v5 }
 0x1e8   : > { %v1421_v8 = vpop.permute.xlu0 %1420  ;;  %v1272_v9 = vpop.permute.xlu1 %1271 }
 0x1e9   : > { %v1426_v10 = vcombine.low %v10700_v38, %v1421_v8  ;;  %v1427_v11 = vcombine.high %v10700_v38, %v1421_v8 }
 0x1eb   : > { %v1434_v15 = vrot.slane %v1426_v10, %v10738_v5  ;;  %v1441_v16 = vrot.slane %v1427_v11, %v10738_v5 }
 0x1ec   : > { %v1275_v17 = vpop.permute.xlu0 %1274  ;;  %v1278_v18 = vpop.permute.xlu1 %1277 }
 0x1ed   : > { %v1458_v19 = vcombine.low %v1434_v15, %v1450_v13  ;;  %v1459_v20 = vcombine.high %v1434_v15, %v1450_v13  ;;  %v1474_v21 = vcombine.low %v1441_v16, %v1457_v14  ;;  %v1475_v22 = vcombine.high %v1441_v16, %v1457_v14 }
 0x1ee   : > { %v1280_v23 = vcombine.low %v10702_v41, %v1275_v17  ;;  %v1281_v24 = vcombine.high %v10702_v41, %v1275_v17  ;;  %v1296_v25 = vcombine.low %v1272_v9, %v1278_v18  ;;  %v1297_v26 = vcombine.high %v1272_v9, %v1278_v18 }
 0x1ef   : > { %v1466_v27 = vrot.slane %v1458_v19, %v10743_v12  ;;  %v1473_v28 = vrot.slane %v1459_v20, %v10743_v12  ;;  %v1482_v29 = vrot.slane %v1474_v21, %v10743_v12  ;;  %v1489_v30 = vrot.slane %v1475_v22, %v10743_v12 }
 0x1f0   : > { %v1288_v31 = vrot.slane %v1280_v23, %v10738_v5  ;;  %v1295_v32 = vrot.slane %v1281_v24, %v10738_v5  ;;  %v1304_v34 = vrot.slane %v1296_v25, %v10738_v5  ;;  %v1311_v35 = vrot.slane %v1297_v26, %v10738_v5  ;;  %v10802_v24 = vld [vmem:[%s11985_s4] sm:$0xff]  ;;  %s11990_s4 = smov 64  }
 0x1f1   : > { %v1494_v36 = vcombine.low %v1466_v27, %v1473_v28  ;;  %v8530_v37 = vcombine.high %v1466_v27, %v1473_v28  ;;  %v1510_v38 = vcombine.low %v1482_v29, %v1489_v30  ;;  %v8531_v39 = vcombine.high %v1482_v29, %v1489_v30 }
 0x1f2   : > { %v1312_v40 = vcombine.low %v1288_v31, %v1304_v34  ;;  %v1313_v41 = vcombine.high %v1288_v31, %v1304_v34  ;;  %v1328_v42 = vcombine.low %v1295_v32, %v1311_v35  ;;  %v1329_v43 = vcombine.high %v1295_v32, %v1311_v35 }
 0x1f3   : > { %v1501_v44 = vrot.slane %v1494_v36, %v10738_v5  ;;  %v1509_v45 = vrot.slane %v8530_v37, %v10738_v5  ;;  %v1517_v46 = vrot.slane %v1510_v38, %v10738_v5  ;;  %v1525_v47 = vrot.slane %v8531_v39, %v10738_v5 }
 0x1f4   : > { %v1320_v48 = vrot.slane %v1312_v40, %v10743_v12  ;;  %v1327_v49 = vrot.slane %v1313_v41, %v10743_v12  ;;  %v1336_v50 = vrot.slane %v1328_v42, %v10743_v12  ;;  %v1343_v51 = vrot.slane %v1329_v43, %v10743_v12 }
 0x1f5   : > { %v1526_v52 = vcombine.low %v1501_v44, %v1509_v45  ;;  %v1542_v53 = vcombine.low %v1517_v46, %v1525_v47  ;;  %v1527_v6 = vcombine.high %v1501_v44, %v1509_v45  ;;  %v1543_v7 = vcombine.high %v1517_v46, %v1525_v47  ;;  %v1266_v46 = vpop.f32.mrf.mxu0 }
 0x1f6   : > { %v1348_v54 = vcombine.low %v1320_v48, %v1327_v49  ;;  %v8528_v55 = vcombine.high %v1320_v48, %v1327_v49  ;;  %v1364_v56 = vcombine.low %v1336_v50, %v1343_v51  ;;  %v8529_v57 = vcombine.high %v1336_v50, %v1343_v51 }
 0x1f7   : > { %v1534_v58 = vrot.slane %v1526_v52, %v10743_v12  ;;  %v1550_v59 = vrot.slane %v1542_v53, %v10743_v12  ;;  %v1541_v15 = vrot.slane %v1527_v6, %v10743_v12  ;;  %v1557_v16 = vrot.slane %v1543_v7, %v10743_v12  ;;  %v9215_v47 = vpop.f32.mrf.mxu0 }
 0x1f8   : > { %v1355_v60 = vrot.slane %v1348_v54, %v10738_v5  ;;  %v1363_v61 = vrot.slane %v8528_v55, %v10738_v5  ;;  %v1371_v62 = vrot.slane %v1364_v56, %v10738_v5  ;;  %v1379_v63 = vrot.slane %v8529_v57, %v10738_v5 }
 0x1f9   : > { %v1558_v2 = vcombine.low %v1534_v58, %v1550_v59  ;;  %v1559_v14 = vcombine.high %v1534_v58, %v1550_v59  ;;  %v1560_v20 = vcombine.low %v1541_v15, %v1557_v16  ;;  %v1561_v22 = vcombine.high %v1541_v15, %v1557_v16  ;;  %v8527_v58 = vld [vmem:[%s11986_s8] ss:$0 sm:$0xff] }
 0x1fa   : > { %v1380_v3 = vcombine.low %v1355_v60, %v1363_v61  ;;  %v1396_v4 = vcombine.low %v1371_v62, %v1379_v63  ;;  %v1381_v10 = vcombine.high %v1355_v60, %v1363_v61  ;;  %v1397_v11 = vcombine.high %v1371_v62, %v1379_v63 }
 0x1fb   : > { %9217 = vmatpush3.xpose.msk.msra.mxu1 %vm1708_vm1, %v1558_v2  ;;  %vm2013_vm2 = vcmp.eq.f32.partialorder %v10802_v24, 0.0  ;;  %v1267_v59 = vadd.f32 %v8527_v58, %v1266_v46 }
 0x1fc   : > { %9221 = vmatprep.subr.mxu1 %v10325_v0  ;;  %v1388_v8 = vrot.slane %v1380_v3, %v10743_v12  ;;  %v1404_v9 = vrot.slane %v1396_v4, %v10743_v12  ;;  %v1395_v18 = vrot.slane %v1381_v10, %v10743_v12  ;;  %v1411_v19 = vrot.slane %v1397_v11, %v10743_v12  ;;  %v1027_v10 = vld [vmem:[#allocation7 + $0x10] sm:$0xff]  ;;  %v1026_v11 = vld [vmem:[#allocation7 + $0x8] sm:$0xff] }
 0x1fe   : > { %v1412_v13 = vcombine.low %v1388_v8, %v1404_v9  ;;  %v1413_v17 = vcombine.high %v1388_v8, %v1404_v9  ;;  %v1414_v21 = vcombine.low %v1395_v18, %v1411_v19  ;;  %v1415_v23 = vcombine.high %v1395_v18, %v1411_v19  ;;  %v1028_v9 = vld [vmem:[#allocation7 + $0x18] sm:$0xff] }
 0x1ff   : > { %9257 = vmatpush3.msra.mxu0 %v1028_v9  ;;  %v1029_v9 = vld [vmem:[#allocation7 + $0x20] sm:$0xff] }
 0x200   : > { %9219 = vmatmul.mubr.msk.f32.vlgmr.msra.gmra.mxu1 %vm1708_vm1, %v1412_v13  ;;  %9258 = vmatprep.subr.mxu0 %v10325_v0 }
 0x201   : > { %9222 = vmatpush3.xpose.msk.msra.mxu1 %vm1708_vm1, %v1559_v14  ;;  %9223 = vmatprep.mubr.msk.f32.mxu1 %vm10326_vm0, %v10325_v0 }
 0x202   : > { %9226 = vmatprep.subr.mxu1 %v10325_v0  ;;  %9259 = vmatpush3.msra.mxu0 %v1027_v10  ;;  %v1036_v10 = vld [vmem:[#allocation7 + $0x58] sm:$0xff] }
 0x203   : > { %9260 = vmatprep.subr.mxu0 %v10325_v0 }
 0x204   : > { %9224 = vmatmul.mubr.msk.f32.vlgmr.msra.gmra.mxu1 %vm1708_vm1, %v1413_v17  ;;  %9261 = vmatpush3.msra.mxu0 %v1026_v11 }
 0x205   : > { %9227 = vmatpush3.xpose.msk.msra.mxu1 %vm1708_vm1, %v1560_v20  ;;  %9228 = vmatprep.mubr.msk.f32.mxu1 %vm10326_vm0, %v10325_v0 }
 0x206   : > { %9231 = vmatprep.subr.mxu1 %v10325_v0  ;;  %9262 = vmatprep.subr.mxu0 %v10325_v0 }
 0x208   : > { %9229 = vmatmul.mubr.msk.f32.vlgmr.msra.gmra.mxu1 %vm1708_vm1, %v1414_v21 }
 0x209   : > { %9232 = vmatpush3.xpose.msk.msra.mxu1 %vm1708_vm1, %v1561_v22  ;;  %9233 = vmatprep.mubr.msk.f32.mxu1 %vm10326_vm0, %v10325_v0 }
 0x20a   : > { %9236 = vmatprep.subr.mxu1 %v10325_v0 }
 0x20c   : > { %9234 = vmatmul.mubr.msk.f32.vlgmr.msra.gmra.mxu1 %vm1708_vm1, %v1415_v23 }
 0x20d   : > { %9238 = vmatprep.mubr.msk.f32.mxu1 %vm10326_vm0, %v10325_v0 }
 0x2c0   : > { %v1781_v25 = vpop.f32.mrf.mxu1 }
 0x2c1   : > { %v2016_v26 = vsel %vm2013_vm2, -inf, %v1781_v25 }
 0x2c2   : > { %v2020_v27 = vmul.f32 0.17677669, %v2016_v26  ;;  %v9220_v28 = vpop.f32.mrf.mxu1 }
 0x2c4   : > { %v1857_v29 = vpop.f32.mrf.mxu1  ;;  %v2025_v30 = vsel %vm2024_vm3, %v2020_v27, -inf }
 0x2c5   : > { %v2017_v31 = vsel %vm2013_vm2, -inf, %v1857_v29  ;;  %2026 = vmax.xlane.f32.xlu0 %v2025_v30 }
 0x2c6   : > { %v2021_v32 = vmul.f32 0.17677669, %v2017_v31  ;;  %v9225_v34 = vpop.f32.mrf.mxu1 }
 0x2c8   : > { %v1933_v35 = vpop.f32.mrf.mxu1  ;;  %v2028_v36 = vsel %vm2024_vm3, %v2021_v32, -inf }
 0x2c9   : > { %v2018_v37 = vsel %vm2013_vm2, -inf, %v1933_v35  ;;  %2029 = vmax.xlane.f32.xlu1 %v2028_v36 }
 0x2ca   : > { %v2022_v38 = vmul.f32 0.17677669, %v2018_v37  ;;  %v9230_v39 = vpop.f32.mrf.mxu1 }
 0x2cc   : > { %v2009_v40 = vpop.f32.mrf.mxu1  ;;  %v2031_v41 = vsel %vm2024_vm3, %v2022_v38, -inf }
 0x2cd   : > { %v2019_v42 = vsel %vm2013_vm2, -inf, %v2009_v40  ;;  %2032 = vmax.xlane.f32.xlu0 %v2031_v41 }
 0x2ce   : > { %v2023_v43 = vmul.f32 0.17677669, %v2019_v42  ;;  %v9235_v44 = vpop.f32.mrf.mxu1 }
 0x2d0   : > { %v2034_v45 = vsel %vm2024_vm3, %v2023_v43, -inf }
 0x2d1   : > { %2035 = vmax.xlane.f32.xlu0 %v2034_v45 }
 0x34e   : > { %v2027_v48 = vpop.xlane.xlu0 %2026 }
 0x34f   : > { %v2037_v49 = vsub.f32 %v2020_v27, %v2027_v48 }
 0x351   : > { %v2041_v50 = vmul.f32 1.442695, %v2037_v49 }
 0x352   : > { %v2030_v51 = vpop.xlane.xlu1 %2029 }
 0x353   : > { %9975 = vpow2.f32 %v2041_v50  ;;  %v2038_v52 = vsub.f32 %v2021_v32, %v2030_v51 }
 0x355   : > { %v2043_v53 = vmul.f32 1.442695, %v2038_v52 }
 0x356   : > { %v2033_v60 = vpop.xlane.xlu0 %2032 }
 0x357   : > { %9977 = vpow2.f32 %v2043_v53  ;;  %v2039_v61 = vsub.f32 %v2022_v38, %v2033_v60 }
 0x359   : > { %v2045_v63 = vmul.f32 1.442695, %v2039_v61 }
 0x35a   : > { %v2036_v62 = vpop.xlane.xlu0 %2035 }
 0x35b   : > { %v2040_v2 = vsub.f32 %v2023_v43, %v2036_v62  ;;  %9979 = vpow2.f32 %v2045_v63 }
 0x35d   : > { %v2047_v3 = vmul.f32 1.442695, %v2040_v2 }
 0x35f   : > { %9981 = vpow2.f32 %v2047_v3 }
 0x360   : > { %v10817_v54 = vpop.eup %9975 }
 0x361   : > { %v2049_v55 = vsel %vm2024_vm3, %v10817_v54, 0.0 }
 0x362   : > { %2050 = vadd.xlane.f32.xlu1 %v2049_v55 }
 0x364   : > { %v10821_v56 = vpop.eup %9977 }
 0x365   : > { %v2052_v57 = vsel %vm2024_vm3, %v10821_v56, 0.0 }
 0x366   : > { %2053 = vadd.xlane.f32.xlu0 %v2052_v57 }
 0x368   : > { %v10830_v4 = vpop.eup %9979 }
 0x369   : > { %v2055_v6 = vsel %vm2024_vm3, %v10830_v4, 0.0 }
 0x36c   : > { %v10834_v7 = vpop.eup %9981 }
 0x36d   : > { %v2058_v8 = vsel %vm2024_vm3, %v10834_v7, 0.0 }
 0x373   : > { %1566 = vrot.lane.b32.xlu1 %v1267_v59, %s11954_s6 }
 0x37c   : > { %1563 = vrot.lane.b32.xlu0 %v1267_v59, %s11952_s2 }
 0x397   : > { %2056 = vadd.xlane.f32.xlu1 %v2055_v6  ;;  %v1032_v6 = vld [vmem:[#allocation7 + $0x38] sm:$0xff] }
 0x39b   : > { %2059 = vadd.xlane.f32.xlu0 %v2058_v8  ;;  %v1031_v8 = vld [vmem:[#allocation7 + $0x30] sm:$0xff] }
 0x3a8   : > { %1569 = vrot.lane.b32.xlu1 %v1267_v59, %s11950_s1 }
 0x3eb   : > { %v2051_v13 = vpop.xlane.xlu1 %2050 }
 0x3ec   : > { %9983 = vrcp.f32 %v2051_v13  ;;  %v1035_v13 = vld [vmem:[#allocation7 + $0x50] sm:$0xff] }
 0x3ef   : > { %v1567_v14 = vpop.permute.xlu1 %1566  ;;  %v2054_v15 = vpop.xlane.xlu0 %2053 }
 0x3f0   : > { %v1572_v17 = vcombine.low %v1267_v59, %v1567_v14  ;;  %v1573_v18 = vcombine.high %v1267_v59, %v1567_v14  ;;  %9985 = vrcp.f32 %v2054_v15  ;;  %v1034_v15 = vld [vmem:[#allocation7 + $0x48] sm:$0xff] }
 0x3f2   : > { %v1580_v23 = vrot.slane %v1572_v17, %v10738_v5  ;;  %v1587_v25 = vrot.slane %v1573_v18, %v10738_v5  ;;  %v1033_v18 = vld [vmem:[#allocation7 + $0x40] sm:$0xff] }
 0x3f3   : > { %v1564_v19 = vpop.permute.xlu0 %1563 }
 0x3f9   : > { %v9984_v48 = vpop.eup %9983 }
 0x3fa   : > { %v2065_v55 = vmul.f32 %v9984_v48, %v10817_v54  ;;  %v2708_v48 = vld [vmem:[#allocation9 + $0x78] sm:$0xff] }
 0x3fd   : > { %v9986_v57 = vpop.eup %9985 }
 0x3fe   : > { %v2066_v61 = vmul.f32 %v9986_v57, %v10821_v56  ;;  %v2718_v57 = vld [vmem:[#allocation10 + $0x40] sm:$0xff] }
 0x420   : > { %v2057_v16 = vpop.xlane.xlu1 %2056 }
 0x421   : > { %9987 = vrcp.f32 %v2057_v16  ;;  %v1040_v16 = vld [vmem:[#allocation7 + $0x78] sm:$0xff] }
 0x424   : > { %v1570_v20 = vpop.permute.xlu1 %1569  ;;  %v2060_v45 = vpop.xlane.xlu0 %2059 }
 0x425   : > { %v1588_v21 = vcombine.low %v1564_v19, %v1570_v20  ;;  %v1589_v22 = vcombine.high %v1564_v19, %v1570_v20  ;;  %9989 = vrcp.f32 %v2060_v45  ;;  %v1039_v19 = vld [vmem:[#allocation7 + $0x70] sm:$0xff] }
 0x426   : > { %v2724_v45 = vld [vmem:[#allocation10 + $0x70] sm:$0xff] }
 0x427   : > { %v1596_v26 = vrot.slane %v1588_v21, %v10738_v5  ;;  %v1603_v27 = vrot.slane %v1589_v22, %v10738_v5  ;;  %v1038_v21 = vld [vmem:[#allocation7 + $0x68] sm:$0xff] }
 0x429   : > { %v1604_v28 = vcombine.low %v1580_v23, %v1596_v26  ;;  %v1605_v29 = vcombine.high %v1580_v23, %v1596_v26  ;;  %v1620_v30 = vcombine.low %v1587_v25, %v1603_v27  ;;  %v1621_v31 = vcombine.high %v1587_v25, %v1603_v27  ;;  %v1037_v23 = vld [vmem:[#allocation7 + $0x60] sm:$0xff] }
 0x42b   : > { %v1612_v32 = vrot.slane %v1604_v28, %v10743_v12  ;;  %v1619_v34 = vrot.slane %v1605_v29, %v10743_v12  ;;  %v1628_v35 = vrot.slane %v1620_v30, %v10743_v12  ;;  %v1635_v36 = vrot.slane %v1621_v31, %v10743_v12 }
 0x42d   : > { %v1640_v37 = vcombine.low %v1612_v32, %v1619_v34  ;;  %v8532_v38 = vcombine.high %v1612_v32, %v1619_v34  ;;  %v1656_v39 = vcombine.low %v1628_v35, %v1635_v36  ;;  %v8533_v40 = vcombine.high %v1628_v35, %v1635_v36 }
 0x42e   : > { %v9988_v54 = vpop.eup %9987 }
 0x42f   : > { %v1647_v41 = vrot.slane %v1640_v37, %v10738_v5  ;;  %v1655_v42 = vrot.slane %v8532_v38, %v10738_v5  ;;  %v1663_v43 = vrot.slane %v1656_v39, %v10738_v5  ;;  %v1671_v44 = vrot.slane %v8533_v40, %v10738_v5  ;;  %v8550_v37 = vld [vmem:[%s11988_s12] ss:$0 sm:$0xff] }
 0x430   : > { %v2067_v63 = vmul.f32 %v9988_v54, %v10830_v4  ;;  %v1025_v4 = vld [vmem:[#allocation7] sm:$0xff]  ;;  %v2713_v54 = vld [vmem:[#allocation10 + $0x18] sm:$0xff] }
 0x431   : > { %v1672_v46 = vcombine.low %v1647_v41, %v1655_v42  ;;  %v1688_v47 = vcombine.low %v1663_v43, %v1671_v44  ;;  %v1673_v51 = vcombine.high %v1647_v41, %v1655_v42  ;;  %v1689_v52 = vcombine.high %v1663_v43, %v1671_v44  ;;  %9263 = vmatpush3.msra.mxu0 %v1025_v4  ;;  %v2725_v44 = vld [vmem:[#allocation10 + $0x78] sm:$0xff] }
 0x432   : > { %v9990_v2 = vpop.eup %9989  ;;  %9278 = vmatprep.subr.mxu0 %v10325_v0 }
 0x433   : > { %v1680_v49 = vrot.slane %v1672_v46, %v10743_v12  ;;  %v1696_v50 = vrot.slane %v1688_v47, %v10743_v12  ;;  %v1687_v59 = vrot.slane %v1673_v51, %v10743_v12  ;;  %v1703_v60 = vrot.slane %v1689_v52, %v10743_v12  ;;  %v2723_v46 = vld [vmem:[#allocation10 + $0x68] sm:$0xff]  ;;  %v2722_v47 = vld [vmem:[#allocation10 + $0x60] sm:$0xff]  ;;  %v2720_v52 = vld [vmem:[#allocation10 + $0x50] sm:$0xff] }
 0x434   : > { %v2068_v56 = vmul.f32 %v9990_v2, %v10834_v7  ;;  %v1030_v7 = vld [vmem:[#allocation7 + $0x28] sm:$0xff]  ;;  %v2710_v2 = vld [vmem:[#allocation10] sm:$0xff] }
 0x435   : > { %v1704_v53 = vcombine.low %v1680_v49, %v1696_v50  ;;  %v1705_v58 = vcombine.high %v1680_v49, %v1696_v50  ;;  %v1706_v62 = vcombine.low %v1687_v59, %v1703_v60  ;;  %v1707_v3 = vcombine.high %v1687_v59, %v1703_v60  ;;  %v2707_v49 = vld [vmem:[#allocation9 + $0x70] sm:$0xff]  ;;  %v2721_v50 = vld [vmem:[#allocation10 + $0x58] sm:$0xff]  ;;  %v2706_v51 = vld [vmem:[#allocation9 + $0x68] sm:$0xff] }
 0x436   : > { %v2716_v59 = vld [vmem:[#allocation10 + $0x30] sm:$0xff]  ;;  %v2715_v60 = vld [vmem:[#allocation10 + $0x28] sm:$0xff] }
 0x437   : > { %9237 = vmatpush3.msra.mxu1 %v1704_v53  ;;  %v2705_v53 = vld [vmem:[#allocation9 + $0x60] sm:$0xff] }
 0x438   : > { %9239 = vmatmul.mubr.msk.f32.vlgmr.msra.gmra.mxu1 %vm2024_vm3, %v2065_v55  ;;  %9241 = vmatprep.subr.mxu1 %v10325_v0  ;;  %v2719_v55 = vld [vmem:[#allocation10 + $0x48] sm:$0xff] }
 0x439   : > { %9242 = vmatpush3.msra.mxu1 %v1705_v58  ;;  %9243 = vmatprep.mubr.msk.f32.mxu1 %vm10326_vm0, %v10325_v0  ;;  %v2717_v58 = vld [vmem:[#allocation10 + $0x38] sm:$0xff] }
 0x43a   : > { %9246 = vmatprep.subr.mxu1 %v10325_v0 }
 0x43c   : > { %9244 = vmatmul.mubr.msk.f32.vlgmr.msra.gmra.mxu1 %vm2024_vm3, %v2066_v61  ;;  %v2714_v61 = vld [vmem:[#allocation10 + $0x20] sm:$0xff] }
 0x43d   : > { %9247 = vmatpush3.msra.mxu1 %v1706_v62  ;;  %9248 = vmatprep.mubr.msk.f32.mxu1 %vm10326_vm0, %v10325_v0  ;;  %v2712_v62 = vld [vmem:[#allocation10 + $0x10] sm:$0xff] }
 0x43e   : > { %9251 = vmatprep.subr.mxu1 %v10325_v0 }
 0x440   : > { %9249 = vmatmul.mubr.msk.f32.vlgmr.msra.gmra.mxu1 %vm2024_vm3, %v2067_v63  ;;  %v2711_v63 = vld [vmem:[#allocation10 + $0x8] sm:$0xff] }
 0x441   : > { %9252 = vmatpush3.msra.mxu1 %v1707_v3  ;;  %9253 = vmatprep.mubr.msk.f32.mxu1 %vm10326_vm0, %v10325_v0 }
 0x442   : > { %9267 = vmatprep.subr.mxu1 %v10325_v0 }
 0x444   : > { %9254 = vmatmul.mubr.msk.f32.vlgmr.msra.gmra.mxu1 %vm2024_vm3, %v2068_v56 }
 0x445   : > { %9268 = vmatpush3.msra.mxu1 %v1032_v6  ;;  %9275 = vmatprep.mubr.msk.f32.mxu1 %vm10326_vm0, %v10325_v0 }
 0x446   : > { %9269 = vmatprep.subr.mxu1 %v10325_v0 }
 0x447   : > { %9270 = vmatpush3.msra.mxu1 %v1031_v8  ;;  %v2704_v8 = vld [vmem:[#allocation9 + $0x58] sm:$0xff] }
 0x448   : > { %9271 = vmatprep.subr.mxu1 %v10325_v0 }
 0x449   : > { %9272 = vmatpush3.msra.mxu1 %v1030_v7  ;;  %v2703_v7 = vld [vmem:[#allocation9 + $0x50] sm:$0xff] }
 0x44a   : > { %9273 = vmatprep.subr.mxu1 %v10325_v0 }
 0x44b   : > { %9274 = vmatpush3.msra.mxu1 %v1029_v9  ;;  %v2702_v9 = vld [vmem:[#allocation9 + $0x48] sm:$0xff] }
 0x44c   : > { %9289 = vmatprep.subr.mxu1 %v10325_v0 }
 0x4f8   : > { %v2138_v11 = vpop.f32.mrf.mxu1 }
 0x4f9   : > { %9265 = vmatmul.mubr.msk.f32.vlgmr.msra.gmra.mxu0 %vm1708_vm1, %v2138_v11  ;;  %v2699_v11 = vld [vmem:[#allocation9 + $0x30] sm:$0xff] }
 0x4fa   : > { %v9240_v14 = vpop.f32.mrf.mxu1  ;;  %9279 = vmatpush3.msra.mxu0 %v1036_v10  ;;  %9286 = vmatprep.mubr.msk.f32.mxu0 %vm10326_vm0, %v10325_v0  ;;  %v2700_v10 = vld [vmem:[#allocation9 + $0x38] sm:$0xff] }
 0x4fb   : > { %9280 = vmatprep.subr.mxu0 %v10325_v0  ;;  %v2697_v14 = vld [vmem:[#allocation9 + $0x20] sm:$0xff] }
 0x4fc   : > { %v2211_v17 = vpop.f32.mrf.mxu1  ;;  %9281 = vmatpush3.msra.mxu0 %v1035_v13  ;;  %v2698_v13 = vld [vmem:[#allocation9 + $0x28] sm:$0xff] }
 0x4fd   : > { %9276 = vmatmul.mubr.msk.f32.vlgmr.msra.gmra.mxu1 %vm1708_vm1, %v2211_v17  ;;  %9282 = vmatprep.subr.mxu0 %v10325_v0  ;;  %v2694_v17 = vld [vmem:[#allocation9 + $0x8] sm:$0xff] }
 0x4fe   : > { %v9245_v20 = vpop.f32.mrf.mxu1  ;;  %9283 = vmatpush3.msra.mxu0 %v1034_v15  ;;  %9290 = vmatpush3.msra.mxu1 %v1040_v16  ;;  %v2696_v15 = vld [vmem:[#allocation9 + $0x18] sm:$0xff]  ;;  %v2695_v16 = vld [vmem:[#allocation9 + $0x10] sm:$0xff] }
 0x4ff   : > { %9284 = vmatprep.subr.mxu0 %v10325_v0  ;;  %9291 = vmatprep.subr.mxu1 %v10325_v0 }
 0x500   : > { %v2284_v22 = vpop.f32.mrf.mxu1  ;;  %9285 = vmatpush3.msra.mxu0 %v1033_v18  ;;  %9292 = vmatpush3.msra.mxu1 %v1039_v19  ;;  %v2693_v18 = vld [vmem:[#allocation9] sm:$0xff] }
 0x501   : > { %9287 = vmatmul.mubr.msk.f32.vlgmr.msra.gmra.mxu0 %vm1708_vm1, %v2284_v22  ;;  %9293 = vmatprep.subr.mxu1 %v10325_v0  ;;  %v8554_v19 = vld [vmem:[%s11927_s13] ss:$0 sm:$0xff] }
 0x502   : > { %v9250_v25 = vpop.f32.mrf.mxu1  ;;  %9294 = vmatpush3.msra.mxu1 %v1038_v21  ;;  %9297 = vmatprep.mubr.msk.f32.mxu1 %vm10326_vm0, %v10325_v0 }
 0x503   : > { %9295 = vmatprep.subr.mxu1 %v10325_v0  ;;  %9300 = vmatprep.subr.mxu0 %v10325_v0 }
 0x504   : > { %v2357_v26 = vpop.f32.mrf.mxu1  ;;  %9296 = vmatpush3.msra.mxu1 %v1037_v23  ;;  %9332 = vmatprep.mubr.msk.f32.mxu0 %vm10326_vm0, %v10325_v0 }
 0x505   : > { %9298 = vmatmul.mubr.msk.f32.vlgmr.msra.gmra.mxu1 %vm1708_vm1, %v2357_v26  ;;  %9335 = vmatprep.subr.mxu1 %v10325_v0 }
 0x506   : > { %v9255_v27 = vpop.f32.mrf.mxu1  ;;  %9367 = vmatprep.mubr.msk.f32.mxu1 %vm10326_vm0, %v10325_v0  ;;  %9336 = vmatpush3.msra.mxu1 %v2725_v44 }
 0x507   : > { %9337 = vmatprep.subr.mxu1 %v10325_v0  ;;  %9301 = vmatpush3.msra.mxu0 %v2708_v48 }
 0x508   : > { %9338 = vmatpush3.msra.mxu1 %v2724_v45  ;;  %9302 = vmatprep.subr.mxu0 %v10325_v0 }
 0x509   : > { %9339 = vmatprep.subr.mxu1 %v10325_v0  ;;  %9303 = vmatpush3.msra.mxu0 %v2707_v49 }
 0x50a   : > { %9340 = vmatpush3.msra.mxu1 %v2723_v46  ;;  %9304 = vmatprep.subr.mxu0 %v10325_v0 }
 0x50b   : > { %9341 = vmatprep.subr.mxu1 %v10325_v0  ;;  %9305 = vmatpush3.msra.mxu0 %v2706_v51 }
 0x50c   : > { %9342 = vmatpush3.msra.mxu1 %v2722_v47  ;;  %9306 = vmatprep.subr.mxu0 %v10325_v0 }
 0x50d   : > { %9343 = vmatprep.subr.mxu1 %v10325_v0  ;;  %9307 = vmatpush3.msra.mxu0 %v2705_v53 }
 0x50e   : > { %9344 = vmatpush3.msra.mxu1 %v2721_v50  ;;  %9308 = vmatprep.subr.mxu0 %v10325_v0 }
 0x50f   : > { %9345 = vmatprep.subr.mxu1 %v10325_v0  ;;  %9309 = vmatpush3.msra.mxu0 %v2704_v8 }
 0x510   : > { %9346 = vmatpush3.msra.mxu1 %v2720_v52  ;;  %9310 = vmatprep.subr.mxu0 %v10325_v0 }
 0x511   : > { %9347 = vmatprep.subr.mxu1 %v10325_v0  ;;  %9311 = vmatpush3.msra.mxu0 %v2703_v7 }
 0x512   : > { %9348 = vmatpush3.msra.mxu1 %v2719_v55  ;;  %9312 = vmatprep.subr.mxu0 %v10325_v0 }
 0x513   : > { %9349 = vmatprep.subr.mxu1 %v10325_v0  ;;  %9313 = vmatpush3.msra.mxu0 %v2702_v9 }
 0x514   : > { %9350 = vmatpush3.msra.mxu1 %v2718_v57  ;;  %9314 = vmatprep.subr.mxu0 %v10325_v0 }
 0x515   : > { %9351 = vmatprep.subr.mxu1 %v10325_v0 }
 0x516   : > { %9352 = vmatpush3.msra.mxu1 %v2717_v58 }
 0x517   : > { %9353 = vmatprep.subr.mxu1 %v10325_v0 }
 0x518   : > { %9354 = vmatpush3.msra.mxu1 %v2716_v59 }
 0x519   : > { %9355 = vmatprep.subr.mxu1 %v10325_v0 }
 0x51a   : > { %9356 = vmatpush3.msra.mxu1 %v2715_v60 }
 0x51b   : > { %9357 = vmatprep.subr.mxu1 %v10325_v0 }
 0x51c   : > { %9358 = vmatpush3.msra.mxu1 %v2714_v61 }
 0x51d   : > { %9359 = vmatprep.subr.mxu1 %v10325_v0 }
 0x51e   : > { %9360 = vmatpush3.msra.mxu1 %v2713_v54 }
 0x51f   : > { %9361 = vmatprep.subr.mxu1 %v10325_v0 }
 0x520   : > { %9362 = vmatpush3.msra.mxu1 %v2712_v62 }
 0x521   : > { %9363 = vmatprep.subr.mxu1 %v10325_v0 }
 0x522   : > { %9364 = vmatpush3.msra.mxu1 %v2711_v63 }
 0x523   : > { %9365 = vmatprep.subr.mxu1 %v10325_v0 }
 0x524   : > { %9366 = vmatpush3.msra.mxu1 %v2710_v2 }
 0x525   : > { %9368 = vmatmul.mubr.f32.vlgmr.msra.gmra.mxu1 %v10682_v33  ;;  %9405 = vmatprep.subr.mxu1 %v10325_v0 }
 0x526   : > { %9407 = vmatprep.mubr.msk.f32.mxu1 %vm10326_vm0, %v10325_v0 }
 0x5b9   : > { %v2430_v28 = vpop.f32.mrf.mxu0 }
 0x5bb   : > { %v9266_v29 = vpop.f32.mrf.mxu0 }
 0x5bd   : > { %v2503_v30 = vpop.f32.mrf.mxu1 }
 0x5be   : > { %v2653_v34 = vadd.f32 %v2503_v30, %v2430_v28  ;;  %v8551_v28 = vld [vmem:[%s11936_s22] ss:$0 sm:$0xff] }
 0x5bf   : > { %v9277_v31 = vpop.f32.mrf.mxu1  ;;  %v8552_v30 = vld [vmem:[%s11937_s23] ss:$0 sm:$0xff] }
 0x5c1   : > { %v2576_v32 = vpop.f32.mrf.mxu0 }
 0x5c2   : > { %v2654_v36 = vadd.f32 %v2653_v34, %v2576_v32 }
 0x5c3   : > { %v9288_v35 = vpop.f32.mrf.mxu0 }
 0x5c5   : > { %v2649_v38 = vpop.f32.mrf.mxu1 }
 0x5c6   : > { %v2655_v39 = vadd.f32 %v2654_v36, %v2649_v38 }
 0x5c7   : > { %v9299_v40 = vpop.f32.mrf.mxu1 }
 0x5c8   : > { %v2662_v41 = vadd.f32 %v8550_v37, %v2655_v39 }
 0x5ca   : > { %v2663_v42 = vmax.f32 %v2662_v41, 0.0 }
 0x5cc   : > { %v10907_v43 = vadd.f32 %v2663_v42, %v10682_v33  ;;  %v2701_v33 = vld [vmem:[#allocation9 + $0x40] sm:$0xff] }
 0x5cd   : > { %9315 = vmatpush3.msra.mxu0 %v2701_v33 }
 0x5ce   : > { %2667 = vadd.xlane.f32.xlu1 %v10907_v43  ;;  %9316 = vmatprep.subr.mxu0 %v10325_v0 }
 0x5cf   : > { %9317 = vmatpush3.msra.mxu0 %v2700_v10 }
 0x5d0   : > { %9318 = vmatprep.subr.mxu0 %v10325_v0 }
 0x5d1   : > { %9319 = vmatpush3.msra.mxu0 %v2699_v11  ;;  %v8553_v11 = vld [vmem:[%s11989_s29] ss:$0 sm:$0xff] }
 0x5d2   : > { %9320 = vmatprep.subr.mxu0 %v10325_v0 }
 0x5d3   : > { %9321 = vmatpush3.msra.mxu0 %v2698_v13 }
 0x5d4   : > { %9322 = vmatprep.subr.mxu0 %v10325_v0 }
 0x5d5   : > { %9323 = vmatpush3.msra.mxu0 %v2697_v14 }
 0x5d6   : > { %9324 = vmatprep.subr.mxu0 %v10325_v0 }
 0x5d7   : > { %9325 = vmatpush3.msra.mxu0 %v2696_v15 }
 0x5d8   : > { %9326 = vmatprep.subr.mxu0 %v10325_v0 }
 0x5d9   : > { %9327 = vmatpush3.msra.mxu0 %v2695_v16  ;;  %v2742_v16 = vld [vmem:[#allocation12 + $0x78] sm:$0xff] }
 0x5da   : > { %9328 = vmatprep.subr.mxu0 %v10325_v0 }
 0x5db   : > { %9329 = vmatpush3.msra.mxu0 %v2694_v17  ;;  %v2741_v17 = vld [vmem:[#allocation12 + $0x70] sm:$0xff] }
 0x5dc   : > { %9330 = vmatprep.subr.mxu0 %v10325_v0 }
 0x5dd   : > { %9331 = vmatpush3.msra.mxu0 %v2693_v18  ;;  %v2740_v18 = vld [vmem:[#allocation12 + $0x68] sm:$0xff] }
 0x5de   : > { %9370 = vmatprep.subr.mxu0 %v10325_v0 }
 0x5e5   : > { %v2909_v20 = vpop.f32.mrf.mxu1 }
 0x5e6   : > { %v2910_v21 = vadd.f32 %v8554_v19, %v2909_v20  ;;  %v2739_v19 = vld [vmem:[#allocation12 + $0x60] sm:$0xff]  ;;  %v2738_v20 = vld [vmem:[#allocation12 + $0x58] sm:$0xff] }
 0x5e7   : > { %v9369_v22 = vpop.f32.mrf.mxu1 }
 0x5e8   : > { %3139 = vrot.lane.b32.xlu1 %v2910_v21, %s11954_s6  ;;  %v2736_v22 = vld [vmem:[#allocation12 + $0x48] sm:$0xff] }
 0x5ec   : > { %3142 = vrot.lane.b32.xlu1 %v2910_v21, %s11950_s1 }
 0x657   : > { %v2668_v3 = vpop.xlane.xlu1 %2667 }
 0x658   : > { %v2670_v56 = vmul.f32 0.0078125, %v2668_v3 }
 0x65a   : > { %v2671_v6 = vsub.f32 %v10907_v43, %v2670_v56 }
 0x65b   : > { %v3140_v34 = vpop.permute.xlu1 %3139 }
 0x65c   : > { %v2672_v4 = vmul.f32 %v2671_v6, %v2671_v6  ;;  %v3145_v35 = vcombine.low %v2910_v21, %v3140_v34  ;;  %v3146_v36 = vcombine.high %v2910_v21, %v3140_v34  ;;  %v2727_v34 = vld [vmem:[#allocation12] sm:$0xff] }
 0x65e   : > { %2673 = vadd.xlane.f32.xlu0 %v2672_v4  ;;  %v3153_v39 = vrot.slane %v3145_v35, %v10738_v5  ;;  %v3160_v40 = vrot.slane %v3146_v36, %v10738_v5  ;;  %v10051_v35 = vld [vmem:[%s10677_s30] sm:$0xff]  ;;  %s11992_s30 = smov 32  }
 0x65f   : > { %v3143_v38 = vpop.permute.xlu1 %3142 }
 0x674   : > { %3136 = vrot.lane.b32.xlu0 %v2910_v21, %s11952_s2  ;;  %v2737_v21 = vld [vmem:[#allocation12 + $0x50] sm:$0xff] }
 0x6e7   : > { %v2674_v23 = vpop.xlane.xlu0 %2673 }
 0x6e8   : > { %v2675_v25 = vmul.f32 0.0078125, %v2674_v23  ;;  %v2735_v23 = vld [vmem:[#allocation12 + $0x40] sm:$0xff] }
 0x6ea   : > { %v2676_v26 = vadd.f32 1e-05, %v2675_v25  ;;  %v2734_v25 = vld [vmem:[#allocation12 + $0x38] sm:$0xff] }
 0x6eb   : > { %v3137_v37 = vpop.permute.xlu0 %3136 }
 0x6ec   : > { %9991 = vrsqrt.f32 %v2676_v26  ;;  %v3161_v41 = vcombine.low %v3137_v37, %v3143_v38  ;;  %v3162_v42 = vcombine.high %v3137_v37, %v3143_v38  ;;  %v2733_v26 = vld [vmem:[#allocation12 + $0x30] sm:$0xff] }
 0x6ee   : > { %v3169_v43 = vrot.slane %v3161_v41, %v10738_v5  ;;  %v3176_v44 = vrot.slane %v3162_v42, %v10738_v5 }
 0x6f0   : > { %v3177_v45 = vcombine.low %v3153_v39, %v3169_v43  ;;  %v3178_v46 = vcombine.high %v3153_v39, %v3169_v43  ;;  %v3193_v47 = vcombine.low %v3160_v40, %v3176_v44  ;;  %v3194_v48 = vcombine.high %v3160_v40, %v3176_v44 }
 0x6f2   : > { %v3185_v49 = vrot.slane %v3177_v45, %v10743_v12  ;;  %v3192_v50 = vrot.slane %v3178_v46, %v10743_v12  ;;  %v3201_v51 = vrot.slane %v3193_v47, %v10743_v12  ;;  %v3208_v52 = vrot.slane %v3194_v48, %v10743_v12 }
 0x6f4   : > { %v3213_v53 = vcombine.low %v3185_v49, %v3192_v50  ;;  %v8558_v55 = vcombine.high %v3185_v49, %v3192_v50  ;;  %v3229_v57 = vcombine.low %v3201_v51, %v3208_v52  ;;  %v8559_v58 = vcombine.high %v3201_v51, %v3208_v52 }
 0x6f6   : > { %v3220_v59 = vrot.slane %v3213_v53, %v10738_v5  ;;  %v3228_v60 = vrot.slane %v8558_v55, %v10738_v5  ;;  %v3236_v61 = vrot.slane %v3229_v57, %v10738_v5  ;;  %v3244_v54 = vrot.slane %v8559_v58, %v10738_v5 }
 0x6f8   : > { %v3245_v62 = vcombine.low %v3220_v59, %v3228_v60  ;;  %v3246_v63 = vcombine.high %v3220_v59, %v3228_v60  ;;  %v3261_v2 = vcombine.low %v3236_v61, %v3244_v54  ;;  %v3262_v3 = vcombine.high %v3236_v61, %v3244_v54 }
 0x6f9   : > { %v9992_v27 = vpop.eup %9991 }
 0x6fa   : > { %v2678_v29 = vmul.f32 %v9992_v27, %v2671_v6  ;;  %v10976_v56 = vrot.slane %v3245_v62, %v10743_v12  ;;  %v10979_v6 = vrot.slane %v3261_v2, %v10743_v12  ;;  %v10986_v8 = vrot.slane %v3246_v63, %v10743_v12  ;;  %v2732_v27 = vld [vmem:[#allocation12 + $0x28] sm:$0xff] }
 0x6fb   : > { %v10989_v7 = vrot.slane %v3262_v3, %v10743_v12 }
 0x6fc   : > { %v2685_v31 = vmul.f32 %v8551_v28, %v2678_v29  ;;  %v3277_v4 = vcombine.low %v10976_v56, %v10979_v6  ;;  %v3278_v9 = vcombine.high %v10976_v56, %v10979_v6  ;;  %v2731_v28 = vld [vmem:[#allocation12 + $0x20] sm:$0xff]  ;;  %v2730_v29 = vld [vmem:[#allocation12 + $0x18] sm:$0xff] }
 0x6fd   : > { %v3279_v33 = vcombine.low %v10986_v8, %v10989_v7  ;;  %v3280_v10 = vcombine.high %v10986_v8, %v10989_v7 }
 0x6fe   : > { %v10958_v32 = vadd.f32 %v8552_v30, %v2685_v31  ;;  %9406 = vmatpush3.xpose.msk.msra.mxu1 %vm1708_vm1, %v3277_v4  ;;  %v2729_v30 = vld [vmem:[#allocation12 + $0x10] sm:$0xff]  ;;  %v2728_v31 = vld [vmem:[#allocation12 + $0x8] sm:$0xff] }
 0x6ff   : > { %9410 = vmatprep.subr.mxu1 %v10325_v0 }
 0x700   : > { %9333 = vmatmul.mubr.f32.vlgmr.msra.gmra.mxu0 %v10958_v32 }
 0x701   : > { %9402 = vmatprep.mubr.msk.f32.mxu0 %vm10326_vm0, %v10325_v0  ;;  %9371 = vmatpush3.msra.mxu0 %v2742_v16 }
 0x702   : > { %9372 = vmatprep.subr.mxu0 %v10325_v0 }
 0x703   : > { %9373 = vmatpush3.msra.mxu0 %v2741_v17 }
 0x704   : > { %9374 = vmatprep.subr.mxu0 %v10325_v0 }
 0x705   : > { %9375 = vmatpush3.msra.mxu0 %v2740_v18 }
 0x706   : > { %9376 = vmatprep.subr.mxu0 %v10325_v0 }
 0x707   : > { %9377 = vmatpush3.msra.mxu0 %v2739_v19 }
 0x708   : > { %9378 = vmatprep.subr.mxu0 %v10325_v0 }
 0x709   : > { %9379 = vmatpush3.msra.mxu0 %v2738_v20 }
 0x70a   : > { %9380 = vmatprep.subr.mxu0 %v10325_v0 }
 0x70b   : > { %9381 = vmatpush3.msra.mxu0 %v2737_v21 }
 0x70c   : > { %9382 = vmatprep.subr.mxu0 %v10325_v0 }
 0x70d   : > { %9383 = vmatpush3.msra.mxu0 %v2736_v22 }
 0x70e   : > { %9384 = vmatprep.subr.mxu0 %v10325_v0 }
 0x70f   : > { %9385 = vmatpush3.msra.mxu0 %v2735_v23 }
 0x710   : > { %9386 = vmatprep.subr.mxu0 %v10325_v0 }
 0x711   : > { %9387 = vmatpush3.msra.mxu0 %v2734_v25 }
 0x712   : > { %9388 = vmatprep.subr.mxu0 %v10325_v0 }
 0x713   : > { %9389 = vmatpush3.msra.mxu0 %v2733_v26 }
 0x714   : > { %9390 = vmatprep.subr.mxu0 %v10325_v0 }
 0x715   : > { %9391 = vmatpush3.msra.mxu0 %v2732_v27 }
 0x716   : > { %9392 = vmatprep.subr.mxu0 %v10325_v0 }
 0x717   : > { %9393 = vmatpush3.msra.mxu0 %v2731_v28 }
 0x718   : > { %9394 = vmatprep.subr.mxu0 %v10325_v0 }
 0x719   : > { %9395 = vmatpush3.msra.mxu0 %v2730_v29 }
 0x71a   : > { %9396 = vmatprep.subr.mxu0 %v10325_v0 }
 0x71b   : > { %9397 = vmatpush3.msra.mxu0 %v2729_v30 }
 0x71c   : > { %9398 = vmatprep.subr.mxu0 %v10325_v0 }
 0x71d   : > { %9399 = vmatpush3.msra.mxu0 %v2728_v31 }
 0x71e   : > { %9400 = vmatprep.subr.mxu0 %v10325_v0 }
 0x71f   : > { %9401 = vmatpush3.msra.mxu0 %v2727_v34 }
 0x720   : > { %9403 = vmatmul.mubr.f32.vlgmr.msra.gmra.mxu0 %v10051_v35  ;;  %9445 = vmatprep.subr.mxu0 %v10325_v0  ;;  %v8555_v35 = vld [vmem:[%s11929_s15] ss:$0 sm:$0xff] }
 0x721   : > { %9453 = vmatprep.mubr.msk.f32.mxu0 %vm10326_vm0, %v10325_v0 }
 0x7c0   : > { %v2833_v13 = vpop.f32.mrf.mxu0 }
 0x7c1   : > { %v11000_v14 = vadd.f32 %v8553_v11, %v2833_v13 }
 0x7c2   : > { %v9334_v15 = vpop.f32.mrf.mxu0 }
 0x7c3   : > { %2993 = vrot.lane.b32.xlu1 %v11000_v14, %s11954_s6  ;;  %2990 = vrot.lane.b32.xlu0 %v11000_v14, %s11952_s2 }
 0x7c7   : > { %2996 = vrot.lane.b32.xlu0 %v11000_v14, %s11950_s1 }
 0x835   : > { %v2994_v36 = vpop.permute.xlu1 %2993  ;;  %v2991_v37 = vpop.permute.xlu0 %2990 }
 0x836   : > { %v2999_v38 = vcombine.low %v11000_v14, %v2994_v36  ;;  %v3000_v39 = vcombine.high %v11000_v14, %v2994_v36 }
 0x838   : > { %v3007_v43 = vrot.slane %v2999_v38, %v10738_v5  ;;  %v3014_v44 = vrot.slane %v3000_v39, %v10738_v5 }
 0x839   : > { %v2997_v40 = vpop.permute.xlu0 %2996 }
 0x83a   : > { %v3015_v41 = vcombine.low %v2991_v37, %v2997_v40  ;;  %v3016_v42 = vcombine.high %v2991_v37, %v2997_v40 }
 0x83c   : > { %v3023_v45 = vrot.slane %v3015_v41, %v10738_v5  ;;  %v3030_v46 = vrot.slane %v3016_v42, %v10738_v5 }
 0x83e   : > { %v3031_v47 = vcombine.low %v3007_v43, %v3023_v45  ;;  %v3032_v48 = vcombine.high %v3007_v43, %v3023_v45  ;;  %v3047_v49 = vcombine.low %v3014_v44, %v3030_v46  ;;  %v3048_v50 = vcombine.high %v3014_v44, %v3030_v46 }
 0x840   : > { %v3039_v51 = vrot.slane %v3031_v47, %v10743_v12  ;;  %v3046_v52 = vrot.slane %v3032_v48, %v10743_v12  ;;  %v3055_v53 = vrot.slane %v3047_v49, %v10743_v12  ;;  %v3062_v55 = vrot.slane %v3048_v50, %v10743_v12 }
 0x842   : > { %v3067_v57 = vcombine.low %v3039_v51, %v3046_v52  ;;  %v8556_v58 = vcombine.high %v3039_v51, %v3046_v52  ;;  %v3083_v59 = vcombine.low %v3055_v53, %v3062_v55  ;;  %v8557_v60 = vcombine.high %v3055_v53, %v3062_v55 }
 0x844   : > { %v3074_v61 = vrot.slane %v3067_v57, %v10738_v5  ;;  %v3082_v54 = vrot.slane %v8556_v58, %v10738_v5  ;;  %v3090_v62 = vrot.slane %v3083_v59, %v10738_v5  ;;  %v3098_v63 = vrot.slane %v8557_v60, %v10738_v5  ;;  %v2747_v59 = vld [vmem:[#allocation13 + $0x18] sm:$0xff]  ;;  %v2746_v60 = vld [vmem:[#allocation13 + $0x10] sm:$0xff] }
 0x845   : > { %9446 = vmatpush3.msra.mxu0 %v2747_v59  ;;  %v2749_v59 = vld [vmem:[#allocation13 + $0x28] sm:$0xff] }
 0x846   : > { %v3099_v2 = vcombine.low %v3074_v61, %v3082_v54  ;;  %v3115_v3 = vcombine.low %v3090_v62, %v3098_v63  ;;  %v3100_v13 = vcombine.high %v3074_v61, %v3082_v54  ;;  %v3116_v14 = vcombine.high %v3090_v62, %v3098_v63  ;;  %9447 = vmatprep.subr.mxu0 %v10325_v0  ;;  %v2745_v61 = vld [vmem:[#allocation13 + $0x8] sm:$0xff] }
 0x847   : > { %9448 = vmatpush3.msra.mxu0 %v2746_v60  ;;  %v2755_v60 = vld [vmem:[#allocation13 + $0x58] sm:$0xff] }
 0x848   : > { %v3107_v4 = vrot.slane %v3099_v2, %v10743_v12  ;;  %v3123_v11 = vrot.slane %v3115_v3, %v10743_v12  ;;  %v3114_v17 = vrot.slane %v3100_v13, %v10743_v12  ;;  %v3130_v18 = vrot.slane %v3116_v14, %v10743_v12  ;;  %9449 = vmatprep.subr.mxu0 %v10325_v0 }
 0x849   : > { %9450 = vmatpush3.msra.mxu0 %v2745_v61 }
 0x84a   : > { %v3131_v15 = vcombine.low %v3107_v4, %v3123_v11  ;;  %v3132_v16 = vcombine.high %v3107_v4, %v3123_v11  ;;  %v3133_v56 = vcombine.low %v3114_v17, %v3130_v18  ;;  %v3134_v6 = vcombine.high %v3114_v17, %v3130_v18  ;;  %9451 = vmatprep.subr.mxu0 %v10325_v0 }
 0x84c   : > { %9408 = vmatmul.mubr.msk.f32.vlgmr.msra.gmra.mxu1 %vm1708_vm1, %v3131_v15 }
 0x84d   : > { %9411 = vmatpush3.xpose.msk.msra.mxu1 %vm1708_vm1, %v3278_v9  ;;  %9412 = vmatprep.mubr.msk.f32.mxu1 %vm10326_vm0, %v10325_v0  ;;  %v2985_v9 = vpop.f32.mrf.mxu0 }
 0x84e   : > { %9415 = vmatprep.subr.mxu1 %v10325_v0  ;;  %v2986_v36 = vadd.f32 %v8555_v35, %v2985_v9 }
 0x850   : > { %9413 = vmatmul.mubr.msk.f32.vlgmr.msra.gmra.mxu1 %vm1708_vm1, %v3132_v16 }
 0x851   : > { %9416 = vmatpush3.xpose.msk.msra.mxu1 %vm1708_vm1, %v3279_v33  ;;  %9417 = vmatprep.mubr.msk.f32.mxu1 %vm10326_vm0, %v10325_v0  ;;  %v9404_v33 = vpop.f32.mrf.mxu0 }
 0x852   : > { %9420 = vmatprep.subr.mxu1 %v10325_v0 }
 0x854   : > { %9418 = vmatmul.mubr.msk.f32.vlgmr.msra.gmra.mxu1 %vm1708_vm1, %v3133_v56 }
 0x855   : > { %9421 = vmatpush3.xpose.msk.msra.mxu1 %vm1708_vm1, %v3280_v10  ;;  %9422 = vmatprep.mubr.msk.f32.mxu1 %vm10326_vm0, %v10325_v0 }
 0x856   : > { %9425 = vmatprep.subr.mxu1 %v10325_v0 }
 0x858   : > { %9423 = vmatmul.mubr.msk.f32.vlgmr.msra.gmra.mxu1 %vm1708_vm1, %v3134_v6 }
 0x859   : > { %9427 = vmatprep.mubr.msk.f32.mxu1 %vm10326_vm0, %v10325_v0 }
 0x90c   : > { %v3499_v19 = vpop.f32.mrf.mxu1 }
 0x90d   : > { %v3731_v20 = vmul.f32 0.17677669, %v3499_v19 }
 0x90e   : > { %v9409_v21 = vpop.f32.mrf.mxu1 }
 0x90f   : > { %v3735_v8 = vsel %vm2024_vm3, %v3731_v20, -inf }
 0x910   : > { %3736 = vmax.xlane.f32.xlu1 %v3735_v8  ;;  %v3575_v7 = vpop.f32.mrf.mxu1 }
 0x911   : > { %v3732_v10 = vmul.f32 0.17677669, %v3575_v7 }
 0x912   : > { %v9414_v22 = vpop.f32.mrf.mxu1 }
 0x913   : > { %v3738_v23 = vsel %vm2024_vm3, %v3732_v10, -inf }
 0x914   : > { %3739 = vmax.xlane.f32.xlu0 %v3738_v23  ;;  %v3651_v25 = vpop.f32.mrf.mxu1 }
 0x915   : > { %v3733_v26 = vmul.f32 0.17677669, %v3651_v25 }
 0x916   : > { %v9419_v27 = vpop.f32.mrf.mxu1 }
 0x917   : > { %v3741_v28 = vsel %vm2024_vm3, %v3733_v26, -inf }
 0x918   : > { %3742 = vmax.xlane.f32.xlu0 %v3741_v28  ;;  %v3727_v29 = vpop.f32.mrf.mxu1 }
 0x919   : > { %v3734_v30 = vmul.f32 0.17677669, %v3727_v29 }
 0x91a   : > { %v9424_v31 = vpop.f32.mrf.mxu1 }
 0x91b   : > { %v3744_v34 = vsel %vm2024_vm3, %v3734_v30, -inf }
 0x91c   : > { %3745 = vmax.xlane.f32.xlu1 %v3744_v34 }
 0x92d   : > { %3282 = vrot.lane.b32.xlu1 %v2986_v36, %s11952_s2 }
 0x999   : > { %v3737_v37 = vpop.xlane.xlu1 %3736 }
 0x99a   : > { %v3747_v38 = vsub.f32 %v3731_v20, %v3737_v37 }
 0x99c   : > { %v3751_v39 = vmul.f32 1.442695, %v3747_v38 }
 0x99d   : > { %v3740_v40 = vpop.xlane.xlu0 %3739 }
 0x99e   : > { %9993 = vpow2.f32 %v3751_v39  ;;  %v3748_v41 = vsub.f32 %v3732_v10, %v3740_v40 }
 0x9a0   : > { %v3753_v42 = vmul.f32 1.442695, %v3748_v41 }
 0x9a1   : > { %v3743_v43 = vpop.xlane.xlu0 %3742 }
 0x9a2   : > { %9995 = vpow2.f32 %v3753_v42  ;;  %v3749_v44 = vsub.f32 %v3733_v26, %v3743_v43 }
 0x9a4   : > { %v3755_v45 = vmul.f32 1.442695, %v3749_v44 }
 0x9a5   : > { %v3746_v52 = vpop.xlane.xlu1 %3745 }
 0x9a6   : > { %9997 = vpow2.f32 %v3755_v45  ;;  %v3750_v53 = vsub.f32 %v3734_v30, %v3746_v52 }
 0x9a8   : > { %v3757_v55 = vmul.f32 1.442695, %v3750_v53 }
 0x9a9   : > { %v3283_v54 = vpop.permute.xlu1 %3282 }
 0x9aa   : > { %9999 = vpow2.f32 %v3757_v55  ;;  %v2751_v55 = vld [vmem:[#allocation13 + $0x38] sm:$0xff] }
 0x9ab   : > { %v11080_v46 = vpop.eup %9993 }
 0x9ac   : > { %v3759_v47 = vsel %vm2024_vm3, %v11080_v46, 0.0 }
 0x9ad   : > { %3760 = vadd.xlane.f32.xlu0 %v3759_v47 }
 0x9af   : > { %v11084_v48 = vpop.eup %9995 }
 0x9b0   : > { %v3762_v49 = vsel %vm2024_vm3, %v11084_v48, 0.0 }
 0x9b1   : > { %3763 = vadd.xlane.f32.xlu1 %v3762_v49 }
 0x9b3   : > { %v11088_v50 = vpop.eup %9997 }
 0x9b4   : > { %v3765_v51 = vsel %vm2024_vm3, %v11088_v50, 0.0 }
 0x9b5   : > { %3766 = vadd.xlane.f32.xlu0 %v3765_v51 }
 0x9b7   : > { %v11094_v57 = vpop.eup %9999 }
 0x9b8   : > { %v3768_v58 = vsel %vm2024_vm3, %v11094_v57, 0.0 }
 0x9c2   : > { %3288 = vrot.lane.b32.xlu1 %v2986_v36, %s11950_s1 }
 0x9cb   : > { %3285 = vrot.lane.b32.xlu0 %v2986_v36, %s11954_s6 }
 0x9e6   : > { %3769 = vadd.xlane.f32.xlu1 %v3768_v58  ;;  %v2750_v58 = vld [vmem:[#allocation13 + $0x30] sm:$0xff] }
 0xa36   : > { %v3761_v62 = vpop.xlane.xlu0 %3760 }
 0xa37   : > { %10001 = vrcp.f32 %v3761_v62 }
 0xa3a   : > { %v3764_v63 = vpop.xlane.xlu1 %3763 }
 0xa3b   : > { %10003 = vrcp.f32 %v3764_v63  ;;  %v2753_v63 = vld [vmem:[#allocation13 + $0x48] sm:$0xff] }
 0xa3e   : > { %v3767_v2 = vpop.xlane.xlu0 %3766  ;;  %v3289_v3 = vpop.permute.xlu1 %3288 }
 0xa3f   : > { %v3307_v4 = vcombine.low %v3283_v54, %v3289_v3  ;;  %v3308_v11 = vcombine.high %v3283_v54, %v3289_v3  ;;  %10005 = vrcp.f32 %v3767_v2  ;;  %v2754_v54 = vld [vmem:[#allocation13 + $0x50] sm:$0xff]  ;;  %v2759_v2 = vld [vmem:[#allocation13 + $0x78] sm:$0xff] }
 0xa41   : > { %v3315_v16 = vrot.slane %v3307_v4, %v10738_v5  ;;  %v3322_v17 = vrot.slane %v3308_v11, %v10738_v5  ;;  %v2752_v4 = vld [vmem:[#allocation13 + $0x40] sm:$0xff]  ;;  %v2758_v11 = vld [vmem:[#allocation13 + $0x70] sm:$0xff] }
 0xa42   : > { %v3286_v13 = vpop.permute.xlu0 %3285 }
 0xa43   : > { %v3291_v14 = vcombine.low %v2986_v36, %v3286_v13  ;;  %v3292_v15 = vcombine.high %v2986_v36, %v3286_v13 }
 0xa44   : > { %v10002_v34 = vpop.eup %10001 }
 0xa45   : > { %v3299_v18 = vrot.slane %v3291_v14, %v10738_v5  ;;  %v3306_v56 = vrot.slane %v3292_v15, %v10738_v5  ;;  %v3775_v40 = vmul.f32 %v10002_v34, %v11080_v46  ;;  %v2757_v14 = vld [vmem:[#allocation13 + $0x68] sm:$0xff]  ;;  %v4430_v34 = vld [vmem:[%s11932_s18 + $0xe0] sm:$0xff] }
 0xa47   : > { %v3323_v6 = vcombine.low %v3299_v18, %v3315_v16  ;;  %v3324_v9 = vcombine.high %v3299_v18, %v3315_v16  ;;  %v3339_v33 = vcombine.low %v3306_v56, %v3322_v17  ;;  %v3340_v19 = vcombine.high %v3306_v56, %v3322_v17  ;;  %v2756_v16 = vld [vmem:[#allocation13 + $0x60] sm:$0xff] }
 0xa48   : > { %v10004_v41 = vpop.eup %10003 }
 0xa49   : > { %v3331_v20 = vrot.slane %v3323_v6, %v10743_v12  ;;  %v3338_v21 = vrot.slane %v3324_v9, %v10743_v12  ;;  %v3347_v8 = vrot.slane %v3339_v33, %v10743_v12  ;;  %v3354_v7 = vrot.slane %v3340_v19, %v10743_v12 }
 0xa4a   : > { %v3776_v45 = vmul.f32 %v10004_v41, %v11084_v48 }
 0xa4b   : > { %v3359_v10 = vcombine.low %v3331_v20, %v3338_v21  ;;  %v8560_v22 = vcombine.high %v3331_v20, %v3338_v21  ;;  %v3375_v23 = vcombine.low %v3347_v8, %v3354_v7  ;;  %v8561_v25 = vcombine.high %v3347_v8, %v3354_v7 }
 0xa4c   : > { %v10006_v46 = vpop.eup %10005 }
 0xa4d   : > { %v3366_v26 = vrot.slane %v3359_v10, %v10738_v5  ;;  %v3374_v27 = vrot.slane %v8560_v22, %v10738_v5  ;;  %v3382_v28 = vrot.slane %v3375_v23, %v10738_v5  ;;  %v3390_v29 = vrot.slane %v8561_v25, %v10738_v5  ;;  %v8578_v10 = vld [vmem:[%s11931_s17] ss:$0 sm:$0xff] }
 0xa4e   : > { %v3777_v49 = vmul.f32 %v10006_v46, %v11088_v50  ;;  %v2744_v50 = vld [vmem:[#allocation13] sm:$0xff]  ;;  %v4421_v46 = vld [vmem:[%s11932_s18 + $0x98] sm:$0xff] }
 0xa4f   : > { %v3391_v30 = vcombine.low %v3366_v26, %v3374_v27  ;;  %v3407_v31 = vcombine.low %v3382_v28, %v3390_v29  ;;  %v3392_v37 = vcombine.high %v3366_v26, %v3374_v27  ;;  %v3408_v38 = vcombine.high %v3382_v28, %v3390_v29  ;;  %9452 = vmatpush3.msra.mxu0 %v2744_v50  ;;  %v4433_v29 = vld [vmem:[%s11932_s18 + $0xf8] sm:$0xff] }
 0xa50   : > { %9467 = vmatprep.subr.mxu0 %v10325_v0  ;;  %v4413_v50 = vld [vmem:[%s11932_s18 + $0x58] sm:$0xff] }
 0xa51   : > { %v3399_v35 = vrot.slane %v3391_v30, %v10743_v12  ;;  %v3415_v36 = vrot.slane %v3407_v31, %v10743_v12  ;;  %v3406_v43 = vrot.slane %v3392_v37, %v10743_v12  ;;  %v3422_v44 = vrot.slane %v3408_v38, %v10743_v12  ;;  %v4432_v30 = vld [vmem:[%s11932_s18 + $0xf0] sm:$0xff]  ;;  %v4431_v31 = vld [vmem:[%s11932_s18 + $0xe8] sm:$0xff]  ;;  %v4426_v37 = vld [vmem:[%s11932_s18 + $0xc0] sm:$0xff] }
 0xa53   : > { %v3423_v39 = vcombine.low %v3399_v35, %v3415_v36  ;;  %v3424_v42 = vcombine.high %v3399_v35, %v3415_v36  ;;  %v3425_v47 = vcombine.low %v3406_v43, %v3422_v44  ;;  %v3426_v51 = vcombine.high %v3406_v43, %v3422_v44  ;;  %v4428_v35 = vld [vmem:[%s11932_s18 + $0xd0] sm:$0xff]  ;;  %v4427_v36 = vld [vmem:[%s11932_s18 + $0xc8] sm:$0xff] }
 0xa54   : > { %v4424_v43 = vld [vmem:[%s11932_s18 + $0xb0] sm:$0xff]  ;;  %v4423_v44 = vld [vmem:[%s11932_s18 + $0xa8] sm:$0xff] }
 0xa55   : > { %9426 = vmatpush3.msra.mxu1 %v3423_v39 }
 0xa56   : > { %9428 = vmatmul.mubr.msk.f32.vlgmr.msra.gmra.mxu1 %vm2024_vm3, %v3775_v40  ;;  %9430 = vmatprep.subr.mxu1 %v10325_v0 }
 0xa57   : > { %9431 = vmatpush3.msra.mxu1 %v3424_v42  ;;  %9432 = vmatprep.mubr.msk.f32.mxu1 %vm10326_vm0, %v10325_v0  ;;  %v4425_v42 = vld [vmem:[%s11932_s18 + $0xb8] sm:$0xff] }
 0xa58   : > { %9435 = vmatprep.subr.mxu1 %v10325_v0 }
 0xa5a   : > { %9433 = vmatmul.mubr.msk.f32.vlgmr.msra.gmra.mxu1 %vm2024_vm3, %v3776_v45  ;;  %v4422_v45 = vld [vmem:[%s11932_s18 + $0xa0] sm:$0xff] }
 0xa5b   : > { %9436 = vmatpush3.msra.mxu1 %v3425_v47  ;;  %9437 = vmatprep.mubr.msk.f32.mxu1 %vm10326_vm0, %v10325_v0  ;;  %v4420_v47 = vld [vmem:[%s11932_s18 + $0x90] sm:$0xff] }
 0xa5c   : > { %9440 = vmatprep.subr.mxu1 %v10325_v0 }
 0xa5e   : > { %9438 = vmatmul.mubr.msk.f32.vlgmr.msra.gmra.mxu1 %vm2024_vm3, %v3777_v49  ;;  %v4419_v49 = vld [vmem:[%s11932_s18 + $0x88] sm:$0xff] }
 0xa5f   : > { %9441 = vmatpush3.msra.mxu1 %v3426_v51  ;;  %9442 = vmatprep.mubr.msk.f32.mxu1 %vm10326_vm0, %v10325_v0  ;;  %v4418_v51 = vld [vmem:[%s11932_s18 + $0x80] sm:$0xff] }
 0xa60   : > { %9456 = vmatprep.subr.mxu1 %v10325_v0 }
 0xa6f   : > { %v3770_v48 = vpop.xlane.xlu1 %3769 }
 0xa70   : > { %10007 = vrcp.f32 %v3770_v48  ;;  %v4417_v48 = vld [vmem:[%s11932_s18 + $0x78] sm:$0xff] }
 0xa7d   : > { %v10008_v52 = vpop.eup %10007 }
 0xa7e   : > { %v3778_v53 = vmul.f32 %v10008_v52, %v11094_v57  ;;  %v2748_v57 = vld [vmem:[#allocation13 + $0x20] sm:$0xff]  ;;  %v4416_v52 = vld [vmem:[%s11932_s18 + $0x70] sm:$0xff] }
 0xa80   : > { %9443 = vmatmul.mubr.msk.f32.vlgmr.msra.gmra.mxu1 %vm2024_vm3, %v3778_v53  ;;  %v4415_v53 = vld [vmem:[%s11932_s18 + $0x68] sm:$0xff] }
 0xa81   : > { %9457 = vmatpush3.msra.mxu1 %v2751_v55  ;;  %9464 = vmatprep.mubr.msk.f32.mxu1 %vm10326_vm0, %v10325_v0  ;;  %v4414_v55 = vld [vmem:[%s11932_s18 + $0x60] sm:$0xff] }
 0xa82   : > { %9458 = vmatprep.subr.mxu1 %v10325_v0 }
 0xa83   : > { %9459 = vmatpush3.msra.mxu1 %v2750_v58  ;;  %v4412_v58 = vld [vmem:[%s11932_s18 + $0x50] sm:$0xff] }
 0xa84   : > { %9460 = vmatprep.subr.mxu1 %v10325_v0 }
 0xa85   : > { %9461 = vmatpush3.msra.mxu1 %v2749_v59  ;;  %v4411_v59 = vld [vmem:[%s11932_s18 + $0x48] sm:$0xff] }
 0xa86   : > { %9462 = vmatprep.subr.mxu1 %v10325_v0 }
 0xa87   : > { %9463 = vmatpush3.msra.mxu1 %v2748_v57  ;;  %v4410_v57 = vld [vmem:[%s11932_s18 + $0x40] sm:$0xff] }
 0xa88   : > { %9478 = vmatprep.subr.mxu1 %v10325_v0 }
 0xb16   : > { %v3848_v61 = vpop.f32.mrf.mxu1 }
 0xb17   : > { %9454 = vmatmul.mubr.msk.f32.vlgmr.msra.gmra.mxu0 %vm1708_vm1, %v3848_v61  ;;  %v4408_v61 = vld [vmem:[%s11932_s18 + $0x30] sm:$0xff] }
 0xb18   : > { %v9429_v62 = vpop.f32.mrf.mxu1  ;;  %9468 = vmatpush3.msra.mxu0 %v2755_v60  ;;  %9475 = vmatprep.mubr.msk.f32.mxu0 %vm10326_vm0, %v10325_v0  ;;  %v4409_v60 = vld [vmem:[%s11932_s18 + $0x38] sm:$0xff] }
 0xb19   : > { %9469 = vmatprep.subr.mxu0 %v10325_v0  ;;  %v4406_v62 = vld [vmem:[%s11932_s18 + $0x20] sm:$0xff] }
 0xb1a   : > { %v3921_v3 = vpop.f32.mrf.mxu1  ;;  %9470 = vmatpush3.msra.mxu0 %v2754_v54  ;;  %v4407_v54 = vld [vmem:[%s11932_s18 + $0x28] sm:$0xff] }
 0xb1b   : > { %9465 = vmatmul.mubr.msk.f32.vlgmr.msra.gmra.mxu1 %vm1708_vm1, %v3921_v3  ;;  %9471 = vmatprep.subr.mxu0 %v10325_v0  ;;  %v4403_v3 = vld [vmem:[%s11932_s18 + $0x8] sm:$0xff] }
 0xb1c   : > { %v9434_v13 = vpop.f32.mrf.mxu1  ;;  %9472 = vmatpush3.msra.mxu0 %v2753_v63  ;;  %9479 = vmatpush3.msra.mxu1 %v2759_v2  ;;  %v4405_v63 = vld [vmem:[%s11932_s18 + $0x18] sm:$0xff]  ;;  %v4404_v2 = vld [vmem:[%s11932_s18 + $0x10] sm:$0xff] }
 0xb1d   : > { %9473 = vmatprep.subr.mxu0 %v10325_v0  ;;  %9480 = vmatprep.subr.mxu1 %v10325_v0  ;;  %v4534_v13 = vld [vmem:[#allocation15 + $0x78] sm:$0xff] }
 0xb1e   : > { %v3994_v15 = vpop.f32.mrf.mxu1  ;;  %9474 = vmatpush3.msra.mxu0 %v2752_v4  ;;  %9481 = vmatpush3.msra.mxu1 %v2758_v11  ;;  %v4402_v4 = vld [vmem:[%s11932_s18] sm:$0xff]  ;;  %v4550_v11 = vld [vmem:[#allocation15 + $0xf8] sm:$0xff] }
 0xb1f   : > { %9476 = vmatmul.mubr.msk.f32.vlgmr.msra.gmra.mxu0 %vm1708_vm1, %v3994_v15  ;;  %9482 = vmatprep.subr.mxu1 %v10325_v0  ;;  %v4533_v15 = vld [vmem:[#allocation15 + $0x70] sm:$0xff] }
 0xb20   : > { %v9439_v17 = vpop.f32.mrf.mxu1  ;;  %9483 = vmatpush3.msra.mxu1 %v2757_v14  ;;  %9486 = vmatprep.mubr.msk.f32.mxu1 %vm10326_vm0, %v10325_v0  ;;  %v4549_v14 = vld [vmem:[#allocation15 + $0xf0] sm:$0xff] }
 0xb21   : > { %9484 = vmatprep.subr.mxu1 %v10325_v0  ;;  %4510 = vmatprep.mubr.f32.mxu0 %v10325_v0  ;;  %v4532_v17 = vld [vmem:[#allocation15 + $0x68] sm:$0xff] }
 0xb22   : > { %9485 = vmatpush3.msra.mxu1 %v2756_v16  ;;  %4446 = vmatprep.subr.mxu0 %v4433_v29  ;;  %v4548_v16 = vld [vmem:[#allocation15 + $0xe8] sm:$0xff]  ;;  %v4523_v29 = vld [vmem:[#allocation15 + $0x20] sm:$0xff] }
 0xb23   : > { %4447 = vmatpush1.msra.mxu0 %v4432_v30  ;;  %8867 = vmatprep.subr.mxu1 %v4550_v11  ;;  %v4691_v11 = vld [vmem:[#allocation4 + $0xf8] sm:$0xff] }
 0xb24   : > { %4448 = vmatprep.subr.mxu0 %v4431_v31 }
 0xb25   : > { %4449 = vmatpush1.msra.mxu0 %v4430_v34 }
 0xb40   : > { %v4067_v18 = vpop.f32.mrf.mxu1 }
 0xb41   : > { %9487 = vmatmul.mubr.msk.f32.vlgmr.msra.gmra.mxu1 %vm1708_vm1, %v4067_v18  ;;  %v4547_v18 = vld [vmem:[#allocation15 + $0xe0] sm:$0xff] }
 0xb42   : > { %v9444_v56 = vpop.f32.mrf.mxu1  ;;  %8868 = vmatpush3.msra.mxu1 %v4534_v13  ;;  %v4671_v13 = vld [vmem:[#allocation2 + $0xf0] sm:$0xff] }
 0xb43   : > { %8869 = vmatprep.subr.mxu1 %v4549_v14  ;;  %v4531_v56 = vld [vmem:[#allocation15 + $0x60] sm:$0xff]  ;;  %v4690_v14 = vld [vmem:[#allocation4 + $0xf0] sm:$0xff] }
 0xb44   : > { %8870 = vmatpush3.msra.mxu1 %v4533_v15  ;;  %v4670_v15 = vld [vmem:[#allocation2 + $0xe8] sm:$0xff] }
 0xb45   : > { %8871 = vmatprep.subr.mxu1 %v4548_v16  ;;  %v4689_v16 = vld [vmem:[#allocation4 + $0xe8] sm:$0xff] }
 0xb46   : > { %8872 = vmatpush3.msra.mxu1 %v4532_v17  ;;  %v4669_v17 = vld [vmem:[#allocation2 + $0xe0] sm:$0xff] }
 0xb47   : > { %8873 = vmatprep.subr.mxu1 %v4547_v18  ;;  %v4688_v18 = vld [vmem:[#allocation4 + $0xe0] sm:$0xff] }
 0xb48   : > { %8874 = vmatpush3.msra.mxu1 %v4531_v56 }
 0xbd7   : > { %v4140_v6 = vpop.f32.mrf.mxu0 }
 0xbd9   : > { %v9455_v9 = vpop.f32.mrf.mxu0 }
 0xbda   : > { %v4530_v9 = vld [vmem:[#allocation15 + $0x58] sm:$0xff] }
 0xbdb   : > { %v4213_v33 = vpop.f32.mrf.mxu1 }
 0xbdc   : > { %v4363_v8 = vadd.f32 %v4213_v33, %v4140_v6  ;;  %v4546_v6 = vld [vmem:[#allocation15 + $0xd8] sm:$0xff]  ;;  %v4545_v33 = vld [vmem:[#allocation15 + $0xd0] sm:$0xff] }
 0xbdd   : > { %v9466_v19 = vpop.f32.mrf.mxu1  ;;  %8875 = vmatprep.subr.mxu1 %v4546_v6 }
 0xbde   : > { %v4529_v19 = vld [vmem:[#allocation15 + $0x50] sm:$0xff]  ;;  %8876 = vmatpush3.msra.mxu1 %v4530_v9 }
 0xbdf   : > { %v4286_v20 = vpop.f32.mrf.mxu0  ;;  %8877 = vmatprep.subr.mxu1 %v4545_v33 }
 0xbe0   : > { %v4364_v7 = vadd.f32 %v4363_v8, %v4286_v20  ;;  %v4544_v20 = vld [vmem:[#allocation15 + $0xc8] sm:$0xff]  ;;  %8878 = vmatpush3.msra.mxu1 %v4529_v19  ;;  %v4543_v8 = vld [vmem:[#allocation15 + $0xc0] sm:$0xff]  ;;  %v4668_v19 = vld [vmem:[#allocation2 + $0xd8] sm:$0xff] }
 0xbe1   : > { %v9477_v21 = vpop.f32.mrf.mxu0  ;;  %8879 = vmatprep.subr.mxu1 %v4544_v20  ;;  %v4687_v20 = vld [vmem:[#allocation4 + $0xd8] sm:$0xff] }
 0xbe2   : > { %v4528_v21 = vld [vmem:[#allocation15 + $0x48] sm:$0xff] }
 0xbe3   : > { %8880 = vmatpush3.msra.mxu1 %v4528_v21  ;;  %v4667_v21 = vld [vmem:[#allocation2 + $0xd0] sm:$0xff] }
 0xbe4   : > { %8881 = vmatprep.subr.mxu1 %v4543_v8  ;;  %v4686_v8 = vld [vmem:[#allocation4 + $0xd0] sm:$0xff] }
 0xc01   : > { %v4359_v22 = vpop.f32.mrf.mxu1 }
 0xc02   : > { %v4365_v23 = vadd.f32 %v4364_v7, %v4359_v22  ;;  %v4527_v7 = vld [vmem:[#allocation15 + $0x40] sm:$0xff]  ;;  %v4526_v22 = vld [vmem:[#allocation15 + $0x38] sm:$0xff] }
 0xc03   : > { %v9488_v25 = vpop.f32.mrf.mxu1  ;;  %8882 = vmatpush3.msra.mxu1 %v4527_v7  ;;  %v4666_v7 = vld [vmem:[#allocation2 + $0xc8] sm:$0xff] }
 0xc04   : > { %v4372_v26 = vadd.f32 %v8578_v10, %v4365_v23  ;;  %v4542_v10 = vld [vmem:[#allocation15 + $0xb8] sm:$0xff]  ;;  %v4541_v23 = vld [vmem:[#allocation15 + $0xb0] sm:$0xff] }
 0xc05   : > { %8883 = vmatprep.subr.mxu1 %v4542_v10  ;;  %v4525_v25 = vld [vmem:[#allocation15 + $0x30] sm:$0xff]  ;;  %v4685_v10 = vld [vmem:[#allocation4 + $0xc8] sm:$0xff] }
 0xc06   : > { %v4373_v27 = vmax.f32 %v4372_v26, 0.0  ;;  %8884 = vmatpush3.msra.mxu1 %v4526_v22  ;;  %v4540_v26 = vld [vmem:[#allocation15 + $0xa8] sm:$0xff]  ;;  %v4665_v22 = vld [vmem:[#allocation2 + $0xc0] sm:$0xff] }
 0xc07   : > { %8885 = vmatprep.subr.mxu1 %v4541_v23  ;;  %v4684_v23 = vld [vmem:[#allocation4 + $0xc0] sm:$0xff] }
 0xc08   : > { %v4376_v28 = vadd.f32 %v4373_v27, %v10958_v32  ;;  %v4429_v32 = vld [vmem:[%s11932_s18 + $0xd8] sm:$0xff]  ;;  %v4524_v27 = vld [vmem:[#allocation15 + $0x28] sm:$0xff]  ;;  %8886 = vmatpush3.msra.mxu1 %v4525_v25 }
 0xc09   : > { %4450 = vmatprep.subr.mxu0 %v4429_v32  ;;  %8887 = vmatprep.subr.mxu1 %v4540_v26  ;;  %v4664_v25 = vld [vmem:[#allocation2 + $0xb8] sm:$0xff] }
 0xc0a   : > { %4377 = vadd.xlane.f32.xlu0 %v4376_v28  ;;  %4451 = vmatpush1.msra.mxu0 %v4428_v35  ;;  %v8579_v35 = vld [vmem:[%s11938_s24] ss:$0 sm:$0xff]  ;;  %v4683_v26 = vld [vmem:[#allocation4 + $0xb8] sm:$0xff] }
 0xc0b   : > { %4452 = vmatprep.subr.mxu0 %v4427_v36  ;;  %8888 = vmatpush3.msra.mxu1 %v4524_v27  ;;  %v4663_v27 = vld [vmem:[#allocation2 + $0xb0] sm:$0xff] }
 0xc0c   : > { %4453 = vmatpush1.msra.mxu0 %v4426_v37  ;;  %v8580_v37 = vld [vmem:[%s11939_s25] ss:$0 sm:$0xff] }
 0xc0d   : > { %4454 = vmatprep.subr.mxu0 %v4425_v42  ;;  %v4522_v42 = vld [vmem:[#allocation15 + $0x18] sm:$0xff] }
 0xc0e   : > { %4455 = vmatpush1.msra.mxu0 %v4424_v43  ;;  %v4537_v43 = vld [vmem:[#allocation15 + $0x90] sm:$0xff] }
 0xc0f   : > { %4456 = vmatprep.subr.mxu0 %v4423_v44  ;;  %v4521_v44 = vld [vmem:[#allocation15 + $0x10] sm:$0xff] }
 0xc10   : > { %4457 = vmatpush1.msra.mxu0 %v4422_v45  ;;  %v4536_v45 = vld [vmem:[#allocation15 + $0x88] sm:$0xff] }
 0xc11   : > { %4458 = vmatprep.subr.mxu0 %v4421_v46  ;;  %v4535_v46 = vld [vmem:[#allocation15 + $0x80] sm:$0xff] }
 0xc12   : > { %4459 = vmatpush1.msra.mxu0 %v4420_v47  ;;  %v4519_v47 = vld [vmem:[#allocation15] sm:$0xff] }
 0xc13   : > { %4460 = vmatprep.subr.mxu0 %v4419_v49  ;;  %v4438_v49 = vsub.s32 0, %v10735_v1 }
 0xc14   : > { %4461 = vmatpush1.msra.mxu0 %v4418_v51  ;;  %v4434_v51 = vld [vmem:[%s11933_s19] sm:$0x3] }
 0xc15   : > { %4462 = vmatprep.subr.mxu0 %v4417_v48  ;;  %v4442_v48 = vsub.s32 1, %v10735_v1 }
 0xc16   : > { %4463 = vmatpush1.msra.mxu0 %v4416_v52  ;;  %v4439_v52 = vrot.slane %v4434_v51, %v4438_v49 }
 0xc17   : > { %4464 = vmatprep.subr.mxu0 %v4415_v53  ;;  %v4443_v53 = vrot.slane %v4434_v51, %v4442_v48  ;;  %v8583_v51 = vld [vmem:[%s11941_s27] ss:$0 sm:$0xff] }
 0xc18   : > { %4465 = vmatpush1.msra.mxu0 %v4414_v55 }
 0xc19   : > { %4466 = vmatprep.subr.mxu0 %v4413_v50 }
 0xc1a   : > { %4467 = vmatpush1.msra.mxu0 %v4412_v58 }
 0xc1b   : > { %4468 = vmatprep.subr.mxu0 %v4411_v59 }
 0xc1c   : > { %4469 = vmatpush1.msra.mxu0 %v4410_v57 }
 0xc1d   : > { %4470 = vmatprep.subr.mxu0 %v4409_v60 }
 0xc1e   : > { %4471 = vmatpush1.msra.mxu0 %v4408_v61 }
 0xc1f   : > { %4472 = vmatprep.subr.mxu0 %v4407_v54  ;;  %v8581_v54 = vld [vmem:[%s11935_s21] ss:$0 sm:$0xff] }
 0xc20   : > { %4473 = vmatpush1.msra.mxu0 %v4406_v62 }
 0xc21   : > { %4474 = vmatprep.subr.mxu0 %v4405_v63 }
 0xc22   : > { %4475 = vmatpush1.msra.mxu0 %v4404_v2 }
 0xc23   : > { %4476 = vmatprep.subr.mxu0 %v4403_v3 }
 0xc24   : > { %4477 = vmatpush1.msra.mxu0 %v4402_v4  ;;  %v4672_v4 = vld [vmem:[#allocation2 + $0xf8] sm:$0xff] }
 0xc25   : > { %9489 = vmatprep.subr.mxu0 %v10325_v0 }
 0xc93   : > { %v4378_v38 = vpop.xlane.xlu0 %4377 }
 0xc94   : > { %v4379_v39 = vmul.f32 0.0078125, %v4378_v38 }
 0xc96   : > { %v11185_v40 = vsub.f32 %v4376_v28, %v4379_v39  ;;  %v4539_v28 = vld [vmem:[#allocation15 + $0xa0] sm:$0xff] }
 0xc97   : > { %8889 = vmatprep.subr.mxu1 %v4539_v28  ;;  %v4682_v28 = vld [vmem:[#allocation4 + $0xb0] sm:$0xff] }
 0xc98   : > { %v4381_v41 = vmul.f32 %v11185_v40, %v11185_v40  ;;  %8890 = vmatpush3.msra.mxu1 %v4523_v29  ;;  %v4662_v29 = vld [vmem:[#allocation2 + $0xa8] sm:$0xff] }
 0xc9a   : > { %4382 = vadd.xlane.f32.xlu0 %v4381_v41  ;;  %v4538_v41 = vld [vmem:[#allocation15 + $0x98] sm:$0xff] }
 0xc9b   : > { %8891 = vmatprep.subr.mxu1 %v4538_v41  ;;  %v4657_v41 = vld [vmem:[#allocation2 + $0x80] sm:$0xff] }
 0xc9c   : > { %8892 = vmatpush3.msra.mxu1 %v4522_v42  ;;  %v4676_v42 = vld [vmem:[#allocation4 + $0x80] sm:$0xff] }
 0xc9d   : > { %8893 = vmatprep.subr.mxu1 %v4537_v43 }
 0xc9e   : > { %8894 = vmatpush3.msra.mxu1 %v4521_v44 }
 0xc9f   : > { %8895 = vmatprep.subr.mxu1 %v4536_v45 }
 0xd23   : > { %v4383_v30 = vpop.xlane.xlu0 %4382 }
 0xd24   : > { %v4384_v31 = vmul.f32 0.0078125, %v4383_v30  ;;  %v4681_v30 = vld [vmem:[#allocation4 + $0xa8] sm:$0xff] }
 0xd26   : > { %v4385_v34 = vadd.f32 1e-05, %v4384_v31  ;;  %v4661_v31 = vld [vmem:[#allocation2 + $0xa0] sm:$0xff] }
 0xd28   : > { %10009 = vrsqrt.f32 %v4385_v34  ;;  %v4680_v34 = vld [vmem:[#allocation4 + $0xa0] sm:$0xff] }
 0xd35   : > { %v10010_v32 = vpop.eup %10009 }
 0xd36   : > { %v4387_v36 = vmul.f32 %v10010_v32, %v11185_v40  ;;  %v4520_v40 = vld [vmem:[#allocation15 + $0x8] sm:$0xff]  ;;  %v4660_v32 = vld [vmem:[#allocation2 + $0x98] sm:$0xff] }
 0xd37   : > { %8896 = vmatpush3.msra.mxu1 %v4520_v40 }
 0xd38   : > { %v4394_v38 = vmul.f32 %v8579_v35, %v4387_v36  ;;  %8897 = vmatprep.subr.mxu1 %v4535_v46  ;;  %v4679_v35 = vld [vmem:[#allocation4 + $0x98] sm:$0xff]  ;;  %v4659_v36 = vld [vmem:[#allocation2 + $0x90] sm:$0xff]  ;;  %v8582_v46 = vld [vmem:[%s11940_s26] ss:$0 sm:$0xff] }
 0xd39   : > { %8898 = vmatpush3.msra.mxu1 %v4519_v47 }
 0xd3a   : > { %v4401_v39 = vadd.f32 %v8580_v37, %v4394_v38  ;;  %9524 = vmatprep.subr.mxu1 %v10325_v0  ;;  %v4678_v37 = vld [vmem:[#allocation4 + $0x90] sm:$0xff]  ;;  %v4658_v38 = vld [vmem:[#allocation2 + $0x88] sm:$0xff] }
 0xd3c   : > { %4511 = vmatmul.mubr.f32.vlgmr.msra.gmra.mxu0 %v4401_v39 }
 0xd3d   : > { %9521 = vmatprep.mubr.msk.f32.mxu0 %vm10326_vm0, %v10325_v0  ;;  %9490 = vmatpush3.msra.mxu0 %v4672_v4  ;;  %v4698_v4 = vld [vmem:[#allocation6 + $0x98] sm:$0xff] }
 0xd3e   : > { %9491 = vmatprep.subr.mxu0 %v10325_v0 }
 0xd3f   : > { %9492 = vmatpush3.msra.mxu0 %v4671_v13  ;;  %v4696_v13 = vld [vmem:[#allocation6 + $0x88] sm:$0xff] }
 0xd40   : > { %9493 = vmatprep.subr.mxu0 %v10325_v0 }
 0xd41   : > { %9494 = vmatpush3.msra.mxu0 %v4670_v15  ;;  %v8589_v15 = vld [vmem:[%s11983_s16 + $0x1] ss:$0 sm:$0xff] }
 0xd42   : > { %9495 = vmatprep.subr.mxu0 %v10325_v0 }
 0xd43   : > { %9496 = vmatpush3.msra.mxu0 %v4669_v17 }
 0xd44   : > { %9497 = vmatprep.subr.mxu0 %v10325_v0 }
 0xd45   : > { %9498 = vmatpush3.msra.mxu0 %v4668_v19 }
 0xd46   : > { %9499 = vmatprep.subr.mxu0 %v10325_v0 }
 0xd47   : > { %9500 = vmatpush3.msra.mxu0 %v4667_v21 }
 0xd48   : > { %9501 = vmatprep.subr.mxu0 %v10325_v0 }
 0xd49   : > { %9502 = vmatpush3.msra.mxu0 %v4666_v7 }
 0xd4a   : > { %9503 = vmatprep.subr.mxu0 %v10325_v0 }
 0xd4b   : > { %9504 = vmatpush3.msra.mxu0 %v4665_v22 }
 0xd4c   : > { %9505 = vmatprep.subr.mxu0 %v10325_v0 }
 0xd4d   : > { %9506 = vmatpush3.msra.mxu0 %v4664_v25 }
 0xd4e   : > { %9507 = vmatprep.subr.mxu0 %v10325_v0 }
 0xd4f   : > { %9508 = vmatpush3.msra.mxu0 %v4663_v27 }
 0xd50   : > { %9509 = vmatprep.subr.mxu0 %v10325_v0 }
 0xd51   : > { %9510 = vmatpush3.msra.mxu0 %v4662_v29 }
 0xd52   : > { %9511 = vmatprep.subr.mxu0 %v10325_v0 }
 0xd53   : > { %9512 = vmatpush3.msra.mxu0 %v4661_v31 }
 0xd54   : > { %9513 = vmatprep.subr.mxu0 %v10325_v0 }
 0xd55   : > { %9514 = vmatpush3.msra.mxu0 %v4660_v32 }
 0xd56   : > { %9515 = vmatprep.subr.mxu0 %v10325_v0 }
 0xd57   : > { %9516 = vmatpush3.msra.mxu0 %v4659_v36 }
 0xd58   : > { %9517 = vmatprep.subr.mxu0 %v10325_v0 }
 0xd59   : > { %9518 = vmatpush3.msra.mxu0 %v4658_v38 }
 0xd5a   : > { %9519 = vmatprep.subr.mxu0 %v10325_v0 }
 0xd5b   : > { %9520 = vmatpush3.msra.mxu0 %v4657_v41 }
 0xd5c   : > { %9559 = vmatprep.subr.mxu0 %v10325_v0 }
 0xdfc   : > { %v4512_v55 = vpop.f32.mrf.mxu0 }
 0xdfd   : > { %v4513_v50 = vadd.f32 %v4512_v55, %v4439_v52  ;;  %v4710_v55 = vld [vmem:[#allocation6 + $0xf8] sm:$0xff] }
 0xdfe   : > { %v4514_v58 = vpop.f32.mrf.mxu0 }
 0xdff   : > { %v4515_v59 = vadd.f32 %v4514_v58, %v4443_v53  ;;  %v4517_v60 = vmax.f32 %v4513_v50, 0.0  ;;  %v4709_v50 = vld [vmem:[#allocation6 + $0xf0] sm:$0xff]  ;;  %v4708_v58 = vld [vmem:[#allocation6 + $0xe8] sm:$0xff] }
 0xe01   : > { %v4518_v57 = vmax.f32 %v4515_v59, 0.0  ;;  %v4707_v59 = vld [vmem:[#allocation6 + $0xe0] sm:$0xff] }
 0xe03   : > { %4622 = vmatprep.mubr.f32.mxu1 %v4518_v57  ;;  %v4706_v57 = vld [vmem:[#allocation6 + $0xd8] sm:$0xff] }
 0xe04   : > { %4623 = vmatmul.mubr.f32.vlgmr.msra.gmra.mxu1 %v4517_v60  ;;  %v4705_v60 = vld [vmem:[#allocation6 + $0xd0] sm:$0xff] }
 0xe05   : > { %9556 = vmatprep.mubr.msk.f32.mxu1 %vm10326_vm0, %v10325_v0  ;;  %9525 = vmatpush3.msra.mxu1 %v4691_v11  ;;  %v4697_v11 = vld [vmem:[#allocation6 + $0x90] sm:$0xff] }
 0xe06   : > { %9526 = vmatprep.subr.mxu1 %v10325_v0 }
 0xe07   : > { %9527 = vmatpush3.msra.mxu1 %v4690_v14  ;;  %v4695_v14 = vld [vmem:[#allocation6 + $0x80] sm:$0xff] }
 0xe08   : > { %9528 = vmatprep.subr.mxu1 %v10325_v0 }
 0xe09   : > { %9529 = vmatpush3.msra.mxu1 %v4689_v16 }
 0xe0a   : > { %9530 = vmatprep.subr.mxu1 %v10325_v0 }
 0xe0b   : > { %9531 = vmatpush3.msra.mxu1 %v4688_v18 }
 0xe0c   : > { %9532 = vmatprep.subr.mxu1 %v10325_v0 }
 0xe0d   : > { %9533 = vmatpush3.msra.mxu1 %v4687_v20 }
 0xe0e   : > { %9534 = vmatprep.subr.mxu1 %v10325_v0 }
 0xe0f   : > { %9535 = vmatpush3.msra.mxu1 %v4686_v8 }
 0xe10   : > { %9536 = vmatprep.subr.mxu1 %v10325_v0 }
 0xe11   : > { %9537 = vmatpush3.msra.mxu1 %v4685_v10 }
 0xe12   : > { %9538 = vmatprep.subr.mxu1 %v10325_v0 }
 0xe13   : > { %9539 = vmatpush3.msra.mxu1 %v4684_v23 }
 0xe14   : > { %9540 = vmatprep.subr.mxu1 %v10325_v0 }
 0xe15   : > { %9541 = vmatpush3.msra.mxu1 %v4683_v26 }
 0xe16   : > { %9542 = vmatprep.subr.mxu1 %v10325_v0 }
 0xe17   : > { %9543 = vmatpush3.msra.mxu1 %v4682_v28 }
 0xe18   : > { %9544 = vmatprep.subr.mxu1 %v10325_v0 }
 0xe19   : > { %9545 = vmatpush3.msra.mxu1 %v4681_v30 }
 0xe1a   : > { %9546 = vmatprep.subr.mxu1 %v10325_v0 }
 0xe1b   : > { %9547 = vmatpush3.msra.mxu1 %v4680_v34 }
 0xe1c   : > { %9548 = vmatprep.subr.mxu1 %v10325_v0 }
 0xe1d   : > { %9549 = vmatpush3.msra.mxu1 %v4679_v35 }
 0xe1e   : > { %9550 = vmatprep.subr.mxu1 %v10325_v0 }
 0xe1f   : > { %9551 = vmatpush3.msra.mxu1 %v4678_v37 }
 0xe20   : > { %9552 = vmatprep.subr.mxu1 %v10325_v0 }
 0xec4   : > { %v8899_v61 = vpop.f32.mrf.mxu1 }
 0xec6   : > { %v8900_v62 = vpop.f32.mrf.mxu1 }
 0xec7   : > { %v8901_v63 = vadd.f32 %v8900_v62, %v8899_v61  ;;  %v4704_v61 = vld [vmem:[#allocation6 + $0xc8] sm:$0xff]  ;;  %v4702_v62 = vld [vmem:[#allocation6 + $0xb8] sm:$0xff] }
 0xec9   : > { %v4625_v2 = vadd.f32 %v8901_v63, %v8581_v54  ;;  %v4703_v54 = vld [vmem:[#allocation6 + $0xc0] sm:$0xff]  ;;  %v4701_v63 = vld [vmem:[#allocation6 + $0xb0] sm:$0xff] }
 0xecb   : > { %v4630_v3 = vadd.f32 %v4625_v2, %v4401_v39  ;;  %v4677_v39 = vld [vmem:[#allocation4 + $0x88] sm:$0xff] }
 0xecc   : > { %9553 = vmatpush3.msra.mxu1 %v4677_v39  ;;  %v4700_v2 = vld [vmem:[#allocation6 + $0xa8] sm:$0xff] }
 0xecd   : > { %4631 = vadd.xlane.f32.xlu1 %v4630_v3  ;;  %9554 = vmatprep.subr.mxu1 %v10325_v0 }
 0xece   : > { %9555 = vmatpush3.msra.mxu1 %v4676_v42 }
 0xecf   : > { %9594 = vmatprep.subr.mxu1 %v10325_v0 }
 0xf56   : > { %v4632_v56 = vpop.xlane.xlu1 %4631 }
 0xf57   : > { %v4633_v6 = vmul.f32 0.0078125, %v4632_v56  ;;  %v8588_v56 = vld [vmem:[%s11984_s7 + $0x1] ss:$0 sm:$0xff] }
 0xf59   : > { %v11294_v9 = vsub.f32 %v4630_v3, %v4633_v6  ;;  %v4699_v3 = vld [vmem:[#allocation6 + $0xa0] sm:$0xff] }
 0xf5b   : > { %v4635_v33 = vmul.f32 %v11294_v9, %v11294_v9 }
 0xf5d   : > { %4636 = vadd.xlane.f32.xlu0 %v4635_v33 }
 0xfe6   : > { %v4637_v43 = vpop.xlane.xlu0 %4636 }
 0xfe7   : > { %v4638_v44 = vmul.f32 0.0078125, %v4637_v43 }
 0xfe9   : > { %v4639_v45 = vadd.f32 1e-05, %v4638_v44 }
 0xfeb   : > { %10011 = vrsqrt.f32 %v4639_v45 }
 0xff8   : > { %v10012_v40 = vpop.eup %10011 }
 0xff9   : > { %v4641_v47 = vmul.f32 %v10012_v40, %v11294_v9 }
 0xffb   : > { %v4648_v52 = vmul.f32 %v8582_v46, %v4641_v47 }
 0xffd   : > { %v11329_v53 = vadd.f32 %v8583_v51, %v4648_v52 }
 0xfff   : > { %9522 = vmatmul.mubr.f32.vlgmr.msra.gmra.mxu0 %v11329_v53  ;;  %9557 = vmatmul.mubr.f32.vlgmr.msra.gmra.mxu1 %v11329_v53 }
0x1000   : > { %9560 = vmatpush3.msra.mxu0 %v4710_v55  ;;  %9591 = vmatprep.mubr.msk.f32.mxu0 %vm10326_vm0, %v10325_v0 }
0x1001   : > { %9561 = vmatprep.subr.mxu0 %v10325_v0  ;;  %9596 = vmatprep.mubr.msk.f32.mxu1 %vm10326_vm0, %v10325_v0 }
0x1002   : > { %9562 = vmatpush3.msra.mxu0 %v4709_v50 }
0x1003   : > { %9563 = vmatprep.subr.mxu0 %v10325_v0 }
0x1004   : > { %9564 = vmatpush3.msra.mxu0 %v4708_v58 }
0x1005   : > { %9565 = vmatprep.subr.mxu0 %v10325_v0 }
0x1006   : > { %9566 = vmatpush3.msra.mxu0 %v4707_v59 }
0x1007   : > { %9567 = vmatprep.subr.mxu0 %v10325_v0 }
0x1008   : > { %9568 = vmatpush3.msra.mxu0 %v4706_v57 }
0x1009   : > { %9569 = vmatprep.subr.mxu0 %v10325_v0 }
0x100a   : > { %9570 = vmatpush3.msra.mxu0 %v4705_v60 }
0x100b   : > { %9571 = vmatprep.subr.mxu0 %v10325_v0 }
0x100c   : > { %9572 = vmatpush3.msra.mxu0 %v4704_v61 }
0x100d   : > { %9573 = vmatprep.subr.mxu0 %v10325_v0 }
0x100e   : > { %9574 = vmatpush3.msra.mxu0 %v4703_v54 }
0x100f   : > { %9575 = vmatprep.subr.mxu0 %v10325_v0 }
0x1010   : > { %9576 = vmatpush3.msra.mxu0 %v4702_v62 }
0x1011   : > { %9577 = vmatprep.subr.mxu0 %v10325_v0 }
0x1012   : > { %9578 = vmatpush3.msra.mxu0 %v4701_v63 }
0x1013   : > { %9579 = vmatprep.subr.mxu0 %v10325_v0 }
0x1014   : > { %9580 = vmatpush3.msra.mxu0 %v4700_v2 }
0x1015   : > { %9581 = vmatprep.subr.mxu0 %v10325_v0 }
0x1016   : > { %9582 = vmatpush3.msra.mxu0 %v4699_v3 }
0x1017   : > { %9583 = vmatprep.subr.mxu0 %v10325_v0 }
0x1018   : > { %9584 = vmatpush3.msra.mxu0 %v4698_v4 }
0x1019   : > { %9585 = vmatprep.subr.mxu0 %v10325_v0 }
0x101a   : > { %9586 = vmatpush3.msra.mxu0 %v4697_v11 }
0x101b   : > { %9587 = vmatprep.subr.mxu0 %v10325_v0 }
0x101c   : > { %9588 = vmatpush3.msra.mxu0 %v4696_v13 }
0x101d   : > { %9589 = vmatprep.subr.mxu0 %v10325_v0 }
0x101e   : > { %9590 = vmatpush3.msra.mxu0 %v4695_v14 }
0x101f   : > { %9592 = vmatmul.mubr.f32.vlgmr.msra.gmra.mxu0 %v11329_v53  ;;  %9634 = vmatprep.subr.mxu0 %v10325_v0 }
0x1020   : > { %9642 = vmatprep.mubr.msk.f32.mxu0 %vm10326_vm0, %v10325_v0 }
0x10bf   : > { %v4804_v16 = vpop.f32.mrf.mxu0  ;;  %v4880_v17 = vpop.f32.mrf.mxu1 }
0x10c0   : > { %v4881_v18 = vadd.f32 %v8589_v15, %v4880_v17  ;;  %v4805_v33 = vadd.f32 %v8588_v56, %v4804_v16 }
0x10c1   : > { %v9523_v6 = vpop.f32.mrf.mxu0  ;;  %v9558_v9 = vpop.f32.mrf.mxu1 }
0x10c2   : > { %5110 = vrot.lane.b32.xlu0 %v4881_v18, %s11990_s4  ;;  %5107 = vrot.lane.b32.xlu1 %v4881_v18, %s11991_s3 }
0x10c6   : > { %5113 = vrot.lane.b32.xlu1 %v4881_v18, %s11992_s30  ;;  %4964 = vrot.lane.b32.xlu0 %v4805_v33, %s11990_s4 }
0x10ca   : > { %4961 = vrot.lane.b32.xlu1 %v4805_v33, %s11991_s3 }
0x10ce   : > { %4967 = vrot.lane.b32.xlu1 %v4805_v33, %s11992_s30 }
0x10df   : > { %v11368_v19 = vpop.f32.mrf.mxu0 }
0x10e1   : > { %v9593_v20 = vpop.f32.mrf.mxu0 }
0x1134   : > { %v5111_v21 = vpop.permute.xlu0 %5110  ;;  %v5108_v8 = vpop.permute.xlu1 %5107 }
0x1135   : > { %v5116_v7 = vcombine.low %v4881_v18, %v5111_v21  ;;  %v5117_v10 = vcombine.high %v4881_v18, %v5111_v21 }
0x1137   : > { %v5124_v26 = vrot.slane %v5116_v7, %v10738_v5  ;;  %v5131_v27 = vrot.slane %v5117_v10, %v10738_v5 }
0x1138   : > { %v5114_v22 = vpop.permute.xlu1 %5113  ;;  %v4965_v36 = vpop.permute.xlu0 %4964 }
0x1139   : > { %v5132_v23 = vcombine.low %v5108_v8, %v5114_v22  ;;  %v5133_v25 = vcombine.high %v5108_v8, %v5114_v22  ;;  %v4970_v42 = vcombine.low %v4805_v33, %v4965_v36  ;;  %v4971_v43 = vcombine.high %v4805_v33, %v4965_v36 }
0x113b   : > { %v5140_v28 = vrot.slane %v5132_v23, %v10738_v5  ;;  %v5147_v29 = vrot.slane %v5133_v25, %v10738_v5  ;;  %v4978_v57 = vrot.slane %v4970_v42, %v10738_v5  ;;  %v4985_v60 = vrot.slane %v4971_v43, %v10738_v5 }
0x113c   : > { %v4962_v30 = vpop.permute.xlu1 %4961 }
0x113d   : > { %v5148_v31 = vcombine.low %v5124_v26, %v5140_v28  ;;  %v5149_v34 = vcombine.high %v5124_v26, %v5140_v28  ;;  %v5164_v32 = vcombine.low %v5131_v27, %v5147_v29  ;;  %v5165_v35 = vcombine.high %v5131_v27, %v5147_v29 }
0x113f   : > { %v5156_v37 = vrot.slane %v5148_v31, %v10743_v12  ;;  %v5163_v38 = vrot.slane %v5149_v34, %v10743_v12  ;;  %v5172_v39 = vrot.slane %v5164_v32, %v10743_v12  ;;  %v5179_v41 = vrot.slane %v5165_v35, %v10743_v12 }
0x1140   : > { %v4968_v44 = vpop.permute.xlu1 %4967 }
0x1141   : > { %v5184_v45 = vcombine.low %v5156_v37, %v5163_v38  ;;  %v8593_v40 = vcombine.high %v5156_v37, %v5163_v38  ;;  %v5200_v46 = vcombine.low %v5172_v39, %v5179_v41  ;;  %v8594_v47 = vcombine.high %v5172_v39, %v5179_v41 }
0x1142   : > { %v4986_v51 = vcombine.low %v4962_v30, %v4968_v44  ;;  %v4987_v52 = vcombine.high %v4962_v30, %v4968_v44 }
0x1143   : > { %v5191_v55 = vrot.slane %v5184_v45, %v10738_v5  ;;  %v5199_v50 = vrot.slane %v8593_v40, %v10738_v5  ;;  %v5207_v58 = vrot.slane %v5200_v46, %v10738_v5  ;;  %v5215_v59 = vrot.slane %v8594_v47, %v10738_v5 }
0x1144   : > { %v4994_v61 = vrot.slane %v4986_v51, %v10738_v5  ;;  %v5001_v54 = vrot.slane %v4987_v52, %v10738_v5 }
0x1145   : > { %v5216_v62 = vcombine.low %v5191_v55, %v5199_v50  ;;  %v5232_v63 = vcombine.low %v5207_v58, %v5215_v59  ;;  %v5217_v25 = vcombine.high %v5191_v55, %v5199_v50  ;;  %v5233_v26 = vcombine.high %v5207_v58, %v5215_v59 }
0x1146   : > { %v5002_v2 = vcombine.low %v4978_v57, %v4994_v61  ;;  %v5003_v3 = vcombine.high %v4978_v57, %v4994_v61  ;;  %v5018_v4 = vcombine.low %v4985_v60, %v5001_v54  ;;  %v5019_v11 = vcombine.high %v4985_v60, %v5001_v54 }
0x1147   : > { %v5224_v13 = vrot.slane %v5216_v62, %v10743_v12  ;;  %v5240_v14 = vrot.slane %v5232_v63, %v10743_v12  ;;  %v5231_v32 = vrot.slane %v5217_v25, %v10743_v12  ;;  %v5247_v35 = vrot.slane %v5233_v26, %v10743_v12 }
0x1148   : > { %v5010_v15 = vrot.slane %v5002_v2, %v10743_v12  ;;  %v5017_v16 = vrot.slane %v5003_v3, %v10743_v12  ;;  %v5026_v17 = vrot.slane %v5018_v4, %v10743_v12  ;;  %v5033_v18 = vrot.slane %v5019_v11, %v10743_v12 }
0x1149   : > { %v5248_v56 = vcombine.low %v5224_v13, %v5240_v14  ;;  %v5249_v34 = vcombine.high %v5224_v13, %v5240_v14  ;;  %v5250_v39 = vcombine.low %v5231_v32, %v5247_v35  ;;  %v5251_v42 = vcombine.high %v5231_v32, %v5247_v35 }
0x114a   : > { %v5038_v6 = vcombine.low %v5010_v15, %v5017_v16  ;;  %v8591_v9 = vcombine.high %v5010_v15, %v5017_v16  ;;  %v5054_v33 = vcombine.low %v5026_v17, %v5033_v18  ;;  %v8592_v20 = vcombine.high %v5026_v17, %v5033_v18 }
0x114b   : > { %9595 = vmatpush3.xpose.msk.msra.mxu1 %vm1708_vm1, %v5248_v56 }
0x114c   : > { %v5045_v21 = vrot.slane %v5038_v6, %v10738_v5  ;;  %v5053_v8 = vrot.slane %v8591_v9, %v10738_v5  ;;  %v5061_v7 = vrot.slane %v5054_v33, %v10738_v5  ;;  %v5069_v10 = vrot.slane %v8592_v20, %v10738_v5  ;;  %9599 = vmatprep.subr.mxu1 %v10325_v0  ;;  %v8590_v9 = vld [vmem:[%s11987_s10 + $0x1] ss:$0 sm:$0xff] }
0x114d   : > { %v4957_v33 = vadd.f32 %v8590_v9, %v11368_v19 }
0x114e   : > { %v5070_v22 = vcombine.low %v5045_v21, %v5053_v8  ;;  %v5086_v23 = vcombine.low %v5061_v7, %v5069_v10  ;;  %v5071_v29 = vcombine.high %v5045_v21, %v5053_v8  ;;  %v5087_v30 = vcombine.high %v5061_v7, %v5069_v10 }
0x1150   : > { %v5078_v27 = vrot.slane %v5070_v22, %v10743_v12  ;;  %v5094_v28 = vrot.slane %v5086_v23, %v10743_v12  ;;  %v5085_v37 = vrot.slane %v5071_v29, %v10743_v12  ;;  %v5101_v38 = vrot.slane %v5087_v30, %v10743_v12  ;;  %v4715_v29 = vld [vmem:[#allocation7 + $0x88] sm:$0xff] }
0x1152   : > { %v5102_v31 = vcombine.low %v5078_v27, %v5094_v28  ;;  %v5103_v36 = vcombine.high %v5078_v27, %v5094_v28  ;;  %v5104_v41 = vcombine.low %v5085_v37, %v5101_v38  ;;  %v5105_v43 = vcombine.high %v5085_v37, %v5101_v38  ;;  %v4717_v27 = vld [vmem:[#allocation7 + $0x98] sm:$0xff]  ;;  %v4716_v28 = vld [vmem:[#allocation7 + $0x90] sm:$0xff] }
0x1153   : > { %9635 = vmatpush3.msra.mxu0 %v4717_v27  ;;  %v4720_v27 = vld [vmem:[#allocation7 + $0xb0] sm:$0xff] }
0x1154   : > { %9597 = vmatmul.mubr.msk.f32.vlgmr.msra.gmra.mxu1 %vm1708_vm1, %v5102_v31  ;;  %9636 = vmatprep.subr.mxu0 %v10325_v0 }
0x1155   : > { %9600 = vmatpush3.xpose.msk.msra.mxu1 %vm1708_vm1, %v5249_v34  ;;  %9601 = vmatprep.mubr.msk.f32.mxu1 %vm10326_vm0, %v10325_v0 }
0x1156   : > { %9604 = vmatprep.subr.mxu1 %v10325_v0  ;;  %9637 = vmatpush3.msra.mxu0 %v4716_v28  ;;  %v4719_v28 = vld [vmem:[#allocation7 + $0xa8] sm:$0xff] }
0x1157   : > { %9638 = vmatprep.subr.mxu0 %v10325_v0 }
0x1158   : > { %9602 = vmatmul.mubr.msk.f32.vlgmr.msra.gmra.mxu1 %vm1708_vm1, %v5103_v36  ;;  %9639 = vmatpush3.msra.mxu0 %v4715_v29  ;;  %v4725_v29 = vld [vmem:[#allocation7 + $0xd8] sm:$0xff] }
0x1159   : > { %9605 = vmatpush3.xpose.msk.msra.mxu1 %vm1708_vm1, %v5250_v39  ;;  %9606 = vmatprep.mubr.msk.f32.mxu1 %vm10326_vm0, %v10325_v0 }
0x115a   : > { %9609 = vmatprep.subr.mxu1 %v10325_v0  ;;  %9640 = vmatprep.subr.mxu0 %v10325_v0 }
0x115c   : > { %9607 = vmatmul.mubr.msk.f32.vlgmr.msra.gmra.mxu1 %vm1708_vm1, %v5104_v41 }
0x115d   : > { %9610 = vmatpush3.xpose.msk.msra.mxu1 %vm1708_vm1, %v5251_v42  ;;  %9611 = vmatprep.mubr.msk.f32.mxu1 %vm10326_vm0, %v10325_v0 }
0x115e   : > { %9614 = vmatprep.subr.mxu1 %v10325_v0 }
0x1160   : > { %9612 = vmatmul.mubr.msk.f32.vlgmr.msra.gmra.mxu1 %vm1708_vm1, %v5105_v43 }
0x1161   : > { %9616 = vmatprep.mubr.msk.f32.mxu1 %vm10326_vm0, %v10325_v0 }
0x1214   : > { %v5470_v44 = vpop.f32.mrf.mxu1 }
0x1215   : > { %v5702_v45 = vsel %vm2013_vm2, -inf, %v5470_v44 }
0x1216   : > { %v5706_v40 = vmul.f32 0.17677669, %v5702_v45  ;;  %v9598_v46 = vpop.f32.mrf.mxu1 }
0x1218   : > { %v5546_v47 = vpop.f32.mrf.mxu1  ;;  %v5710_v51 = vsel %vm2024_vm3, %v5706_v40, -inf }
0x1219   : > { %v5703_v52 = vsel %vm2013_vm2, -inf, %v5546_v47  ;;  %5711 = vmax.xlane.f32.xlu0 %v5710_v51 }
0x121a   : > { %v5707_v55 = vmul.f32 0.17677669, %v5703_v52  ;;  %v9603_v50 = vpop.f32.mrf.mxu1 }
0x121c   : > { %v5622_v58 = vpop.f32.mrf.mxu1  ;;  %v5713_v59 = vsel %vm2024_vm3, %v5707_v55, -inf }
0x121d   : > { %v5704_v57 = vsel %vm2013_vm2, -inf, %v5622_v58  ;;  %5714 = vmax.xlane.f32.xlu1 %v5713_v59 }
0x121e   : > { %v5708_v60 = vmul.f32 0.17677669, %v5704_v57  ;;  %v9608_v61 = vpop.f32.mrf.mxu1 }
0x1220   : > { %v5698_v54 = vpop.f32.mrf.mxu1  ;;  %v5716_v62 = vsel %vm2024_vm3, %v5708_v60, -inf }
0x1221   : > { %v5705_v63 = vsel %vm2013_vm2, -inf, %v5698_v54  ;;  %5717 = vmax.xlane.f32.xlu0 %v5716_v62 }
0x1222   : > { %v5709_v2 = vmul.f32 0.17677669, %v5705_v63  ;;  %v9613_v3 = vpop.f32.mrf.mxu1 }
0x1224   : > { %v5719_v4 = vsel %vm2024_vm3, %v5709_v2, -inf }
0x1225   : > { %5720 = vmax.xlane.f32.xlu0 %v5719_v4 }
0x12a2   : > { %v5712_v11 = vpop.xlane.xlu0 %5711 }
0x12a3   : > { %v5722_v13 = vsub.f32 %v5706_v40, %v5712_v11 }
0x12a5   : > { %v5726_v14 = vmul.f32 1.442695, %v5722_v13 }
0x12a6   : > { %v5715_v15 = vpop.xlane.xlu1 %5714 }
0x12a7   : > { %10013 = vpow2.f32 %v5726_v14  ;;  %v5723_v16 = vsub.f32 %v5707_v55, %v5715_v15 }
0x12a9   : > { %v5728_v17 = vmul.f32 1.442695, %v5723_v16 }
0x12aa   : > { %v5718_v20 = vpop.xlane.xlu0 %5717 }
0x12ab   : > { %10015 = vpow2.f32 %v5728_v17  ;;  %v5724_v21 = vsub.f32 %v5708_v60, %v5718_v20 }
0x12ad   : > { %v5730_v7 = vmul.f32 1.442695, %v5724_v21 }
0x12ae   : > { %v5721_v8 = vpop.xlane.xlu0 %5720 }
0x12af   : > { %v5725_v10 = vsub.f32 %v5709_v2, %v5721_v8  ;;  %10017 = vpow2.f32 %v5730_v7 }
0x12b1   : > { %v5732_v22 = vmul.f32 1.442695, %v5725_v10 }
0x12b3   : > { %10019 = vpow2.f32 %v5732_v22 }
0x12b4   : > { %v11434_v18 = vpop.eup %10013 }
0x12b5   : > { %v5734_v24 = vsel %vm2024_vm3, %v11434_v18, 0.0 }
0x12b6   : > { %5735 = vadd.xlane.f32.xlu1 %v5734_v24 }
0x12b8   : > { %v11438_v56 = vpop.eup %10015 }
0x12b9   : > { %v5737_v6 = vsel %vm2024_vm3, %v11438_v56, 0.0 }
0x12ba   : > { %5738 = vadd.xlane.f32.xlu0 %v5737_v6 }
0x12bc   : > { %v11448_v23 = vpop.eup %10017 }
0x12bd   : > { %v5740_v25 = vsel %vm2024_vm3, %v11448_v23, 0.0 }
0x12c0   : > { %v11452_v26 = vpop.eup %10019 }
0x12c1   : > { %v5743_v19 = vsel %vm2024_vm3, %v11452_v26, 0.0 }
0x12c7   : > { %5256 = vrot.lane.b32.xlu1 %v4957_v33, %s11990_s4 }
0x12d0   : > { %5253 = vrot.lane.b32.xlu0 %v4957_v33, %s11991_s3 }
0x12eb   : > { %5741 = vadd.xlane.f32.xlu1 %v5740_v25 }
0x12ef   : > { %5744 = vadd.xlane.f32.xlu0 %v5743_v19  ;;  %v4721_v19 = vld [vmem:[#allocation7 + $0xb8] sm:$0xff] }
0x12fc   : > { %5259 = vrot.lane.b32.xlu1 %v4957_v33, %s11992_s30 }
0x133f   : > { %v5736_v30 = vpop.xlane.xlu1 %5735 }
0x1340   : > { %10021 = vrcp.f32 %v5736_v30 }
0x1343   : > { %v5257_v31 = vpop.permute.xlu1 %5256  ;;  %v5739_v34 = vpop.xlane.xlu0 %5738 }
0x1344   : > { %v5262_v35 = vcombine.low %v4957_v33, %v5257_v31  ;;  %v5263_v36 = vcombine.high %v4957_v33, %v5257_v31  ;;  %10023 = vrcp.f32 %v5739_v34  ;;  %v4724_v31 = vld [vmem:[#allocation7 + $0xd0] sm:$0xff] }
0x1346   : > { %v5270_v42 = vrot.slane %v5262_v35, %v10738_v5  ;;  %v5277_v43 = vrot.slane %v5263_v36, %v10738_v5  ;;  %v4723_v35 = vld [vmem:[#allocation7 + $0xc8] sm:$0xff] }
0x1347   : > { %v5254_v37 = vpop.permute.xlu0 %5253 }
0x134d   : > { %v10022_v13 = vpop.eup %10021 }
0x134e   : > { %v5750_v6 = vmul.f32 %v10022_v13, %v11434_v18 }
0x1351   : > { %v10024_v9 = vpop.eup %10023 }
0x1352   : > { %v5751_v8 = vmul.f32 %v10024_v9, %v11438_v56 }
0x1374   : > { %v5742_v32 = vpop.xlane.xlu1 %5741 }
0x1375   : > { %10025 = vrcp.f32 %v5742_v32  ;;  %v4729_v32 = vld [vmem:[#allocation7 + $0xf8] sm:$0xff] }
0x1378   : > { %v5260_v38 = vpop.permute.xlu1 %5259  ;;  %v5745_v3 = vpop.xlane.xlu0 %5744 }
0x1379   : > { %v5278_v39 = vcombine.low %v5254_v37, %v5260_v38  ;;  %v5279_v41 = vcombine.high %v5254_v37, %v5260_v38  ;;  %10027 = vrcp.f32 %v5745_v3  ;;  %v4728_v37 = vld [vmem:[#allocation7 + $0xf0] sm:$0xff]  ;;  %v4722_v38 = vld [vmem:[#allocation7 + $0xc0] sm:$0xff] }
0x137a   : > { %v6399_v3 = vld [vmem:[#allocation10 + $0x80] sm:$0xff] }
0x137b   : > { %v5286_v44 = vrot.slane %v5278_v39, %v10738_v5  ;;  %v5293_v45 = vrot.slane %v5279_v41, %v10738_v5  ;;  %v4727_v41 = vld [vmem:[#allocation7 + $0xe8] sm:$0xff] }
0x137d   : > { %v5294_v40 = vcombine.low %v5270_v42, %v5286_v44  ;;  %v5295_v46 = vcombine.high %v5270_v42, %v5286_v44  ;;  %v5310_v47 = vcombine.low %v5277_v43, %v5293_v45  ;;  %v5311_v51 = vcombine.high %v5277_v43, %v5293_v45  ;;  %v4726_v43 = vld [vmem:[#allocation7 + $0xe0] sm:$0xff]  ;;  %v6414_v45 = vld [vmem:[#allocation10 + $0xf8] sm:$0xff] }
0x137f   : > { %v5302_v52 = vrot.slane %v5294_v40, %v10743_v12  ;;  %v5309_v55 = vrot.slane %v5295_v46, %v10743_v12  ;;  %v5318_v50 = vrot.slane %v5310_v47, %v10743_v12  ;;  %v5325_v58 = vrot.slane %v5311_v51, %v10743_v12  ;;  %v6413_v46 = vld [vmem:[#allocation10 + $0xf0] sm:$0xff]  ;;  %v6412_v51 = vld [vmem:[#allocation10 + $0xe8] sm:$0xff] }
0x1381   : > { %v5330_v59 = vcombine.low %v5302_v52, %v5309_v55  ;;  %v8595_v57 = vcombine.high %v5302_v52, %v5309_v55  ;;  %v5346_v60 = vcombine.low %v5318_v50, %v5325_v58  ;;  %v8596_v61 = vcombine.high %v5318_v50, %v5325_v58  ;;  %v6411_v52 = vld [vmem:[#allocation10 + $0xe0] sm:$0xff]  ;;  %v6410_v55 = vld [vmem:[#allocation10 + $0xd8] sm:$0xff]  ;;  %v6409_v50 = vld [vmem:[#allocation10 + $0xd0] sm:$0xff] }
0x1382   : > { %v10026_v18 = vpop.eup %10025  ;;  %v6408_v58 = vld [vmem:[#allocation10 + $0xc8] sm:$0xff] }
0x1383   : > { %v5337_v54 = vrot.slane %v5330_v59, %v10738_v5  ;;  %v5345_v62 = vrot.slane %v8595_v57, %v10738_v5  ;;  %v5353_v63 = vrot.slane %v5346_v60, %v10738_v5  ;;  %v5361_v2 = vrot.slane %v8596_v61, %v10738_v5  ;;  %v6407_v59 = vld [vmem:[#allocation10 + $0xc0] sm:$0xff]  ;;  %v6406_v57 = vld [vmem:[#allocation10 + $0xb8] sm:$0xff]  ;;  %v6405_v60 = vld [vmem:[#allocation10 + $0xb0] sm:$0xff] }
0x1384   : > { %v5752_v10 = vmul.f32 %v10026_v18, %v11448_v23  ;;  %v4714_v23 = vld [vmem:[#allocation7 + $0x80] sm:$0xff]  ;;  %v6404_v61 = vld [vmem:[#allocation10 + $0xa8] sm:$0xff] }
0x1385   : > { %v5362_v4 = vcombine.low %v5337_v54, %v5345_v62  ;;  %v5378_v11 = vcombine.low %v5353_v63, %v5361_v2  ;;  %v5363_v16 = vcombine.high %v5337_v54, %v5345_v62  ;;  %v5379_v17 = vcombine.high %v5353_v63, %v5361_v2  ;;  %9641 = vmatpush3.msra.mxu0 %v4714_v23  ;;  %v6403_v54 = vld [vmem:[#allocation10 + $0xa0] sm:$0xff]  ;;  %v6402_v62 = vld [vmem:[#allocation10 + $0x98] sm:$0xff]  ;;  %v6401_v63 = vld [vmem:[#allocation10 + $0x90] sm:$0xff] }
0x1386   : > { %v10028_v22 = vpop.eup %10027  ;;  %9656 = vmatprep.subr.mxu0 %v10325_v0  ;;  %v6400_v2 = vld [vmem:[#allocation10 + $0x88] sm:$0xff]  ;;  %v6392_v23 = vld [vmem:[#allocation9 + $0xe0] sm:$0xff] }
0x1387   : > { %v5370_v14 = vrot.slane %v5362_v4, %v10743_v12  ;;  %v5386_v15 = vrot.slane %v5378_v11, %v10743_v12  ;;  %v5377_v20 = vrot.slane %v5363_v16, %v10743_v12  ;;  %v5393_v21 = vrot.slane %v5379_v17, %v10743_v12 }
0x1388   : > { %v5753_v56 = vmul.f32 %v10028_v22, %v11452_v26  ;;  %v4718_v26 = vld [vmem:[#allocation7 + $0xa0] sm:$0xff] }
0x1389   : > { %v5394_v24 = vcombine.low %v5370_v14, %v5386_v15  ;;  %v5395_v33 = vcombine.high %v5370_v14, %v5386_v15  ;;  %v5396_v7 = vcombine.low %v5377_v20, %v5393_v21  ;;  %v5397_v25 = vcombine.high %v5377_v20, %v5393_v21 }
0x138b   : > { %9615 = vmatpush3.msra.mxu1 %v5394_v24 }
0x138c   : > { %9617 = vmatmul.mubr.msk.f32.vlgmr.msra.gmra.mxu1 %vm2024_vm3, %v5750_v6  ;;  %9619 = vmatprep.subr.mxu1 %v10325_v0  ;;  %v8613_v6 = vld [vmem:[%s11988_s12 + $0x1] ss:$0 sm:$0xff] }
0x138d   : > { %9620 = vmatpush3.msra.mxu1 %v5395_v33  ;;  %9621 = vmatprep.mubr.msk.f32.mxu1 %vm10326_vm0, %v10325_v0 }
0x138e   : > { %9624 = vmatprep.subr.mxu1 %v10325_v0 }
0x1390   : > { %9622 = vmatmul.mubr.msk.f32.vlgmr.msra.gmra.mxu1 %vm2024_vm3, %v5751_v8 }
0x1391   : > { %9625 = vmatpush3.msra.mxu1 %v5396_v7  ;;  %9626 = vmatprep.mubr.msk.f32.mxu1 %vm10326_vm0, %v10325_v0  ;;  %v8623_v7 = vld [vmem:[%s11927_s13 + $0x1] ss:$0 sm:$0xff] }
0x1392   : > { %9629 = vmatprep.subr.mxu1 %v10325_v0 }
0x1394   : > { %9627 = vmatmul.mubr.msk.f32.vlgmr.msra.gmra.mxu1 %vm2024_vm3, %v5752_v10 }
0x1395   : > { %9630 = vmatpush3.msra.mxu1 %v5397_v25  ;;  %9631 = vmatprep.mubr.msk.f32.mxu1 %vm10326_vm0, %v10325_v0 }
0x1396   : > { %9645 = vmatprep.subr.mxu1 %v10325_v0 }
0x1398   : > { %9632 = vmatmul.mubr.msk.f32.vlgmr.msra.gmra.mxu1 %vm2024_vm3, %v5753_v56  ;;  %v6395_v56 = vld [vmem:[#allocation9 + $0xf8] sm:$0xff] }
0x1399   : > { %9646 = vmatpush3.msra.mxu1 %v4721_v19  ;;  %9653 = vmatprep.mubr.msk.f32.mxu1 %vm10326_vm0, %v10325_v0  ;;  %v6394_v19 = vld [vmem:[#allocation9 + $0xf0] sm:$0xff] }
0x139a   : > { %9647 = vmatprep.subr.mxu1 %v10325_v0 }
0x139b   : > { %9648 = vmatpush3.msra.mxu1 %v4720_v27  ;;  %v6393_v27 = vld [vmem:[#allocation9 + $0xe8] sm:$0xff] }
0x139c   : > { %9649 = vmatprep.subr.mxu1 %v10325_v0 }
0x139d   : > { %9650 = vmatpush3.msra.mxu1 %v4719_v28 }
0x139e   : > { %9651 = vmatprep.subr.mxu1 %v10325_v0 }
0x139f   : > { %9652 = vmatpush3.msra.mxu1 %v4718_v26 }
0x13a0   : > { %9667 = vmatprep.subr.mxu1 %v10325_v0 }
0x144c   : > { %v5823_v30 = vpop.f32.mrf.mxu1 }
0x144d   : > { %9643 = vmatmul.mubr.msk.f32.vlgmr.msra.gmra.mxu0 %vm1708_vm1, %v5823_v30 }
0x144e   : > { %v9618_v34 = vpop.f32.mrf.mxu1  ;;  %9657 = vmatpush3.msra.mxu0 %v4725_v29  ;;  %9664 = vmatprep.mubr.msk.f32.mxu0 %vm10326_vm0, %v10325_v0 }
0x144f   : > { %9658 = vmatprep.subr.mxu0 %v10325_v0  ;;  %v6390_v34 = vld [vmem:[#allocation9 + $0xd0] sm:$0xff] }
0x1450   : > { %v5896_v36 = vpop.f32.mrf.mxu1  ;;  %9659 = vmatpush3.msra.mxu0 %v4724_v31  ;;  %v6391_v31 = vld [vmem:[#allocation9 + $0xd8] sm:$0xff] }
0x1451   : > { %9654 = vmatmul.mubr.msk.f32.vlgmr.msra.gmra.mxu1 %vm1708_vm1, %v5896_v36  ;;  %9660 = vmatprep.subr.mxu0 %v10325_v0  ;;  %v6387_v36 = vld [vmem:[#allocation9 + $0xb8] sm:$0xff] }
0x1452   : > { %9668 = vmatpush3.msra.mxu1 %v4729_v32  ;;  %v9623_v39 = vpop.f32.mrf.mxu1  ;;  %9661 = vmatpush3.msra.mxu0 %v4723_v35  ;;  %v6389_v32 = vld [vmem:[#allocation9 + $0xc8] sm:$0xff]  ;;  %v6388_v35 = vld [vmem:[#allocation9 + $0xc0] sm:$0xff] }
0x1453   : > { %9669 = vmatprep.subr.mxu1 %v10325_v0  ;;  %9662 = vmatprep.subr.mxu0 %v10325_v0  ;;  %v6384_v39 = vld [vmem:[#allocation9 + $0xa0] sm:$0xff] }
0x1454   : > { %9670 = vmatpush3.msra.mxu1 %v4728_v37  ;;  %v5969_v42 = vpop.f32.mrf.mxu1  ;;  %9663 = vmatpush3.msra.mxu0 %v4722_v38  ;;  %v6386_v37 = vld [vmem:[#allocation9 + $0xb0] sm:$0xff]  ;;  %v6385_v38 = vld [vmem:[#allocation9 + $0xa8] sm:$0xff] }
0x1455   : > { %9671 = vmatprep.subr.mxu1 %v10325_v0  ;;  %9665 = vmatmul.mubr.msk.f32.vlgmr.msra.gmra.mxu0 %vm1708_vm1, %v5969_v42  ;;  %v6382_v42 = vld [vmem:[#allocation9 + $0x90] sm:$0xff] }
0x1456   : > { %9672 = vmatpush3.msra.mxu1 %v4727_v41  ;;  %v9628_v44 = vpop.f32.mrf.mxu1  ;;  %9675 = vmatprep.mubr.msk.f32.mxu1 %vm10326_vm0, %v10325_v0  ;;  %v6383_v41 = vld [vmem:[#allocation9 + $0x98] sm:$0xff] }
0x1457   : > { %9673 = vmatprep.subr.mxu1 %v10325_v0  ;;  %9678 = vmatprep.subr.mxu0 %v10325_v0  ;;  %v6380_v44 = vld [vmem:[#allocation9 + $0x80] sm:$0xff] }
0x1458   : > { %9674 = vmatpush3.msra.mxu1 %v4726_v43  ;;  %v6042_v40 = vpop.f32.mrf.mxu1  ;;  %9710 = vmatprep.mubr.msk.f32.mxu0 %vm10326_vm0, %v10325_v0  ;;  %v6381_v43 = vld [vmem:[#allocation9 + $0x88] sm:$0xff] }
0x1459   : > { %9713 = vmatprep.subr.mxu1 %v10325_v0  ;;  %9676 = vmatmul.mubr.msk.f32.vlgmr.msra.gmra.mxu1 %vm1708_vm1, %v6042_v40 }
0x145a   : > { %9714 = vmatpush3.msra.mxu1 %v6414_v45  ;;  %v9633_v47 = vpop.f32.mrf.mxu1  ;;  %9745 = vmatprep.mubr.msk.f32.mxu1 %vm10326_vm0, %v10325_v0 }
0x145b   : > { %9715 = vmatprep.subr.mxu1 %v10325_v0  ;;  %9679 = vmatpush3.msra.mxu0 %v6395_v56 }
0x145c   : > { %9716 = vmatpush3.msra.mxu1 %v6413_v46  ;;  %9680 = vmatprep.subr.mxu0 %v10325_v0 }
0x145d   : > { %9717 = vmatprep.subr.mxu1 %v10325_v0  ;;  %9681 = vmatpush3.msra.mxu0 %v6394_v19 }
0x145e   : > { %9718 = vmatpush3.msra.mxu1 %v6412_v51  ;;  %9682 = vmatprep.subr.mxu0 %v10325_v0 }
0x145f   : > { %9719 = vmatprep.subr.mxu1 %v10325_v0  ;;  %9683 = vmatpush3.msra.mxu0 %v6393_v27 }
0x1460   : > { %9720 = vmatpush3.msra.mxu1 %v6411_v52  ;;  %9684 = vmatprep.subr.mxu0 %v10325_v0 }
0x1461   : > { %9721 = vmatprep.subr.mxu1 %v10325_v0  ;;  %9685 = vmatpush3.msra.mxu0 %v6392_v23  ;;  %v8617_v23 = vld [vmem:[%s11937_s23 + $0x1] ss:$0 sm:$0xff] }
0x1462   : > { %9722 = vmatpush3.msra.mxu1 %v6410_v55  ;;  %9686 = vmatprep.subr.mxu0 %v10325_v0 }
0x1463   : > { %9723 = vmatprep.subr.mxu1 %v10325_v0  ;;  %9687 = vmatpush3.msra.mxu0 %v6391_v31 }
0x1464   : > { %9724 = vmatpush3.msra.mxu1 %v6409_v50  ;;  %9688 = vmatprep.subr.mxu0 %v10325_v0 }
0x1465   : > { %9725 = vmatprep.subr.mxu1 %v10325_v0  ;;  %9689 = vmatpush3.msra.mxu0 %v6390_v34 }
0x1466   : > { %9726 = vmatpush3.msra.mxu1 %v6408_v58  ;;  %9690 = vmatprep.subr.mxu0 %v10325_v0 }
0x1467   : > { %9727 = vmatprep.subr.mxu1 %v10325_v0  ;;  %9691 = vmatpush3.msra.mxu0 %v6389_v32 }
0x1468   : > { %9728 = vmatpush3.msra.mxu1 %v6407_v59  ;;  %9692 = vmatprep.subr.mxu0 %v10325_v0 }
0x1469   : > { %9729 = vmatprep.subr.mxu1 %v10325_v0  ;;  %9693 = vmatpush3.msra.mxu0 %v6388_v35  ;;  %v6433_v35 = vld [vmem:[#allocation12 + $0xf8] sm:$0xff] }
0x146a   : > { %9730 = vmatpush3.msra.mxu1 %v6406_v57  ;;  %9694 = vmatprep.subr.mxu0 %v10325_v0 }
0x146b   : > { %9731 = vmatprep.subr.mxu1 %v10325_v0  ;;  %9695 = vmatpush3.msra.mxu0 %v6387_v36  ;;  %v6432_v36 = vld [vmem:[#allocation12 + $0xf0] sm:$0xff] }
0x146c   : > { %9732 = vmatpush3.msra.mxu1 %v6405_v60  ;;  %9696 = vmatprep.subr.mxu0 %v10325_v0 }
0x146d   : > { %9733 = vmatprep.subr.mxu1 %v10325_v0  ;;  %9697 = vmatpush3.msra.mxu0 %v6386_v37  ;;  %v6431_v37 = vld [vmem:[#allocation12 + $0xe8] sm:$0xff] }
0x146e   : > { %9734 = vmatpush3.msra.mxu1 %v6404_v61  ;;  %9698 = vmatprep.subr.mxu0 %v10325_v0 }
0x146f   : > { %9735 = vmatprep.subr.mxu1 %v10325_v0  ;;  %9699 = vmatpush3.msra.mxu0 %v6385_v38  ;;  %v6430_v38 = vld [vmem:[#allocation12 + $0xe0] sm:$0xff] }
0x1470   : > { %9736 = vmatpush3.msra.mxu1 %v6403_v54  ;;  %9700 = vmatprep.subr.mxu0 %v10325_v0 }
0x1471   : > { %9737 = vmatprep.subr.mxu1 %v10325_v0  ;;  %9701 = vmatpush3.msra.mxu0 %v6384_v39  ;;  %v6429_v39 = vld [vmem:[#allocation12 + $0xd8] sm:$0xff] }
0x1472   : > { %9738 = vmatpush3.msra.mxu1 %v6402_v62  ;;  %9702 = vmatprep.subr.mxu0 %v10325_v0 }
0x1473   : > { %9739 = vmatprep.subr.mxu1 %v10325_v0  ;;  %9703 = vmatpush3.msra.mxu0 %v6383_v41  ;;  %v6428_v41 = vld [vmem:[#allocation12 + $0xd0] sm:$0xff] }
0x1474   : > { %9740 = vmatpush3.msra.mxu1 %v6401_v63  ;;  %9704 = vmatprep.subr.mxu0 %v10325_v0 }
0x1475   : > { %9741 = vmatprep.subr.mxu1 %v10325_v0  ;;  %9705 = vmatpush3.msra.mxu0 %v6382_v42  ;;  %v6427_v42 = vld [vmem:[#allocation12 + $0xc8] sm:$0xff] }
0x1476   : > { %9742 = vmatpush3.msra.mxu1 %v6400_v2  ;;  %9706 = vmatprep.subr.mxu0 %v10325_v0 }
0x1477   : > { %9743 = vmatprep.subr.mxu1 %v10325_v0  ;;  %9707 = vmatpush3.msra.mxu0 %v6381_v43  ;;  %v6426_v43 = vld [vmem:[#allocation12 + $0xc0] sm:$0xff] }
0x1478   : > { %9744 = vmatpush3.msra.mxu1 %v6399_v3  ;;  %9708 = vmatprep.subr.mxu0 %v10325_v0 }
0x1479   : > { %9746 = vmatmul.mubr.f32.vlgmr.msra.gmra.mxu1 %v11329_v53  ;;  %9783 = vmatprep.subr.mxu1 %v10325_v0 }
0x147a   : > { %9785 = vmatprep.mubr.msk.f32.mxu1 %vm10326_vm0, %v10325_v0  ;;  %9709 = vmatpush3.msra.mxu0 %v6380_v44  ;;  %v6425_v44 = vld [vmem:[#allocation12 + $0xb8] sm:$0xff] }
0x147b   : > { %9748 = vmatprep.subr.mxu0 %v10325_v0 }
0x150d   : > { %v6115_v4 = vpop.f32.mrf.mxu0 }
0x150f   : > { %v9644_v11 = vpop.f32.mrf.mxu0 }
0x1511   : > { %v6188_v13 = vpop.f32.mrf.mxu1 }
0x1512   : > { %v6338_v16 = vadd.f32 %v6188_v13, %v6115_v4 }
0x1513   : > { %v9655_v14 = vpop.f32.mrf.mxu1 }
0x1515   : > { %v6261_v15 = vpop.f32.mrf.mxu0 }
0x1516   : > { %v6339_v24 = vadd.f32 %v6338_v16, %v6261_v15 }
0x1517   : > { %v9666_v17 = vpop.f32.mrf.mxu0 }
0x1519   : > { %v6334_v9 = vpop.f32.mrf.mxu1 }
0x151a   : > { %v6340_v33 = vadd.f32 %v6339_v24, %v6334_v9 }
0x151b   : > { %v9677_v20 = vpop.f32.mrf.mxu1 }
0x151c   : > { %v6347_v21 = vadd.f32 %v8613_v6, %v6340_v33 }
0x151e   : > { %v6348_v8 = vmax.f32 %v6347_v21, 0.0 }
0x1520   : > { %v6353_v18 = vadd.f32 %v6348_v8, %v11329_v53 }
0x1522   : > { %6354 = vadd.xlane.f32.xlu1 %v6353_v18 }
0x1539   : > { %v6603_v10 = vpop.f32.mrf.mxu1 }
0x153a   : > { %v11547_v22 = vadd.f32 %v8623_v7, %v6603_v10 }
0x153b   : > { %v9747_v25 = vpop.f32.mrf.mxu1 }
0x153c   : > { %6833 = vrot.lane.b32.xlu1 %v11547_v22, %s11990_s4 }
0x1540   : > { %6836 = vrot.lane.b32.xlu1 %v11547_v22, %s11992_s30 }
0x15ab   : > { %v6355_v28 = vpop.xlane.xlu1 %6354 }
0x15ac   : > { %v6356_v26 = vmul.f32 0.0078125, %v6355_v28 }
0x15ae   : > { %v11557_v29 = vsub.f32 %v6353_v18, %v6356_v26 }
0x15af   : > { %v6834_v45 = vpop.permute.xlu1 %6833 }
0x15b0   : > { %v6358_v30 = vmul.f32 %v11557_v29, %v11557_v29  ;;  %v6839_v47 = vcombine.low %v11547_v22, %v6834_v45  ;;  %v6840_v51 = vcombine.high %v11547_v22, %v6834_v45  ;;  %v6424_v45 = vld [vmem:[#allocation12 + $0xb0] sm:$0xff] }
0x15b2   : > { %6359 = vadd.xlane.f32.xlu0 %v6358_v30  ;;  %v6847_v57 = vrot.slane %v6839_v47, %v10738_v5  ;;  %v6854_v60 = vrot.slane %v6840_v51, %v10738_v5  ;;  %v6421_v47 = vld [vmem:[#allocation12 + $0x98] sm:$0xff]  ;;  %v6420_v51 = vld [vmem:[#allocation12 + $0x90] sm:$0xff] }
0x15b3   : > { %v6837_v55 = vpop.permute.xlu1 %6836 }
0x15c8   : > { %6830 = vrot.lane.b32.xlu0 %v11547_v22, %s11991_s3  ;;  %v8616_v22 = vld [vmem:[%s11936_s22 + $0x1] ss:$0 sm:$0xff] }
0x163b   : > { %v6360_v40 = vpop.xlane.xlu0 %6359 }
0x163c   : > { %v6361_v46 = vmul.f32 0.0078125, %v6360_v40  ;;  %v6423_v40 = vld [vmem:[#allocation12 + $0xa8] sm:$0xff] }
0x163e   : > { %v6362_v52 = vadd.f32 1e-05, %v6361_v46  ;;  %v6422_v46 = vld [vmem:[#allocation12 + $0xa0] sm:$0xff] }
0x163f   : > { %v6831_v50 = vpop.permute.xlu0 %6830 }
0x1640   : > { %10029 = vrsqrt.f32 %v6362_v52  ;;  %v6855_v58 = vcombine.low %v6831_v50, %v6837_v55  ;;  %v6856_v59 = vcombine.high %v6831_v50, %v6837_v55  ;;  %v6419_v52 = vld [vmem:[#allocation12 + $0x88] sm:$0xff]  ;;  %v6418_v55 = vld [vmem:[#allocation12 + $0x80] sm:$0xff] }
0x1641   : > { %v8622_v50 = vld [vmem:[%s11989_s29 + $0x1] ss:$0 sm:$0xff] }
0x1642   : > { %v6863_v61 = vrot.slane %v6855_v58, %v10738_v5  ;;  %v6870_v54 = vrot.slane %v6856_v59, %v10738_v5 }
0x1644   : > { %v6871_v62 = vcombine.low %v6847_v57, %v6863_v61  ;;  %v6872_v63 = vcombine.high %v6847_v57, %v6863_v61  ;;  %v6887_v2 = vcombine.low %v6854_v60, %v6870_v54  ;;  %v6888_v3 = vcombine.high %v6854_v60, %v6870_v54 }
0x1646   : > { %v6879_v4 = vrot.slane %v6871_v62, %v10743_v12  ;;  %v6886_v11 = vrot.slane %v6872_v63, %v10743_v12  ;;  %v6895_v13 = vrot.slane %v6887_v2, %v10743_v12  ;;  %v6902_v14 = vrot.slane %v6888_v3, %v10743_v12 }
0x1648   : > { %v6907_v15 = vcombine.low %v6879_v4, %v6886_v11  ;;  %v8627_v16 = vcombine.high %v6879_v4, %v6886_v11  ;;  %v6923_v17 = vcombine.low %v6895_v13, %v6902_v14  ;;  %v8628_v24 = vcombine.high %v6895_v13, %v6902_v14 }
0x164a   : > { %v6914_v6 = vrot.slane %v6907_v15, %v10738_v5  ;;  %v6922_v9 = vrot.slane %v8627_v16, %v10738_v5  ;;  %v6930_v33 = vrot.slane %v6923_v17, %v10738_v5  ;;  %v6938_v20 = vrot.slane %v8628_v24, %v10738_v5 }
0x164c   : > { %v6939_v21 = vcombine.low %v6914_v6, %v6922_v9  ;;  %v6940_v8 = vcombine.high %v6914_v6, %v6922_v9  ;;  %v6955_v18 = vcombine.low %v6930_v33, %v6938_v20  ;;  %v6956_v7 = vcombine.high %v6930_v33, %v6938_v20 }
0x164d   : > { %v10030_v10 = vpop.eup %10029 }
0x164e   : > { %v11593_v25 = vrot.slane %v6939_v21, %v10743_v12  ;;  %v11596_v56 = vrot.slane %v6955_v18, %v10743_v12  ;;  %v6364_v19 = vmul.f32 %v10030_v10, %v11557_v29  ;;  %v11600_v27 = vrot.slane %v6940_v8, %v10743_v12 }
0x164f   : > { %v11606_v28 = vrot.slane %v6956_v7, %v10743_v12 }
0x1650   : > { %v6971_v26 = vcombine.low %v11593_v25, %v11596_v56  ;;  %v6371_v30 = vmul.f32 %v8616_v22, %v6364_v19  ;;  %v6972_v31 = vcombine.high %v11593_v25, %v11596_v56 }
0x1651   : > { %v6973_v29 = vcombine.low %v11600_v27, %v11606_v28  ;;  %v6974_v34 = vcombine.high %v11600_v27, %v11606_v28 }
0x1652   : > { %9784 = vmatpush3.xpose.msk.msra.mxu1 %vm1708_vm1, %v6971_v26  ;;  %v11617_v32 = vadd.f32 %v8617_v23, %v6371_v30 }
0x1653   : > { %9788 = vmatprep.subr.mxu1 %v10325_v0 }
0x1654   : > { %9711 = vmatmul.mubr.f32.vlgmr.msra.gmra.mxu0 %v11617_v32 }
0x1655   : > { %9749 = vmatpush3.msra.mxu0 %v6433_v35  ;;  %9780 = vmatprep.mubr.msk.f32.mxu0 %vm10326_vm0, %v10325_v0 }
0x1656   : > { %9750 = vmatprep.subr.mxu0 %v10325_v0 }
0x1657   : > { %9751 = vmatpush3.msra.mxu0 %v6432_v36 }
0x1658   : > { %9752 = vmatprep.subr.mxu0 %v10325_v0 }
0x1659   : > { %9753 = vmatpush3.msra.mxu0 %v6431_v37 }
0x165a   : > { %9754 = vmatprep.subr.mxu0 %v10325_v0 }
0x165b   : > { %9755 = vmatpush3.msra.mxu0 %v6430_v38 }
0x165c   : > { %9756 = vmatprep.subr.mxu0 %v10325_v0 }
0x165d   : > { %9757 = vmatpush3.msra.mxu0 %v6429_v39 }
0x165e   : > { %9758 = vmatprep.subr.mxu0 %v10325_v0 }
0x165f   : > { %9759 = vmatpush3.msra.mxu0 %v6428_v41 }
0x1660   : > { %9760 = vmatprep.subr.mxu0 %v10325_v0 }
0x1661   : > { %9761 = vmatpush3.msra.mxu0 %v6427_v42 }
0x1662   : > { %9762 = vmatprep.subr.mxu0 %v10325_v0 }
0x1663   : > { %9763 = vmatpush3.msra.mxu0 %v6426_v43 }
0x1664   : > { %9764 = vmatprep.subr.mxu0 %v10325_v0 }
0x1665   : > { %9765 = vmatpush3.msra.mxu0 %v6425_v44 }
0x1666   : > { %9766 = vmatprep.subr.mxu0 %v10325_v0 }
0x1667   : > { %9767 = vmatpush3.msra.mxu0 %v6424_v45 }
0x1668   : > { %9768 = vmatprep.subr.mxu0 %v10325_v0 }
0x1669   : > { %9769 = vmatpush3.msra.mxu0 %v6423_v40 }
0x166a   : > { %9770 = vmatprep.subr.mxu0 %v10325_v0 }
0x166b   : > { %9771 = vmatpush3.msra.mxu0 %v6422_v46 }
0x166c   : > { %9772 = vmatprep.subr.mxu0 %v10325_v0 }
0x166d   : > { %9773 = vmatpush3.msra.mxu0 %v6421_v47 }
0x166e   : > { %9774 = vmatprep.subr.mxu0 %v10325_v0 }
0x166f   : > { %9775 = vmatpush3.msra.mxu0 %v6420_v51 }
0x1670   : > { %9776 = vmatprep.subr.mxu0 %v10325_v0 }
0x1671   : > { %9777 = vmatpush3.msra.mxu0 %v6419_v52 }
0x1672   : > { %9778 = vmatprep.subr.mxu0 %v10325_v0 }
0x1673   : > { %9779 = vmatpush3.msra.mxu0 %v6418_v55 }
0x1674   : > { %9781 = vmatmul.mubr.f32.vlgmr.msra.gmra.mxu0 %v11329_v53  ;;  %9823 = vmatprep.subr.mxu0 %v10325_v0 }
0x1675   : > { %9831 = vmatprep.mubr.msk.f32.mxu0 %vm10326_vm0, %v10325_v0 }
0x1714   : > { %v6527_v58 = vpop.f32.mrf.mxu0 }
0x1715   : > { %v6528_v59 = vadd.f32 %v8622_v50, %v6527_v58 }
0x1716   : > { %v9712_v57 = vpop.f32.mrf.mxu0 }
0x1717   : > { %6687 = vrot.lane.b32.xlu1 %v6528_v59, %s11990_s4  ;;  %6684 = vrot.lane.b32.xlu0 %v6528_v59, %s11991_s3 }
0x171b   : > { %6690 = vrot.lane.b32.xlu0 %v6528_v59, %s11992_s30 }
0x1734   : > { %v11648_v60 = vpop.f32.mrf.mxu0 }
0x1736   : > { %v9782_v53 = vpop.f32.mrf.mxu0 }
0x1737   : > { %v8624_v53 = vld [vmem:[%s11929_s15 + $0x1] ss:$0 sm:$0xff] }
0x1789   : > { %v6688_v61 = vpop.permute.xlu1 %6687  ;;  %v6685_v54 = vpop.permute.xlu0 %6684 }
0x178a   : > { %v6693_v62 = vcombine.low %v6528_v59, %v6688_v61  ;;  %v6694_v63 = vcombine.high %v6528_v59, %v6688_v61  ;;  %v6680_v61 = vadd.f32 %v8624_v53, %v11648_v60 }
0x178c   : > { %v6701_v11 = vrot.slane %v6693_v62, %v10738_v5  ;;  %v6708_v13 = vrot.slane %v6694_v63, %v10738_v5 }
0x178d   : > { %v6691_v2 = vpop.permute.xlu0 %6690 }
0x178e   : > { %v6709_v3 = vcombine.low %v6685_v54, %v6691_v2  ;;  %v6710_v4 = vcombine.high %v6685_v54, %v6691_v2 }
0x1790   : > { %v6717_v14 = vrot.slane %v6709_v3, %v10738_v5  ;;  %v6724_v15 = vrot.slane %v6710_v4, %v10738_v5 }
0x1792   : > { %v6725_v16 = vcombine.low %v6701_v11, %v6717_v14  ;;  %v6726_v17 = vcombine.high %v6701_v11, %v6717_v14  ;;  %v6741_v24 = vcombine.low %v6708_v13, %v6724_v15  ;;  %v6742_v6 = vcombine.high %v6708_v13, %v6724_v15 }
0x1794   : > { %v6733_v9 = vrot.slane %v6725_v16, %v10743_v12  ;;  %v6740_v33 = vrot.slane %v6726_v17, %v10743_v12  ;;  %v6749_v20 = vrot.slane %v6741_v24, %v10743_v12  ;;  %v6756_v21 = vrot.slane %v6742_v6, %v10743_v12 }
0x1796   : > { %v6761_v8 = vcombine.low %v6733_v9, %v6740_v33  ;;  %v8625_v18 = vcombine.high %v6733_v9, %v6740_v33  ;;  %v6777_v7 = vcombine.low %v6749_v20, %v6756_v21  ;;  %v8626_v10 = vcombine.high %v6749_v20, %v6756_v21 }
0x1798   : > { %v6768_v22 = vrot.slane %v6761_v8, %v10738_v5  ;;  %v6776_v19 = vrot.slane %v8625_v18, %v10738_v5  ;;  %v6784_v23 = vrot.slane %v6777_v7, %v10738_v5  ;;  %v6792_v26 = vrot.slane %v8626_v10, %v10738_v5  ;;  %v6440_v18 = vld [vmem:[#allocation13 + $0x98] sm:$0xff]  ;;  %v6439_v7 = vld [vmem:[#allocation13 + $0x90] sm:$0xff]  ;;  %v6438_v10 = vld [vmem:[#allocation13 + $0x88] sm:$0xff] }
0x1799   : > { %9824 = vmatpush3.msra.mxu0 %v6440_v18  ;;  %v6448_v18 = vld [vmem:[#allocation13 + $0xd8] sm:$0xff] }
0x179a   : > { %v6793_v30 = vcombine.low %v6768_v22, %v6776_v19  ;;  %v6809_v35 = vcombine.low %v6784_v23, %v6792_v26  ;;  %v6794_v38 = vcombine.high %v6768_v22, %v6776_v19  ;;  %v6810_v39 = vcombine.high %v6784_v23, %v6792_v26  ;;  %9825 = vmatprep.subr.mxu0 %v10325_v0 }
0x179b   : > { %9826 = vmatpush3.msra.mxu0 %v6439_v7 }
0x179c   : > { %v6801_v36 = vrot.slane %v6793_v30, %v10743_v12  ;;  %v6817_v37 = vrot.slane %v6809_v35, %v10743_v12  ;;  %v6808_v43 = vrot.slane %v6794_v38, %v10743_v12  ;;  %v6824_v44 = vrot.slane %v6810_v39, %v10743_v12  ;;  %9827 = vmatprep.subr.mxu0 %v10325_v0 }
0x179d   : > { %9828 = vmatpush3.msra.mxu0 %v6438_v10  ;;  %v6447_v10 = vld [vmem:[#allocation13 + $0xd0] sm:$0xff] }
0x179e   : > { %v6825_v41 = vcombine.low %v6801_v36, %v6817_v37  ;;  %v6826_v42 = vcombine.high %v6801_v36, %v6817_v37  ;;  %v6827_v25 = vcombine.low %v6808_v43, %v6824_v44  ;;  %v6828_v56 = vcombine.high %v6808_v43, %v6824_v44  ;;  %9829 = vmatprep.subr.mxu0 %v10325_v0 }
0x17a0   : > { %9786 = vmatmul.mubr.msk.f32.vlgmr.msra.gmra.mxu1 %vm1708_vm1, %v6825_v41 }
0x17a1   : > { %9789 = vmatpush3.xpose.msk.msra.mxu1 %vm1708_vm1, %v6972_v31  ;;  %9790 = vmatprep.mubr.msk.f32.mxu1 %vm10326_vm0, %v10325_v0 }
0x17a2   : > { %9793 = vmatprep.subr.mxu1 %v10325_v0 }
0x17a4   : > { %9791 = vmatmul.mubr.msk.f32.vlgmr.msra.gmra.mxu1 %vm1708_vm1, %v6826_v42 }
0x17a5   : > { %9794 = vmatpush3.xpose.msk.msra.mxu1 %vm1708_vm1, %v6973_v29  ;;  %9795 = vmatprep.mubr.msk.f32.mxu1 %vm10326_vm0, %v10325_v0 }
0x17a6   : > { %9798 = vmatprep.subr.mxu1 %v10325_v0 }
0x17a8   : > { %9796 = vmatmul.mubr.msk.f32.vlgmr.msra.gmra.mxu1 %vm1708_vm1, %v6827_v25 }
0x17a9   : > { %9799 = vmatpush3.xpose.msk.msra.mxu1 %vm1708_vm1, %v6974_v34  ;;  %9800 = vmatprep.mubr.msk.f32.mxu1 %vm10326_vm0, %v10325_v0 }
0x17aa   : > { %9803 = vmatprep.subr.mxu1 %v10325_v0 }
0x17ac   : > { %9801 = vmatmul.mubr.msk.f32.vlgmr.msra.gmra.mxu1 %vm1708_vm1, %v6828_v56 }
0x17ad   : > { %9805 = vmatprep.mubr.msk.f32.mxu1 %vm10326_vm0, %v10325_v0 }
0x1860   : > { %v7193_v31 = vpop.f32.mrf.mxu1 }
0x1861   : > { %v7425_v29 = vmul.f32 0.17677669, %v7193_v31 }
0x1862   : > { %v9787_v45 = vpop.f32.mrf.mxu1 }
0x1863   : > { %v7429_v40 = vsel %vm2024_vm3, %v7425_v29, -inf }
0x1864   : > { %7430 = vmax.xlane.f32.xlu1 %v7429_v40  ;;  %v7269_v27 = vpop.f32.mrf.mxu1 }
0x1865   : > { %v7426_v28 = vmul.f32 0.17677669, %v7269_v27 }
0x1866   : > { %v9792_v34 = vpop.f32.mrf.mxu1 }
0x1867   : > { %v7432_v46 = vsel %vm2024_vm3, %v7426_v28, -inf }
0x1868   : > { %7433 = vmax.xlane.f32.xlu0 %v7432_v46  ;;  %v7345_v47 = vpop.f32.mrf.mxu1 }
0x1869   : > { %v7427_v51 = vmul.f32 0.17677669, %v7345_v47 }
0x186a   : > { %v9797_v52 = vpop.f32.mrf.mxu1 }
0x186b   : > { %v7435_v55 = vsel %vm2024_vm3, %v7427_v51, -inf }
0x186c   : > { %7436 = vmax.xlane.f32.xlu0 %v7435_v55  ;;  %v7421_v50 = vpop.f32.mrf.mxu1 }
0x186d   : > { %v7428_v58 = vmul.f32 0.17677669, %v7421_v50 }
0x186e   : > { %v9802_v59 = vpop.f32.mrf.mxu1 }
0x186f   : > { %v7438_v57 = vsel %vm2024_vm3, %v7428_v58, -inf }
0x1870   : > { %7439 = vmax.xlane.f32.xlu1 %v7438_v57 }
0x1881   : > { %6976 = vrot.lane.b32.xlu1 %v6680_v61, %s11991_s3  ;;  %s971_s3 = scalar_lea.vmem %s11942_s28, %s11993_s11 }
0x18ed   : > { %v7431_v54 = vpop.xlane.xlu1 %7430 }
0x18ee   : > { %v7441_v62 = vsub.f32 %v7425_v29, %v7431_v54 }
0x18f0   : > { %v7445_v63 = vmul.f32 1.442695, %v7441_v62 }
0x18f1   : > { %v7434_v2 = vpop.xlane.xlu0 %7433 }
0x18f2   : > { %10031 = vpow2.f32 %v7445_v63  ;;  %v7442_v3 = vsub.f32 %v7426_v28, %v7434_v2 }
0x18f4   : > { %v7447_v4 = vmul.f32 1.442695, %v7442_v3 }
0x18f5   : > { %v7437_v11 = vpop.xlane.xlu0 %7436 }
0x18f6   : > { %10033 = vpow2.f32 %v7447_v4  ;;  %v7443_v13 = vsub.f32 %v7427_v51, %v7437_v11 }
0x18f8   : > { %v7449_v14 = vmul.f32 1.442695, %v7443_v13 }
0x18f9   : > { %v7440_v9 = vpop.xlane.xlu1 %7439 }
0x18fa   : > { %10035 = vpow2.f32 %v7449_v14  ;;  %v7444_v33 = vsub.f32 %v7428_v58, %v7440_v9 }
0x18fc   : > { %v7451_v20 = vmul.f32 1.442695, %v7444_v33  ;;  %v6444_v33 = vld [vmem:[#allocation13 + $0xb8] sm:$0xff] }
0x18fd   : > { %v6977_v22 = vpop.permute.xlu1 %6976 }
0x18fe   : > { %10037 = vpow2.f32 %v7451_v20  ;;  %v6443_v20 = vld [vmem:[#allocation13 + $0xb0] sm:$0xff] }
0x18ff   : > { %v11702_v15 = vpop.eup %10031 }
0x1900   : > { %v7453_v16 = vsel %vm2024_vm3, %v11702_v15, 0.0 }
0x1901   : > { %7454 = vadd.xlane.f32.xlu0 %v7453_v16 }
0x1903   : > { %v11706_v60 = vpop.eup %10033 }
0x1904   : > { %v7456_v17 = vsel %vm2024_vm3, %v11706_v60, 0.0 }
0x1905   : > { %7457 = vadd.xlane.f32.xlu1 %v7456_v17 }
0x1907   : > { %v11710_v24 = vpop.eup %10035 }
0x1908   : > { %v7459_v6 = vsel %vm2024_vm3, %v11710_v24, 0.0 }
0x1909   : > { %7460 = vadd.xlane.f32.xlu0 %v7459_v6 }
0x190b   : > { %v11716_v21 = vpop.eup %10037 }
0x190c   : > { %v7462_v8 = vsel %vm2024_vm3, %v11716_v21, 0.0 }
0x1916   : > { %6982 = vrot.lane.b32.xlu1 %v6680_v61, %s11992_s30 }
0x191f   : > { %6979 = vrot.lane.b32.xlu0 %v6680_v61, %s11990_s4 }
0x193a   : > { %7463 = vadd.xlane.f32.xlu1 %v7462_v8  ;;  %v6442_v8 = vld [vmem:[#allocation13 + $0xa8] sm:$0xff] }
0x198a   : > { %v7455_v19 = vpop.xlane.xlu0 %7454 }
0x198b   : > { %10039 = vrcp.f32 %v7455_v19  ;;  %v6446_v19 = vld [vmem:[#allocation13 + $0xc8] sm:$0xff] }
0x198e   : > { %v7458_v23 = vpop.xlane.xlu1 %7457 }
0x198f   : > { %10041 = vrcp.f32 %v7458_v23  ;;  %v6452_v23 = vld [vmem:[#allocation13 + $0xf8] sm:$0xff] }
0x1992   : > { %v7461_v26 = vpop.xlane.xlu0 %7460  ;;  %v6983_v30 = vpop.permute.xlu1 %6982 }
0x1993   : > { %v7001_v35 = vcombine.low %v6977_v22, %v6983_v30  ;;  %v7002_v36 = vcombine.high %v6977_v22, %v6983_v30  ;;  %10043 = vrcp.f32 %v7461_v26  ;;  %v6445_v30 = vld [vmem:[#allocation13 + $0xc0] sm:$0xff] }
0x1995   : > { %v7009_v41 = vrot.slane %v7001_v35, %v10738_v5  ;;  %v7016_v42 = vrot.slane %v7002_v36, %v10738_v5  ;;  %v6451_v35 = vld [vmem:[#allocation13 + $0xf0] sm:$0xff] }
0x1996   : > { %v6980_v37 = vpop.permute.xlu0 %6979 }
0x1997   : > { %v6985_v38 = vcombine.low %v6680_v61, %v6980_v37  ;;  %v6986_v39 = vcombine.high %v6680_v61, %v6980_v37  ;;  %v6450_v37 = vld [vmem:[#allocation13 + $0xe8] sm:$0xff] }
0x1998   : > { %v10040_v53 = vpop.eup %10039 }
0x1999   : > { %v6993_v43 = vrot.slane %v6985_v38, %v10738_v5  ;;  %v7000_v44 = vrot.slane %v6986_v39, %v10738_v5  ;;  %v7469_v3 = vmul.f32 %v10040_v53, %v11702_v15  ;;  %v6449_v39 = vld [vmem:[#allocation13 + $0xe0] sm:$0xff]  ;;  %v8677_v53 = vld [vmem:[%s11932_s18 + $0x1c8] sm:$0xff] }
0x199b   : > { %v7017_v25 = vcombine.low %v6993_v43, %v7009_v41  ;;  %v7018_v56 = vcombine.high %v6993_v43, %v7009_v41  ;;  %v7033_v31 = vcombine.low %v7000_v44, %v7016_v42  ;;  %v7034_v29 = vcombine.high %v7000_v44, %v7016_v42 }
0x199c   : > { %v10042_v4 = vpop.eup %10041 }
0x199d   : > { %v7025_v45 = vrot.slane %v7017_v25, %v10743_v12  ;;  %v7032_v40 = vrot.slane %v7018_v56, %v10743_v12  ;;  %v7041_v27 = vrot.slane %v7033_v31, %v10743_v12  ;;  %v7048_v28 = vrot.slane %v7034_v29, %v10743_v12 }
0x199f   : > { %v7053_v34 = vcombine.low %v7025_v45, %v7032_v40  ;;  %v8629_v46 = vcombine.high %v7025_v45, %v7032_v40  ;;  %v7069_v47 = vcombine.low %v7041_v27, %v7048_v28  ;;  %v8630_v51 = vcombine.high %v7041_v27, %v7048_v28  ;;  %v8647_v28 = vld [vmem:[%s11931_s17 + $0x1] ss:$0 sm:$0xff] }
0x19a0   : > { %v10044_v15 = vpop.eup %10043 }
0x19a1   : > { %v7060_v52 = vrot.slane %v7053_v34, %v10738_v5  ;;  %v7068_v55 = vrot.slane %v8629_v46, %v10738_v5  ;;  %v7076_v50 = vrot.slane %v7069_v47, %v10738_v5  ;;  %v7084_v58 = vrot.slane %v8630_v51, %v10738_v5 }
0x19a2   : > { %v7470_v5 = vmul.f32 %v10042_v4, %v11706_v60  ;;  %v8674_v4 = vld [vmem:[%s11932_s18 + $0x1b0] sm:$0xff] }
0x19a3   : > { %v7085_v59 = vcombine.low %v7060_v52, %v7068_v55  ;;  %v7101_v57 = vcombine.low %v7076_v50, %v7084_v58  ;;  %v7086_v62 = vcombine.high %v7060_v52, %v7068_v55  ;;  %v7102_v63 = vcombine.high %v7076_v50, %v7084_v58  ;;  %v8683_v55 = vld [vmem:[%s11932_s18 + $0x1f8] sm:$0xff]  ;;  %v8682_v50 = vld [vmem:[%s11932_s18 + $0x1f0] sm:$0xff]  ;;  %v8681_v58 = vld [vmem:[%s11932_s18 + $0x1e8] sm:$0xff] }
0x19a5   : > { %v7093_v61 = vrot.slane %v7085_v59, %v10743_v12  ;;  %v7109_v54 = vrot.slane %v7101_v57, %v10743_v12  ;;  %v7100_v13 = vrot.slane %v7086_v62, %v10743_v12  ;;  %v7116_v14 = vrot.slane %v7102_v63, %v10743_v12  ;;  %v8680_v59 = vld [vmem:[%s11932_s18 + $0x1e0] sm:$0xff]  ;;  %v8678_v57 = vld [vmem:[%s11932_s18 + $0x1d0] sm:$0xff] }
0x19a6   : > { %v7471_v12 = vmul.f32 %v10044_v15, %v11710_v24  ;;  %v6437_v24 = vld [vmem:[#allocation13 + $0x80] sm:$0xff]  ;;  %v8669_v15 = vld [vmem:[%s11932_s18 + $0x188] sm:$0xff] }
0x19a7   : > { %v7117_v2 = vcombine.low %v7093_v61, %v7109_v54  ;;  %v7118_v11 = vcombine.high %v7093_v61, %v7109_v54  ;;  %v7119_v16 = vcombine.low %v7100_v13, %v7116_v14  ;;  %v7120_v17 = vcombine.high %v7100_v13, %v7116_v14  ;;  %9830 = vmatpush3.msra.mxu0 %v6437_v24  ;;  %v8676_v61 = vld [vmem:[%s11932_s18 + $0x1c0] sm:$0xff]  ;;  %v8671_v14 = vld [vmem:[%s11932_s18 + $0x198] sm:$0xff]  ;;  %v8661_v24 = vld [vmem:[%s11932_s18 + $0x148] sm:$0xff] }
0x19a8   : > { %9845 = vmatprep.subr.mxu0 %v10325_v0  ;;  %v8672_v13 = vld [vmem:[%s11932_s18 + $0x1a0] sm:$0xff] }
0x19a9   : > { %9804 = vmatpush3.msra.mxu1 %v7117_v2 }
0x19aa   : > { %9806 = vmatmul.mubr.msk.f32.vlgmr.msra.gmra.mxu1 %vm2024_vm3, %v7469_v3  ;;  %9808 = vmatprep.subr.mxu1 %v10325_v0  ;;  %v8675_v3 = vld [vmem:[%s11932_s18 + $0x1b8] sm:$0xff] }
0x19ab   : > { %9809 = vmatpush3.msra.mxu1 %v7118_v11  ;;  %9810 = vmatprep.mubr.msk.f32.mxu1 %vm10326_vm0, %v10325_v0  ;;  %v8673_v11 = vld [vmem:[%s11932_s18 + $0x1a8] sm:$0xff] }
0x19ac   : > { %9813 = vmatprep.subr.mxu1 %v10325_v0 }
0x19ae   : > { %9811 = vmatmul.mubr.msk.f32.vlgmr.msra.gmra.mxu1 %vm2024_vm3, %v7470_v5  ;;  %v8670_v5 = vld [vmem:[%s11932_s18 + $0x190] sm:$0xff] }
0x19af   : > { %9814 = vmatpush3.msra.mxu1 %v7119_v16  ;;  %9815 = vmatprep.mubr.msk.f32.mxu1 %vm10326_vm0, %v10325_v0  ;;  %v8668_v16 = vld [vmem:[%s11932_s18 + $0x180] sm:$0xff] }
0x19b0   : > { %9818 = vmatprep.subr.mxu1 %v10325_v0 }
0x19b2   : > { %9816 = vmatmul.mubr.msk.f32.vlgmr.msra.gmra.mxu1 %vm2024_vm3, %v7471_v12  ;;  %v8667_v12 = vld [vmem:[%s11932_s18 + $0x178] sm:$0xff] }
0x19b3   : > { %9819 = vmatpush3.msra.mxu1 %v7120_v17  ;;  %9820 = vmatprep.mubr.msk.f32.mxu1 %vm10326_vm0, %v10325_v0  ;;  %v8666_v17 = vld [vmem:[%s11932_s18 + $0x170] sm:$0xff] }
0x19b4   : > { %9834 = vmatprep.subr.mxu1 %v10325_v0 }
0x19c3   : > { %v7464_v60 = vpop.xlane.xlu1 %7463 }
0x19c4   : > { %10045 = vrcp.f32 %v7464_v60  ;;  %v8665_v60 = vld [vmem:[%s11932_s18 + $0x168] sm:$0xff] }
0x19d1   : > { %v10046_v6 = vpop.eup %10045 }
0x19d2   : > { %v7472_v9 = vmul.f32 %v10046_v6, %v11716_v21  ;;  %v6441_v21 = vld [vmem:[#allocation13 + $0xa0] sm:$0xff] }
0x19d3   : > { %v8664_v6 = vld [vmem:[%s11932_s18 + $0x160] sm:$0xff] }
0x19d4   : > { %9821 = vmatmul.mubr.msk.f32.vlgmr.msra.gmra.mxu1 %vm2024_vm3, %v7472_v9  ;;  %v8663_v9 = vld [vmem:[%s11932_s18 + $0x158] sm:$0xff] }
0x19d5   : > { %9835 = vmatpush3.msra.mxu1 %v6444_v33  ;;  %9842 = vmatprep.mubr.msk.f32.mxu1 %vm10326_vm0, %v10325_v0  ;;  %v8662_v33 = vld [vmem:[%s11932_s18 + $0x150] sm:$0xff] }
0x19d6   : > { %9836 = vmatprep.subr.mxu1 %v10325_v0 }
0x19d7   : > { %9837 = vmatpush3.msra.mxu1 %v6443_v20  ;;  %v8660_v20 = vld [vmem:[%s11932_s18 + $0x140] sm:$0xff] }
0x19d8   : > { %9838 = vmatprep.subr.mxu1 %v10325_v0 }
0x19d9   : > { %9839 = vmatpush3.msra.mxu1 %v6442_v8  ;;  %v8659_v8 = vld [vmem:[%s11932_s18 + $0x138] sm:$0xff] }
0x19da   : > { %9840 = vmatprep.subr.mxu1 %v10325_v0 }
0x19db   : > { %9841 = vmatpush3.msra.mxu1 %v6441_v21  ;;  %v8658_v21 = vld [vmem:[%s11932_s18 + $0x130] sm:$0xff] }
0x19dc   : > { %9856 = vmatprep.subr.mxu1 %v10325_v0 }
0x1a6a   : > { %v7542_v7 = vpop.f32.mrf.mxu1 }
0x1a6b   : > { %9832 = vmatmul.mubr.msk.f32.vlgmr.msra.gmra.mxu0 %vm1708_vm1, %v7542_v7  ;;  %v8656_v7 = vld [vmem:[%s11932_s18 + $0x120] sm:$0xff] }
0x1a6c   : > { %v9807_v22 = vpop.f32.mrf.mxu1  ;;  %9846 = vmatpush3.msra.mxu0 %v6448_v18  ;;  %9853 = vmatprep.mubr.msk.f32.mxu0 %vm10326_vm0, %v10325_v0  ;;  %v8657_v18 = vld [vmem:[%s11932_s18 + $0x128] sm:$0xff] }
0x1a6d   : > { %9847 = vmatprep.subr.mxu0 %v10325_v0  ;;  %v8654_v22 = vld [vmem:[%s11932_s18 + $0x110] sm:$0xff] }
0x1a6e   : > { %v7615_v26 = vpop.f32.mrf.mxu1  ;;  %9848 = vmatpush3.msra.mxu0 %v6447_v10  ;;  %v8655_v10 = vld [vmem:[%s11932_s18 + $0x118] sm:$0xff] }
0x1a6f   : > { %9843 = vmatmul.mubr.msk.f32.vlgmr.msra.gmra.mxu1 %vm1708_vm1, %v7615_v26  ;;  %9849 = vmatprep.subr.mxu0 %v10325_v0  ;;  %v8249_v26 = vld [vmem:[#allocation15 + $0x1f8] sm:$0xff] }
0x1a70   : > { %v9812_v36 = vpop.f32.mrf.mxu1  ;;  %9850 = vmatpush3.msra.mxu0 %v6446_v19  ;;  %9857 = vmatpush3.msra.mxu1 %v6452_v23  ;;  %v8653_v19 = vld [vmem:[%s11932_s18 + $0x108] sm:$0xff]  ;;  %v8652_v23 = vld [vmem:[%s11932_s18 + $0x100] sm:$0xff] }
0x1a71   : > { %9851 = vmatprep.subr.mxu0 %v10325_v0  ;;  %9858 = vmatprep.subr.mxu1 %v10325_v0  ;;  %v8232_v36 = vld [vmem:[#allocation15 + $0x170] sm:$0xff] }
0x1a72   : > { %v7688_v38 = vpop.f32.mrf.mxu1  ;;  %9852 = vmatpush3.msra.mxu0 %v6445_v30  ;;  %9859 = vmatpush3.msra.mxu1 %v6451_v35  ;;  %v8233_v30 = vld [vmem:[#allocation15 + $0x178] sm:$0xff]  ;;  %v8248_v35 = vld [vmem:[#allocation15 + $0x1f0] sm:$0xff] }
0x1a73   : > { %9854 = vmatmul.mubr.msk.f32.vlgmr.msra.gmra.mxu0 %vm1708_vm1, %v7688_v38  ;;  %9860 = vmatprep.subr.mxu1 %v10325_v0  ;;  %v8231_v38 = vld [vmem:[#allocation15 + $0x168] sm:$0xff] }
0x1a74   : > { %v9817_v41 = vpop.f32.mrf.mxu1  ;;  %9861 = vmatpush3.msra.mxu1 %v6450_v37  ;;  %9864 = vmatprep.mubr.msk.f32.mxu1 %vm10326_vm0, %v10325_v0  ;;  %v8247_v37 = vld [vmem:[#allocation15 + $0x1e8] sm:$0xff] }
0x1a75   : > { %9862 = vmatprep.subr.mxu1 %v10325_v0  ;;  %8208 = vmatprep.mubr.f32.mxu0 %v10325_v0  ;;  %v8230_v41 = vld [vmem:[#allocation15 + $0x160] sm:$0xff] }
0x1a76   : > { %9863 = vmatpush3.msra.mxu1 %v6449_v39  ;;  %8144 = vmatprep.subr.mxu0 %v8683_v55  ;;  %v8246_v39 = vld [vmem:[#allocation15 + $0x1e0] sm:$0xff] }
0x1a77   : > { %8145 = vmatpush1.msra.mxu0 %v8682_v50  ;;  %9076 = vmatprep.subr.mxu1 %v8249_v26  ;;  %v8689_v26 = vld [vmem:[%s11940_s26 + $0x1] ss:$0 sm:$0xff] }
0x1a78   : > { %8146 = vmatprep.subr.mxu0 %v8681_v58 }
0x1a79   : > { %8147 = vmatpush1.msra.mxu0 %v8680_v59  ;;  %v8650_v59 = vld [vmem:[%s11938_s24 + $0x1] ss:$0 sm:$0xff] }
0x1a94   : > { %v7761_v42 = vpop.f32.mrf.mxu1 }
0x1a95   : > { %9865 = vmatmul.mubr.msk.f32.vlgmr.msra.gmra.mxu1 %vm1708_vm1, %v7761_v42  ;;  %v8245_v42 = vld [vmem:[#allocation15 + $0x1d8] sm:$0xff] }
0x1a96   : > { %v9822_v43 = vpop.f32.mrf.mxu1  ;;  %9077 = vmatpush3.msra.mxu1 %v8233_v30 }
0x1a97   : > { %9078 = vmatprep.subr.mxu1 %v8248_v35  ;;  %v8229_v43 = vld [vmem:[#allocation15 + $0x158] sm:$0xff]  ;;  %v8690_v35 = vld [vmem:[%s11941_s27 + $0x1] ss:$0 sm:$0xff] }
0x1a98   : > { %9079 = vmatpush3.msra.mxu1 %v8232_v36 }
0x1a99   : > { %9080 = vmatprep.subr.mxu1 %v8247_v37 }
0x1a9a   : > { %9081 = vmatpush3.msra.mxu1 %v8231_v38 }
0x1a9b   : > { %9082 = vmatprep.subr.mxu1 %v8246_v39 }
0x1a9c   : > { %9083 = vmatpush3.msra.mxu1 %v8230_v41 }
0x1a9d   : > { %9084 = vmatprep.subr.mxu1 %v8245_v42 }
0x1a9e   : > { %9085 = vmatpush3.msra.mxu1 %v8229_v43 }
0x1b2b   : > { %v7834_v44 = vpop.f32.mrf.mxu0 }
0x1b2d   : > { %v9833_v25 = vpop.f32.mrf.mxu0 }
0x1b2e   : > { %v8228_v25 = vld [vmem:[#allocation15 + $0x150] sm:$0xff] }
0x1b2f   : > { %v7907_v56 = vpop.f32.mrf.mxu1 }
0x1b30   : > { %v8057_v40 = vadd.f32 %v7907_v56, %v7834_v44  ;;  %v8244_v44 = vld [vmem:[#allocation15 + $0x1d0] sm:$0xff]  ;;  %v8243_v56 = vld [vmem:[#allocation15 + $0x1c8] sm:$0xff] }
0x1b31   : > { %v9844_v31 = vpop.f32.mrf.mxu1  ;;  %9086 = vmatprep.subr.mxu1 %v8244_v44 }
0x1b32   : > { %v8227_v31 = vld [vmem:[#allocation15 + $0x148] sm:$0xff]  ;;  %9087 = vmatpush3.msra.mxu1 %v8228_v25 }
0x1b33   : > { %v7980_v29 = vpop.f32.mrf.mxu0  ;;  %9088 = vmatprep.subr.mxu1 %v8243_v56 }
0x1b34   : > { %v8058_v27 = vadd.f32 %v8057_v40, %v7980_v29  ;;  %v8242_v29 = vld [vmem:[#allocation15 + $0x1c0] sm:$0xff]  ;;  %9089 = vmatpush3.msra.mxu1 %v8227_v31  ;;  %v8241_v40 = vld [vmem:[#allocation15 + $0x1b8] sm:$0xff] }
0x1b35   : > { %v9855_v45 = vpop.f32.mrf.mxu0  ;;  %9090 = vmatprep.subr.mxu1 %v8242_v29 }
0x1b36   : > { %v8226_v45 = vld [vmem:[#allocation15 + $0x140] sm:$0xff] }
0x1b37   : > { %9091 = vmatpush3.msra.mxu1 %v8226_v45 }
0x1b38   : > { %9092 = vmatprep.subr.mxu1 %v8241_v40 }
0x1b55   : > { %v8053_v34 = vpop.f32.mrf.mxu1 }
0x1b56   : > { %v8059_v46 = vadd.f32 %v8058_v27, %v8053_v34  ;;  %v8225_v27 = vld [vmem:[#allocation15 + $0x138] sm:$0xff]  ;;  %v8224_v34 = vld [vmem:[#allocation15 + $0x130] sm:$0xff] }
0x1b57   : > { %v9866_v0 = vpop.f32.mrf.mxu1  ;;  %9093 = vmatpush3.msra.mxu1 %v8225_v27 }
0x1b58   : > { %v8066_v47 = vadd.f32 %v8647_v28, %v8059_v46  ;;  %v8240_v28 = vld [vmem:[#allocation15 + $0x1b0] sm:$0xff]  ;;  %v8239_v46 = vld [vmem:[#allocation15 + $0x1a8] sm:$0xff] }
0x1b59   : > { %9094 = vmatprep.subr.mxu1 %v8240_v28  ;;  %v8223_v0 = vld [vmem:[#allocation15 + $0x128] sm:$0xff] }
0x1b5a   : > { %v8067_v51 = vmax.f32 %v8066_v47, 0.0  ;;  %9095 = vmatpush3.msra.mxu1 %v8224_v34  ;;  %v8238_v47 = vld [vmem:[#allocation15 + $0x1a0] sm:$0xff] }
0x1b5b   : > { %9096 = vmatprep.subr.mxu1 %v8239_v46 }
0x1b5c   : > { %v8072_v52 = vadd.f32 %v8067_v51, %v11617_v32  ;;  %v8679_v32 = vld [vmem:[%s11932_s18 + $0x1d8] sm:$0xff]  ;;  %v8222_v51 = vld [vmem:[#allocation15 + $0x120] sm:$0xff]  ;;  %9097 = vmatpush3.msra.mxu1 %v8223_v0 }
0x1b5d   : > { %8148 = vmatprep.subr.mxu0 %v8679_v32  ;;  %9098 = vmatprep.subr.mxu1 %v8238_v47 }
0x1b5e   : > { %8073 = vadd.xlane.f32.xlu0 %v8072_v52  ;;  %8149 = vmatpush1.msra.mxu0 %v8678_v57  ;;  %v8651_v57 = vld [vmem:[%s11939_s25 + $0x1] ss:$0 sm:$0xff] }
0x1b5f   : > { %8150 = vmatprep.subr.mxu0 %v8677_v53  ;;  %9099 = vmatpush3.msra.mxu1 %v8222_v51 }
0x1b60   : > { %8151 = vmatpush1.msra.mxu0 %v8676_v61 }
0x1b61   : > { %8152 = vmatprep.subr.mxu0 %v8675_v3  ;;  %v8220_v3 = vld [vmem:[#allocation15 + $0x110] sm:$0xff] }
0x1b62   : > { %8153 = vmatpush1.msra.mxu0 %v8674_v4  ;;  %v8235_v4 = vld [vmem:[#allocation15 + $0x188] sm:$0xff] }
0x1b63   : > { %8154 = vmatprep.subr.mxu0 %v8673_v11  ;;  %v8219_v11 = vld [vmem:[#allocation15 + $0x108] sm:$0xff] }
0x1b64   : > { %8155 = vmatpush1.msra.mxu0 %v8672_v13  ;;  %v8234_v13 = vld [vmem:[#allocation15 + $0x180] sm:$0xff] }
0x1b65   : > { %8156 = vmatprep.subr.mxu0 %v8671_v14  ;;  %v8684_v14 = vld [vmem:[%s11933_s19 + $0x2] sm:$0x3] }
0x1b66   : > { %8157 = vmatpush1.msra.mxu0 %v8670_v5  ;;  %v8137_v5 = vrot.slane %v8684_v14, %v4438_v49 }
0x1b67   : > { %8158 = vmatprep.subr.mxu0 %v8669_v15  ;;  %v8141_v15 = vrot.slane %v8684_v14, %v4442_v48 }
0x1b68   : > { %8159 = vmatpush1.msra.mxu0 %v8668_v16 }
0x1b69   : > { %8160 = vmatprep.subr.mxu0 %v8667_v12 }
0x1b6a   : > { %8161 = vmatpush1.msra.mxu0 %v8666_v17 }
0x1b6b   : > { %8162 = vmatprep.subr.mxu0 %v8665_v60 }
0x1b6c   : > { %8163 = vmatpush1.msra.mxu0 %v8664_v6 }
0x1b6d   : > { %8164 = vmatprep.subr.mxu0 %v8663_v9 }
0x1b6e   : > { %8165 = vmatpush1.msra.mxu0 %v8662_v33 }
0x1b6f   : > { %8166 = vmatprep.subr.mxu0 %v8661_v24  ;;  %v8686_v24 = vld [vmem:[%s11935_s21 + $0x1] ss:$0 sm:$0xff] }
0x1b70   : > { %8167 = vmatpush1.msra.mxu0 %v8660_v20 }
0x1b71   : > { %8168 = vmatprep.subr.mxu0 %v8659_v8 }
0x1b72   : > { %8169 = vmatpush1.msra.mxu0 %v8658_v21 }
0x1b73   : > { %8170 = vmatprep.subr.mxu0 %v8657_v18 }
0x1b74   : > { %8171 = vmatpush1.msra.mxu0 %v8656_v7 }
0x1b75   : > { %8172 = vmatprep.subr.mxu0 %v8655_v10 }
0x1b76   : > { %8173 = vmatpush1.msra.mxu0 %v8654_v22 }
0x1b77   : > { %8174 = vmatprep.subr.mxu0 %v8653_v19 }
0x1b78   : > { %8175 = vmatpush1.msra.mxu0 %v8652_v23 }
0x1be7   : > { %v8074_v54 = vpop.xlane.xlu0 %8073 }
0x1be8   : > { %v8075_v62 = vmul.f32 0.0078125, %v8074_v54  ;;  %v8237_v54 = vld [vmem:[#allocation15 + $0x198] sm:$0xff] }
0x1be9   : > { %9100 = vmatprep.subr.mxu1 %v8237_v54 }
0x1bea   : > { %v11807_v63 = vsub.f32 %v8072_v52, %v8075_v62  ;;  %v8221_v62 = vld [vmem:[#allocation15 + $0x118] sm:$0xff] }
0x1beb   : > { %9101 = vmatpush3.msra.mxu1 %v8221_v62 }
0x1bec   : > { %v8077_v2 = vmul.f32 %v11807_v63, %v11807_v63 }
0x1bee   : > { %8078 = vadd.xlane.f32.xlu0 %v8077_v2  ;;  %v8236_v2 = vld [vmem:[#allocation15 + $0x190] sm:$0xff] }
0x1bef   : > { %9102 = vmatprep.subr.mxu1 %v8236_v2 }
0x1bf0   : > { %9103 = vmatpush3.msra.mxu1 %v8220_v3 }
0x1bf1   : > { %9104 = vmatprep.subr.mxu1 %v8235_v4 }
0x1bf2   : > { %9105 = vmatpush3.msra.mxu1 %v8219_v11 }
0x1bf3   : > { %9106 = vmatprep.subr.mxu1 %v8234_v13 }
0x1c77   : > { %v8079_v52 = vpop.xlane.xlu0 %8078 }
0x1c78   : > { %v8080_v55 = vmul.f32 0.0078125, %v8079_v52 }
0x1c7a   : > { %v8081_v50 = vadd.f32 1e-05, %v8080_v55 }
0x1c7c   : > { %10047 = vrsqrt.f32 %v8081_v50 }
0x1c89   : > { %v10048_v58 = vpop.eup %10047 }
0x1c8a   : > { %v8083_v32 = vmul.f32 %v10048_v58, %v11807_v63  ;;  %v8218_v63 = vld [vmem:[#allocation15 + $0x100] sm:$0xff] }
0x1c8b   : > { %9107 = vmatpush3.msra.mxu1 %v8218_v63 }
0x1c8c   : > { %v8090_v53 = vmul.f32 %v8650_v59, %v8083_v32 }
0x1c8e   : > { %v8097_v61 = vadd.f32 %v8651_v57, %v8090_v53 }
0x1c90   : > { %8209 = vmatmul.mubr.f32.vlgmr.msra.gmra.mxu0 %v8097_v61 }
0x1d50   : > { %v8210_v16 = vpop.f32.mrf.mxu0 }
0x1d51   : > { %v8211_v12 = vadd.f32 %v8210_v16, %v8137_v5 }
0x1d52   : > { %v8212_v17 = vpop.f32.mrf.mxu0 }
0x1d53   : > { %v8213_v60 = vadd.f32 %v8212_v17, %v8141_v15  ;;  %v8215_v9 = vmax.f32 %v8211_v12, 0.0 }
0x1d55   : > { %v8216_v6 = vmax.f32 %v8213_v60, 0.0 }
0x1d57   : > { %8322 = vmatprep.mubr.f32.mxu1 %v8216_v6 }
0x1d58   : > { %8323 = vmatmul.mubr.f32.vlgmr.msra.gmra.mxu1 %v8215_v9 }
0x1e18   : > { %v9108_v33 = vpop.f32.mrf.mxu1 }
0x1e1a   : > { %v9109_v20 = vpop.f32.mrf.mxu1 }
0x1e1b   : > { %v9110_v8 = vadd.f32 %v9109_v20, %v9108_v33 }
0x1e1d   : > { %v8325_v21 = vadd.f32 %v9110_v8, %v8686_v24 }
0x1e1f   : > { %v8332_v49 = vadd.f32 %v8325_v21, %v8097_v61 }
0x1e21   : > { %8333 = vadd.xlane.f32.xlu1 %v8332_v49 }
0x1eaa   : > { %v8334_v1 = vpop.xlane.xlu1 %8333 }
0x1eab   : > { %v8335_v48 = vmul.f32 0.0078125, %v8334_v1 }
0x1ead   : > { %v8336_v18 = vsub.f32 %v8332_v49, %v8335_v48 }
0x1eaf   : > { %v8337_v7 = vmul.f32 %v8336_v18, %v8336_v18 }
0x1eb1   : > { %8338 = vadd.xlane.f32.xlu0 %v8337_v7 }
0x1f3a   : > { %v8339_v10 = vpop.xlane.xlu0 %8338 }
0x1f3b   : > { %v8340_v22 = vmul.f32 0.0078125, %v8339_v10 }
0x1f3d   : > { %v8341_v19 = vadd.f32 1e-05, %v8340_v22 }
0x1f3f   : > { %10049 = vrsqrt.f32 %v8341_v19 }
0x1f4c   : > { %v10050_v23 = vpop.eup %10049 }
0x1f4d   : > { %v8343_v30 = vmul.f32 %v10050_v23, %v8336_v18 }
0x1f4f   : > { %v8350_v36 = vmul.f32 %v8689_v26, %v8343_v30 }
0x1f51   : > { %v8357_v37 = vadd.f32 %v8690_v35, %v8350_v36 }
0x1f53   : > { %8358 = vst [vmem:[%s971_s3] sm:$0xff] %v8357_v37 }
0x1f54 PF: > { %s11994_s30 = sld [smem:[#allocation21_spill]] }
0x1f5a   : > { %s43_s8 = sadd.s32 1, %s11994_s30  }
0x1f5b   : > { %p40_p3 = scmp.ge.s32.totalorder %s43_s8, 4  }
0x1f5d   :  { %42 = sbr.rel (!%p40_p3) target bundleno = 20 (0x14), region = 225 }
0x1f62   :  { %8378 = vsyncpa [#allocation3], 1 }
0x1f63   :  { %8380 = vsyncpa [#allocation3 + $0x1], 1 }
0x1f64   :  { %8381 = vsyncpa [#allocation5], 1 }
0x1f65   :  { %8382 = vsyncpa [#allocation8], 1 }
0x1f66   :  { %8383 = vsyncpa [#allocation11], 1 }
0x1f67   :  { %8384 = vsyncpa [#allocation14], 1 }

</bundles_post_ra>
